<compile_context>
chip_gen: v6e
topology: v6e:2x2x1
jax: 0.10.0
libtpu: 0.0.40
codegen_flags: <defaults>
</compile_context>

<pallas_src>
import functools

import jax
import jax.numpy as jnp
import numpy as np
from jax.experimental import pallas as pl
from jax.experimental.pallas import tpu as pltpu


def _round_up(x, m):
    return (x + m - 1) // m * m


def _cdiv(a, b):
    return -(-a // b)


def _choose_m_tiling(M, max_tile_m):
    """Pick (tile_m, Mp, grid_m): tile_m multiple of 16, Mp = grid_m * tile_m >= M.

    Does NOT require tile_m to divide M (pads a few zero rows instead), and
    guarantees >= 2 grid steps when Mp >= 32 so v7x megacore can split the
    'parallel' M axis across its two TensorCores.
    """
    Mp = _round_up(M, 16)                      # bf16 sublane pack, not 128
    grid_m = max(1, _cdiv(Mp, max_tile_m))
    if grid_m == 1 and Mp >= 32:
        grid_m = 2                             # keep both v7x TCs busy
    tile_m = _round_up(_cdiv(Mp, grid_m), 16)  # balanced tile, 16-row aligned
    Mp = grid_m * tile_m
    return tile_m, Mp, grid_m


# ----------------------------------------------------------------------------
# Pallas kernel 1: conv GEMM  relu(A @ W + b), de-padded N store
# ----------------------------------------------------------------------------
def _matmul_bias_relu_kernel(a_ref, w_ref, b_ref, o_ref, *, n_out):
    acc = jnp.dot(a_ref[...], w_ref[...], preferred_element_type=jnp.float32)
    acc = jnp.maximum(acc + b_ref[...], 0.0)
    # Weights stay 128-wide for the MXU; store only the useful channels.
    o_ref[...] = acc[:, :n_out].astype(o_ref.dtype)


def conv_gemm(patches, w_p, b_p, n_out, *, max_tile_m=2048):
    """patches: (M, Kp) bf16 (Kp already padded to a multiple of 128).
    w_p: (Kp, 128) bf16, b_p: (1, 128) f32. Returns (M, n_out) bf16."""
    M, Kp = patches.shape
    Kw, Np = w_p.shape
    assert Kp == Kw and Kp % 128 == 0 and Np % 128 == 0 and n_out <= Np

    tile_m, Mp, grid_m = _choose_m_tiling(M, max_tile_m)
    a = patches if Mp == M else jnp.pad(patches, ((0, Mp - M), (0, 0)))

    flops = 2 * Mp * Kp * Np
    bytes_accessed = Mp * Kp * 2 + Kp * Np * 2 + Np * 4 + Mp * n_out * 2

    out = pl.pallas_call(
        functools.partial(_matmul_bias_relu_kernel, n_out=n_out),
        out_shape=jax.ShapeDtypeStruct((Mp, n_out), jnp.bfloat16),
        grid=(grid_m,),
        in_specs=[
            pl.BlockSpec((tile_m, Kp), lambda i: (i, 0)),   # A row tile
            pl.BlockSpec((Kp, Np), lambda i: (0, 0)),       # full W (VMEM-resident)
            pl.BlockSpec((1, Np), lambda i: (0, 0)),        # bias
        ],
        out_specs=pl.BlockSpec((tile_m, n_out), lambda i: (i, 0)),
        compiler_params=pltpu.CompilerParams(dimension_semantics=("parallel",)),
        cost_estimate=pl.CostEstimate(
            flops=flops, transcendentals=0, bytes_accessed=bytes_accessed),
    )(a, w_p, b_p)
    return out[:M]


# ----------------------------------------------------------------------------
# Pallas kernel 2: fused FC head  q = relu(A @ W1 + b1) @ W2 + b2
# ----------------------------------------------------------------------------
def _fc_fused_kernel(a_ref, w1_ref, b1_ref, w2_ref, b2_ref, o_ref, *, n_out):
    h = jnp.dot(a_ref[...], w1_ref[...], preferred_element_type=jnp.float32)
    h = jnp.maximum(h + b1_ref[...], 0.0).astype(jnp.bfloat16)   # hidden stays on-chip
    q = jnp.dot(h, w2_ref[...], preferred_element_type=jnp.float32) + b2_ref[...]
    o_ref[...] = q[:, :n_out].astype(o_ref.dtype)


def fc_head(x_flat, w1_p, b1_p, w2_p, b2_p, n_out, *, max_tile_m=256):
    """x_flat: (M, Kp) bf16 (Kp padded); w1_p: (Kp, 512) bf16; w2_p: (512, 128) bf16.
    Returns (M, n_out) f32 Q-values."""
    M, Kp = x_flat.shape
    K1, N1 = w1_p.shape
    K2, N2 = w2_p.shape
    assert Kp == K1 and N1 == K2 and N2 % 128 == 0 and n_out <= N2

    tile_m, Mp, grid_m = _choose_m_tiling(M, max_tile_m)
    a = x_flat if Mp == M else jnp.pad(x_flat, ((0, Mp - M), (0, 0)))

    flops = 2 * Mp * (K1 * N1 + K2 * N2)
    bytes_accessed = (Mp * Kp * 2 + K1 * N1 * 2 + K2 * N2 * 2
                      + (N1 + N2) * 4 + Mp * n_out * 4)

    out = pl.pallas_call(
        functools.partial(_fc_fused_kernel, n_out=n_out),
        out_shape=jax.ShapeDtypeStruct((Mp, n_out), jnp.float32),
        grid=(grid_m,),
        in_specs=[
            pl.BlockSpec((tile_m, Kp), lambda i: (i, 0)),   # A row tile
            pl.BlockSpec((K1, N1), lambda i: (0, 0)),       # full W_fc1 (3.2 MiB bf16)
            pl.BlockSpec((1, N1), lambda i: (0, 0)),
            pl.BlockSpec((K2, N2), lambda i: (0, 0)),       # full W_fc2
            pl.BlockSpec((1, N2), lambda i: (0, 0)),
        ],
        out_specs=pl.BlockSpec((tile_m, n_out), lambda i: (i, 0)),
        compiler_params=pltpu.CompilerParams(dimension_semantics=("parallel",)),
        cost_estimate=pl.CostEstimate(
            flops=flops, transcendentals=0, bytes_accessed=bytes_accessed),
    )(a, w1_p, b1_p, w2_p, b2_p)
    return out[:M]


# ----------------------------------------------------------------------------
# Conv2d (valid padding) via NHWC im2col + Pallas GEMM; activations stay NHWC.
# ----------------------------------------------------------------------------
def _im2col_nhwc(x, k, s, k_pad):
    """x: (B, H, W, C) -> patches (B*OH*OW, k_pad), K ordered (kh, kw, c);
    extra K columns (if any) are emitted as zeros by the same producer fusion."""
    B, H, W, C = x.shape
    OH = (H - k) // s + 1
    OW = (W - k) // s + 1
    cols = []
    for i in range(k):
        for j in range(k):
            cols.append(x[:, i:i + s * (OH - 1) + 1:s,
                          j:j + s * (OW - 1) + 1:s, :])        # (B, OH, OW, C)
    patches = jnp.stack(cols, axis=3)                           # (B, OH, OW, k*k, C)
    patches = patches.reshape(B * OH * OW, k * k * C)
    if k_pad > k * k * C:
        patches = jnp.pad(patches, ((0, 0), (0, k_pad - k * k * C)))
    return patches, OH, OW


def conv2d_relu(x, w_p, b_p, c_out, *, k, s, max_tile_m=2048):
    """x: (B, H, W, C) bf16 NHWC (already de-padded); returns (B, OH, OW, c_out) bf16."""
    B = x.shape[0]
    patches, OH, OW = _im2col_nhwc(x, k, s, w_p.shape[0])
    y = conv_gemm(patches, w_p, b_p, c_out, max_tile_m=max_tile_m)
    return y.reshape(B, OH, OW, c_out)


# ----------------------------------------------------------------------------
# One-time parameter preparation (pad + transpose OUTSIDE the per-step hot path)
# ----------------------------------------------------------------------------
def prepare_params(params):
    def prep_conv_w(w):
        c_out, c_in, kh, kw = w.shape
        wt = jnp.transpose(w, (2, 3, 1, 0)).reshape(kh * kw * c_in, c_out)
        kp = _round_up(kh * kw * c_in, 128)
        n_p = _round_up(c_out, 128)
        wt = jnp.pad(wt, ((0, kp - kh * kw * c_in), (0, n_p - c_out)))
        return wt.astype(jnp.bfloat16)

    def prep_bias(b, n_p):
        n = b.shape[0]
        return jnp.pad(b.astype(jnp.float32).reshape(1, n), ((0, 0), (0, n_p - n)))

    prep = {
        "w1": prep_conv_w(params["conv1_w"]), "b1": prep_bias(params["conv1_b"], 128),
        "w2": prep_conv_w(params["conv2_w"]), "b2": prep_bias(params["conv2_b"], 128),
        "w3": prep_conv_w(params["conv3_w"]), "b3": prep_bias(params["conv3_b"], 128),
    }

    # fc1: PyTorch flattens (B, 64, 7, 7) channel-major (c, h, w); our activations
    # are flattened (h, w, c), so permute the weight's K axis once here.
    fc1_w = params["fc1_w"]                                    # (512, 3136)
    n_hidden, k_in = fc1_w.shape
    assert k_in == 64 * 7 * 7, k_in
    fc1 = fc1_w.reshape(n_hidden, 64, 7, 7)                    # (out, c, h, w)
    fc1 = jnp.transpose(fc1, (0, 2, 3, 1)).reshape(n_hidden, k_in)   # (out, h*w*c)
    fc1 = fc1.T                                                # (3136, 512)
    kp = _round_up(k_in, 128)                                  # 3200
    prep["w_fc1"] = jnp.pad(fc1, ((0, kp - k_in), (0, 0))).astype(jnp.bfloat16)
    prep["b_fc1"] = prep_bias(params["fc1_b"], 512)

    fc2_w = params["fc2_w"]                                    # (out_features, 512)
    out_f = fc2_w.shape[0]
    n_p = _round_up(out_f, 128)
    prep["w_fc2"] = jnp.pad(fc2_w.T, ((0, 0), (0, n_p - out_f))).astype(jnp.bfloat16)
    prep["b_fc2"] = prep_bias(params["fc2_b"], n_p)
    return prep


# ----------------------------------------------------------------------------
# StateToQValues forward (same architecture / semantics as the PyTorch module)
# ----------------------------------------------------------------------------
def state_to_q_values(obs, prep, *, out_features):
    assert obs.ndim == 4, f"obs.shape={obs.shape!r}"
    B = obs.shape[0]
    x = jnp.transpose(obs, (0, 2, 3, 1)).astype(jnp.bfloat16)        # NCHW -> NHWC
    x = conv2d_relu(x, prep["w1"], prep["b1"], 32, k=8, s=4)         # (B, 20, 20, 32)
    x = conv2d_relu(x, prep["w2"], prep["b2"], 64, k=4, s=2)         # (B,  9,  9, 64)
    x = conv2d_relu(x, prep["w3"], prep["b3"], 64, k=3, s=1)         # (B,  7,  7, 64)
    x = x.reshape(B, 7 * 7 * 64)                                     # (h, w, c) flatten
    kp = prep["w_fc1"].shape[0]
    if kp > x.shape[1]:                                              # K pad fused into flatten
        x = jnp.pad(x, ((0, 0), (0, kp - x.shape[1])))
    q = fc_head(x, prep["w_fc1"], prep["b_fc1"],
                prep["w_fc2"], prep["b_fc2"], out_features)          # (B, out_features) f32
    return q


# ----------------------------------------------------------------------------
# Deterministic parameter init (same shapes as the torch module)
# ----------------------------------------------------------------------------
def init_params(key, out_features):
    shapes = {
        "conv1_w": (32, 4, 8, 8),   "conv1_b": (32,),
        "conv2_w": (64, 32, 4, 4),  "conv2_b": (64,),
        "conv3_w": (64, 64, 3, 3),  "conv3_b": (64,),
        "fc1_w": (512, 3136),       "fc1_b": (512,),
        "fc2_w": (out_features, 512), "fc2_b": (out_features,),
    }
    fan_in = {"conv1": 4 * 8 * 8, "conv2": 32 * 4 * 4, "conv3": 64 * 3 * 3,
              "fc1": 3136, "fc2": 512}
    params = {}
    keys = jax.random.split(key, len(shapes))
    for k_rng, (name, shp) in zip(keys, sorted(shapes.items())):
        bound = 1.0 / np.sqrt(fan_in[name.split("_")[0]])
        params[name] = jax.random.uniform(
            k_rng, shp, dtype=jnp.float32, minval=-bound, maxval=bound)
    return params


# ----------------------------------------------------------------------------
# Pure-JAX f32 reference (lax.conv) for a loose numerical sanity check
# ----------------------------------------------------------------------------
def reference_forward(obs, params):
    x = obs.astype(jnp.float32)
    for w, b, s in [(params["conv1_w"], params["conv1_b"], 4),
                    (params["conv2_w"], params["conv2_b"], 2),
                    (params["conv3_w"], params["conv3_b"], 1)]:
        x = jax.lax.conv_general_dilated(
            x, w, window_strides=(s, s), padding="VALID",
            dimension_numbers=("NCHW", "OIHW", "NCHW"))
        x = jnp.maximum(x + b.reshape(1, -1, 1, 1), 0.0)
    x = x.reshape(x.shape[0], -1)
    x = jnp.maximum(x @ params["fc1_w"].T + params["fc1_b"], 0.0)
    return x @ params["fc2_w"].T + params["fc2_b"]


if __name__ == "__main__":
    out_features = 18  # full Atari action set (Montezuma's Revenge)
    key = jax.random.PRNGKey(0)
    k_param, k_obs = jax.random.split(key)

    params = init_params(k_param, out_features)
    # Linear(3136, 512) implies 4x84x84 inputs; keep batch small.
    obs = jax.random.normal(k_obs, (2, 4, 84, 84), dtype=jnp.float32)

    prep = jax.block_until_ready(prepare_params(params))   # one-time weight prep

    fwd = jax.jit(functools.partial(state_to_q_values, out_features=out_features))
    q = jax.block_until_ready(fwd(obs, prep))
    assert q.shape == (2, out_features), q.shape

    # Loose sanity check vs an f32 XLA reference (bf16 MXU operands -> ~1% error).
    q_ref = jax.block_until_ready(reference_forward(obs, params))
    np.testing.assert_allclose(np.asarray(q), np.asarray(q_ref), rtol=0.1, atol=0.1)

    print("KERNEL_OK")
</pallas_src>

<mosaic_0001>
module attributes {stable_mosaic.version = 11 : i64} {
  func.func @_matmul_bias_relu_kernel(%arg0: i32, %arg1: memref<400x256xbf16, #tpu.memory_space<vmem>>, %arg2: memref<256x128xbf16, #tpu.memory_space<vmem>>, %arg3: memref<1x128xf32, #tpu.memory_space<vmem>>, %arg4: memref<400x32xbf16, #tpu.memory_space<vmem>>) attributes {dimension_semantics = [#tpu.dimension_semantics<parallel>], iteration_bounds = array<i64: 2>, scalar_prefetch = 0 : i64, scratch_operands = 0 : i64, tpu.core_type = #tpu.core_type<tc>, window_params = [{transform_indices = @transform_0, window_bounds = array<i64: 400, 256>}, {pipeline_mode = #tpu.pipeline_mode<synchronous>, transform_indices = @transform_1, window_bounds = array<i64: 256, 128>}, {pipeline_mode = #tpu.pipeline_mode<synchronous>, transform_indices = @transform_2, window_bounds = array<i64: 1, 128>}, {transform_indices = @transform_3, window_bounds = array<i64: 400, 32>}]} {
    %c0 = arith.constant 0 : index
    %c0_0 = arith.constant 0 : index
    %0 = vector.load %arg1[%c0, %c0_0] : memref<400x256xbf16, #tpu.memory_space<vmem>>, vector<400x256xbf16>
    %c0_1 = arith.constant 0 : index
    %c0_2 = arith.constant 0 : index
    %1 = vector.load %arg2[%c0_1, %c0_2] : memref<256x128xbf16, #tpu.memory_space<vmem>>, vector<256x128xbf16>
    %cst = arith.constant dense<0.000000e+00> : vector<400x128xf32>
    %2 = tpu.matmul %0, %1, %cst {dimension_numbers = #tpu.dot_dimension_numbers<[1], [0], [0], [1], [0, 0, 1, 1], [], []>} : vector<400x256xbf16>, vector<256x128xbf16>, vector<400x128xf32> -> vector<400x128xf32>
    %c0_3 = arith.constant 0 : index
    %c0_4 = arith.constant 0 : index
    %3 = vector.load %arg3[%c0_3, %c0_4] : memref<1x128xf32, #tpu.memory_space<vmem>>, vector<1x128xf32>
    %4 = vector.broadcast %3 : vector<1x128xf32> to vector<400x128xf32>
    %5 = arith.addf %2, %4 : vector<400x128xf32>
    %cst_5 = arith.constant 0.000000e+00 : f32
    %6 = vector.broadcast %cst_5 : f32 to vector<400x128xf32>
    %7 = arith.maximumf %5, %6 : vector<400x128xf32>
    %8 = vector.extract_strided_slice %7 {offsets = [0, 0], sizes = [400, 32], strides = [1, 1]} : vector<400x128xf32> to vector<400x32xf32>
    %9 = arith.truncf %8 : vector<400x32xf32> to vector<400x32xbf16>
    %c0_6 = arith.constant 0 : index
    %c0_7 = arith.constant 0 : index
    %10 = vector.load %arg4[%c0_6, %c0_7] : memref<400x32xbf16, #tpu.memory_space<vmem>>, vector<400x32xbf16>
    tpu.vector_store %arg4[%c0_6, %c0_7], %9 {strides = array<i32>} : memref<400x32xbf16, #tpu.memory_space<vmem>>, vector<400x32xbf16>,
    return
  }
  func.func @transform_0(%arg0: i32) -> (i32, i32) {
    %c0_i32 = arith.constant 0 : i32
    %c0_i32_0 = arith.constant 0 : i32
    return %arg0, %c0_i32 : i32, i32
  }
  func.func @transform_1(%arg0: i32) -> (i32, i32) {
    %c0_i32 = arith.constant 0 : i32
    %c0_i32_0 = arith.constant 0 : i32
    %c0_i32_1 = arith.constant 0 : i32
    return %c0_i32, %c0_i32_0 : i32, i32
  }
  func.func @transform_2(%arg0: i32) -> (i32, i32) {
    %c0_i32 = arith.constant 0 : i32
    %c0_i32_0 = arith.constant 0 : i32
    %c0_i32_1 = arith.constant 0 : i32
    return %c0_i32, %c0_i32_0 : i32, i32
  }
  func.func @transform_3(%arg0: i32) -> (i32, i32) {
    %c0_i32 = arith.constant 0 : i32
    %c0_i32_0 = arith.constant 0 : i32
    return %arg0, %c0_i32 : i32, i32
  }
}

module attributes {stable_mosaic.version = 11 : i64} {
  func.func @_matmul_bias_relu_kernel(%arg0: i32, %arg1: memref<96x512xbf16, #tpu.memory_space<vmem>>, %arg2: memref<512x128xbf16, #tpu.memory_space<vmem>>, %arg3: memref<1x128xf32, #tpu.memory_space<vmem>>, %arg4: memref<96x64xbf16, #tpu.memory_space<vmem>>) attributes {dimension_semantics = [#tpu.dimension_semantics<parallel>], iteration_bounds = array<i64: 2>, scalar_prefetch = 0 : i64, scratch_operands = 0 : i64, tpu.core_type = #tpu.core_type<tc>, window_params = [{transform_indices = @transform_0, window_bounds = array<i64: 96, 512>}, {pipeline_mode = #tpu.pipeline_mode<synchronous>, transform_indices = @transform_1, window_bounds = array<i64: 512, 128>}, {pipeline_mode = #tpu.pipeline_mode<synchronous>, transform_indices = @transform_2, window_bounds = array<i64: 1, 128>}, {transform_indices = @transform_3, window_bounds = array<i64: 96, 64>}]} {
    %c0 = arith.constant 0 : index
    %c0_0 = arith.constant 0 : index
    %0 = vector.load %arg1[%c0, %c0_0] : memref<96x512xbf16, #tpu.memory_space<vmem>>, vector<96x512xbf16>
    %c0_1 = arith.constant 0 : index
    %c0_2 = arith.constant 0 : index
    %1 = vector.load %arg2[%c0_1, %c0_2] : memref<512x128xbf16, #tpu.memory_space<vmem>>, vector<512x128xbf16>
    %cst = arith.constant dense<0.000000e+00> : vector<96x128xf32>
    %2 = tpu.matmul %0, %1, %cst {dimension_numbers = #tpu.dot_dimension_numbers<[1], [0], [0], [1], [0, 0, 1, 1], [], []>} : vector<96x512xbf16>, vector<512x128xbf16>, vector<96x128xf32> -> vector<96x128xf32>
    %c0_3 = arith.constant 0 : index
    %c0_4 = arith.constant 0 : index
    %3 = vector.load %arg3[%c0_3, %c0_4] : memref<1x128xf32, #tpu.memory_space<vmem>>, vector<1x128xf32>
    %4 = vector.broadcast %3 : vector<1x128xf32> to vector<96x128xf32>
    %5 = arith.addf %2, %4 : vector<96x128xf32>
    %cst_5 = arith.constant 0.000000e+00 : f32
    %6 = vector.broadcast %cst_5 : f32 to vector<96x128xf32>
    %7 = arith.maximumf %5, %6 : vector<96x128xf32>
    %8 = vector.extract_strided_slice %7 {offsets = [0, 0], sizes = [96, 64], strides = [1, 1]} : vector<96x128xf32> to vector<96x64xf32>
    %9 = arith.truncf %8 : vector<96x64xf32> to vector<96x64xbf16>
    %c0_6 = arith.constant 0 : index
    %c0_7 = arith.constant 0 : index
    %10 = vector.load %arg4[%c0_6, %c0_7] : memref<96x64xbf16, #tpu.memory_space<vmem>>, vector<96x64xbf16>
    tpu.vector_store %arg4[%c0_6, %c0_7], %9 {strides = array<i32>} : memref<96x64xbf16, #tpu.memory_space<vmem>>, vector<96x64xbf16>,
    return
  }
  func.func @transform_0(%arg0: i32) -> (i32, i32) {
    %c0_i32 = arith.constant 0 : i32
    %c0_i32_0 = arith.constant 0 : i32
    return %arg0, %c0_i32 : i32, i32
  }
  func.func @transform_1(%arg0: i32) -> (i32, i32) {
    %c0_i32 = arith.constant 0 : i32
    %c0_i32_0 = arith.constant 0 : i32
    %c0_i32_1 = arith.constant 0 : i32
    return %c0_i32, %c0_i32_0 : i32, i32
  }
  func.func @transform_2(%arg0: i32) -> (i32, i32) {
    %c0_i32 = arith.constant 0 : i32
    %c0_i32_0 = arith.constant 0 : i32
    %c0_i32_1 = arith.constant 0 : i32
    return %c0_i32, %c0_i32_0 : i32, i32
  }
  func.func @transform_3(%arg0: i32) -> (i32, i32) {
    %c0_i32 = arith.constant 0 : i32
    %c0_i32_0 = arith.constant 0 : i32
    return %arg0, %c0_i32 : i32, i32
  }
}

module attributes {stable_mosaic.version = 11 : i64} {
  func.func @_matmul_bias_relu_kernel(%arg0: i32, %arg1: memref<64x640xbf16, #tpu.memory_space<vmem>>, %arg2: memref<640x128xbf16, #tpu.memory_space<vmem>>, %arg3: memref<1x128xf32, #tpu.memory_space<vmem>>, %arg4: memref<64x64xbf16, #tpu.memory_space<vmem>>) attributes {dimension_semantics = [#tpu.dimension_semantics<parallel>], iteration_bounds = array<i64: 2>, scalar_prefetch = 0 : i64, scratch_operands = 0 : i64, tpu.core_type = #tpu.core_type<tc>, window_params = [{transform_indices = @transform_0, window_bounds = array<i64: 64, 640>}, {pipeline_mode = #tpu.pipeline_mode<synchronous>, transform_indices = @transform_1, window_bounds = array<i64: 640, 128>}, {pipeline_mode = #tpu.pipeline_mode<synchronous>, transform_indices = @transform_2, window_bounds = array<i64: 1, 128>}, {transform_indices = @transform_3, window_bounds = array<i64: 64, 64>}]} {
    %c0 = arith.constant 0 : index
    %c0_0 = arith.constant 0 : index
    %0 = vector.load %arg1[%c0, %c0_0] : memref<64x640xbf16, #tpu.memory_space<vmem>>, vector<64x640xbf16>
    %c0_1 = arith.constant 0 : index
    %c0_2 = arith.constant 0 : index
    %1 = vector.load %arg2[%c0_1, %c0_2] : memref<640x128xbf16, #tpu.memory_space<vmem>>, vector<640x128xbf16>
    %cst = arith.constant dense<0.000000e+00> : vector<64x128xf32>
    %2 = tpu.matmul %0, %1, %cst {dimension_numbers = #tpu.dot_dimension_numbers<[1], [0], [0], [1], [0, 0, 1, 1], [], []>} : vector<64x640xbf16>, vector<640x128xbf16>, vector<64x128xf32> -> vector<64x128xf32>
    %c0_3 = arith.constant 0 : index
    %c0_4 = arith.constant 0 : index
    %3 = vector.load %arg3[%c0_3, %c0_4] : memref<1x128xf32, #tpu.memory_space<vmem>>, vector<1x128xf32>
    %4 = vector.broadcast %3 : vector<1x128xf32> to vector<64x128xf32>
    %5 = arith.addf %2, %4 : vector<64x128xf32>
    %cst_5 = arith.constant 0.000000e+00 : f32
    %6 = vector.broadcast %cst_5 : f32 to vector<64x128xf32>
    %7 = arith.maximumf %5, %6 : vector<64x128xf32>
    %8 = vector.extract_strided_slice %7 {offsets = [0, 0], sizes = [64, 64], strides = [1, 1]} : vector<64x128xf32> to vector<64x64xf32>
    %9 = arith.truncf %8 : vector<64x64xf32> to vector<64x64xbf16>
    %c0_6 = arith.constant 0 : index
    %c0_7 = arith.constant 0 : index
    %10 = vector.load %arg4[%c0_6, %c0_7] : memref<64x64xbf16, #tpu.memory_space<vmem>>, vector<64x64xbf16>
    tpu.vector_store %arg4[%c0_6, %c0_7], %9 {strides = array<i32>} : memref<64x64xbf16, #tpu.memory_space<vmem>>, vector<64x64xbf16>,
    return
  }
  func.func @transform_0(%arg0: i32) -> (i32, i32) {
    %c0_i32 = arith.constant 0 : i32
    %c0_i32_0 = arith.constant 0 : i32
    return %arg0, %c0_i32 : i32, i32
  }
  func.func @transform_1(%arg0: i32) -> (i32, i32) {
    %c0_i32 = arith.constant 0 : i32
    %c0_i32_0 = arith.constant 0 : i32
    %c0_i32_1 = arith.constant 0 : i32
    return %c0_i32, %c0_i32_0 : i32, i32
  }
  func.func @transform_2(%arg0: i32) -> (i32, i32) {
    %c0_i32 = arith.constant 0 : i32
    %c0_i32_0 = arith.constant 0 : i32
    %c0_i32_1 = arith.constant 0 : i32
    return %c0_i32, %c0_i32_0 : i32, i32
  }
  func.func @transform_3(%arg0: i32) -> (i32, i32) {
    %c0_i32 = arith.constant 0 : i32
    %c0_i32_0 = arith.constant 0 : i32
    return %arg0, %c0_i32 : i32, i32
  }
}

module attributes {stable_mosaic.version = 11 : i64} {
  func.func @_fc_fused_kernel(%arg0: i32, %arg1: memref<16x3200xbf16, #tpu.memory_space<vmem>>, %arg2: memref<3200x512xbf16, #tpu.memory_space<vmem>>, %arg3: memref<1x512xf32, #tpu.memory_space<vmem>>, %arg4: memref<512x128xbf16, #tpu.memory_space<vmem>>, %arg5: memref<1x128xf32, #tpu.memory_space<vmem>>, %arg6: memref<16x18xf32, #tpu.memory_space<vmem>>) attributes {dimension_semantics = [#tpu.dimension_semantics<parallel>], iteration_bounds = array<i64: 1>, scalar_prefetch = 0 : i64, scratch_operands = 0 : i64, tpu.core_type = #tpu.core_type<tc>, window_params = [{transform_indices = @transform_0, window_bounds = array<i64: 16, 3200>}, {pipeline_mode = #tpu.pipeline_mode<synchronous>, transform_indices = @transform_1, window_bounds = array<i64: 3200, 512>}, {pipeline_mode = #tpu.pipeline_mode<synchronous>, transform_indices = @transform_2, window_bounds = array<i64: 1, 512>}, {pipeline_mode = #tpu.pipeline_mode<synchronous>, transform_indices = @transform_3, window_bounds = array<i64: 512, 128>}, {pipeline_mode = #tpu.pipeline_mode<synchronous>, transform_indices = @transform_4, window_bounds = array<i64: 1, 128>}, {transform_indices = @transform_5, window_bounds = array<i64: 16, 18>}]} {
    %c0 = arith.constant 0 : index
    %c0_0 = arith.constant 0 : index
    %0 = vector.load %arg1[%c0, %c0_0] : memref<16x3200xbf16, #tpu.memory_space<vmem>>, vector<16x3200xbf16>
    %c0_1 = arith.constant 0 : index
    %c0_2 = arith.constant 0 : index
    %1 = vector.load %arg2[%c0_1, %c0_2] : memref<3200x512xbf16, #tpu.memory_space<vmem>>, vector<3200x512xbf16>
    %cst = arith.constant dense<0.000000e+00> : vector<16x512xf32>
    %2 = tpu.matmul %0, %1, %cst {dimension_numbers = #tpu.dot_dimension_numbers<[1], [0], [0], [1], [0, 0, 1, 1], [], []>} : vector<16x3200xbf16>, vector<3200x512xbf16>, vector<16x512xf32> -> vector<16x512xf32>
    %c0_3 = arith.constant 0 : index
    %c0_4 = arith.constant 0 : index
    %3 = vector.load %arg3[%c0_3, %c0_4] : memref<1x512xf32, #tpu.memory_space<vmem>>, vector<1x512xf32>
    %4 = vector.broadcast %3 : vector<1x512xf32> to vector<16x512xf32>
    %5 = arith.addf %2, %4 : vector<16x512xf32>
    %cst_5 = arith.constant 0.000000e+00 : f32
    %6 = vector.broadcast %cst_5 : f32 to vector<16x512xf32>
    %7 = arith.maximumf %5, %6 : vector<16x512xf32>
    %8 = arith.truncf %7 : vector<16x512xf32> to vector<16x512xbf16>
    %c0_6 = arith.constant 0 : index
    %c0_7 = arith.constant 0 : index
    %9 = vector.load %arg4[%c0_6, %c0_7] : memref<512x128xbf16, #tpu.memory_space<vmem>>, vector<512x128xbf16>
    %cst_8 = arith.constant dense<0.000000e+00> : vector<16x128xf32>
    %10 = tpu.matmul %8, %9, %cst_8 {dimension_numbers = #tpu.dot_dimension_numbers<[1], [0], [0], [1], [0, 0, 1, 1], [], []>} : vector<16x512xbf16>, vector<512x128xbf16>, vector<16x128xf32> -> vector<16x128xf32>
    %c0_9 = arith.constant 0 : index
    %c0_10 = arith.constant 0 : index
    %11 = vector.load %arg5[%c0_9, %c0_10] : memref<1x128xf32, #tpu.memory_space<vmem>>, vector<1x128xf32>
    %12 = vector.broadcast %11 : vector<1x128xf32> to vector<16x128xf32>
    %13 = arith.addf %10, %12 : vector<16x128xf32>
    %14 = vector.extract_strided_slice %13 {offsets = [0, 0], sizes = [16, 18], strides = [1, 1]} : vector<16x128xf32> to vector<16x18xf32>
    %c0_11 = arith.constant 0 : index
    %c0_12 = arith.constant 0 : index
    %15 = vector.load %arg6[%c0_11, %c0_12] : memref<16x18xf32, #tpu.memory_space<vmem>>, vector<16x18xf32>
    tpu.vector_store %arg6[%c0_11, %c0_12], %14 {strides = array<i32>} : memref<16x18xf32, #tpu.memory_space<vmem>>, vector<16x18xf32>,
    return
  }
  func.func @transform_0(%arg0: i32) -> (i32, i32) {
    %c0_i32 = arith.constant 0 : i32
    %c0_i32_0 = arith.constant 0 : i32
    return %arg0, %c0_i32 : i32, i32
  }
  func.func @transform_1(%arg0: i32) -> (i32, i32) {
    %c0_i32 = arith.constant 0 : i32
    %c0_i32_0 = arith.constant 0 : i32
    %c0_i32_1 = arith.constant 0 : i32
    return %c0_i32, %c0_i32_0 : i32, i32
  }
  func.func @transform_2(%arg0: i32) -> (i32, i32) {
    %c0_i32 = arith.constant 0 : i32
    %c0_i32_0 = arith.constant 0 : i32
    %c0_i32_1 = arith.constant 0 : i32
    return %c0_i32, %c0_i32_0 : i32, i32
  }
  func.func @transform_3(%arg0: i32) -> (i32, i32) {
    %c0_i32 = arith.constant 0 : i32
    %c0_i32_0 = arith.constant 0 : i32
    %c0_i32_1 = arith.constant 0 : i32
    return %c0_i32, %c0_i32_0 : i32, i32
  }
  func.func @transform_4(%arg0: i32) -> (i32, i32) {
    %c0_i32 = arith.constant 0 : i32
    %c0_i32_0 = arith.constant 0 : i32
    %c0_i32_1 = arith.constant 0 : i32
    return %c0_i32, %c0_i32_0 : i32, i32
  }
  func.func @transform_5(%arg0: i32) -> (i32, i32) {
    %c0_i32 = arith.constant 0 : i32
    %c0_i32_0 = arith.constant 0 : i32
    return %arg0, %c0_i32 : i32, i32
  }
}

</mosaic_0001>

<bundles_post_ra>
// kernel: state_to_q_values.4
= control target key start
LH: loop header
LB: loop body
LE: loop exit
PB: predicated region body
PF: predicated region fallthrough
CT: control target
= control target key end

     0   :  { %s1542_s12 = smov 0   ;;  %s1852_s0 = inlined_call_operand.vmem [shape: bf16[800,256], index: 0, kind: input, shape index: {}]   ;;  %s1853_s1 = inlined_call_operand.vmem [shape: bf16[256,128], index: 1, kind: input, shape index: {}]   ;;  %s1854_s2 = inlined_call_operand.vmem [shape: f32[1,128], index: 2, kind: input, shape index: {}]   ;;  %s1855_s3 = inlined_call_operand.vmem [shape: bf16[800,32], index: 3, kind: output, shape index: {}]  }
   0x1 LB: > { %s1203_s13 = sadd.s32 4294967295, %s1519_s12   ;;  %p1207_p0 = scmp.ge.s32.totalorder %s1519_s12, 1  ;;  %s1519_s12 = sphi %s1542_s12, %s13_s12  }
   0x2   : > { %p139_p1 = scmp.lt.s32.totalorder %s1519_s12, 3 }
   0x4   : > { %p140_p2 = pnand %p1207_p0, %p139_p1 }
   0x5   : > { %s164_s16 = smul.u32 (!%p140_p2), 50, %s1203_s13 }
   0x6   : > { %143 = sbr.rel (%p140_p2) target bundleno = 376 (0x178), region = 32 }
   0x7   : > { %p165_p3 = scmp.lt.s32.totalorder (!%p140_p2), %s164_s16, 99 }
   0xb   : > { %v1422_v0 = vld [vmem:[%s1853_s1 + $0x38] sm:$0xff]   ;;  %v1521_v1 = vmov 0   ;;  %v1423_v2 = vld [vmem:[%s1853_s1 + $0x30] sm:$0xff]   ;;  %v1424_v3 = vld [vmem:[%s1853_s1 + $0x28] sm:$0xff]   ;;  %s1857_s16 = smov (!%p165_p3, %s164_s16), 99  ;;  %vm1096_vm0 = vcmask 257024  }
   0xc   : > { %613 = vmatprep.subr.bf16.mxu0 %v1521_v1  ;;  %1381 = vmatprep.subr.bf16.mxu1 %v1521_v1  ;;  %v1425_v4 = vld [vmem:[%s1853_s1 + $0x20] sm:$0xff]   ;;  %s1330_s23 = sshll.u32 %s1857_s16, 3  ;;  %v1426_v5 = vld [vmem:[%s1853_s1 + $0x18] sm:$0xff]   ;;  %v1427_v7 = vld [vmem:[%s1853_s1 + $0x10] sm:$0xff]   ;;  %s1210_s29 = sshll.u32 %s1857_s16, 2 }
   0xd   : > { %614 = vmatpush1.bf16.msra.mxu0 %v1422_v0  ;;  %1397 = vmatpush1.bf16.msra.mxu1 %v1422_v0  ;;  %s1579_s28 = scalar_lea.vmem %s1852_s0, %s1330_s23  ;;  %v1428_v9 = vld [vmem:[%s1853_s1 + $0x8] sm:$0xff]   ;;  %v1429_v10 = vld [vmem:[%s1853_s1] sm:$0xff]   ;;  %v1430_v11 = vld [vmem:[%s1853_s1 + $0x78] sm:$0xff]  }
   0xe   : > { %615 = vmatprep.subr.bf16.mxu0 %v1521_v1  ;;  %1382 = vmatprep.subr.bf16.mxu1 %v1521_v1  ;;  %v1440_v6 = vld [vmem:[%s1579_s28 + $0x4] ss:$8 sps:$4 sm:$0xff]   ;;  %v1443_v8 = vld [vmem:[%s1579_s28 + $0xd4] ss:$8 sps:$4 sm:$0xff]   ;;  %v1438_v19 = vld [vmem:[%s1579_s28] ss:$8 sps:$4 sm:$0xff]  }
   0xf   : > { %645 = vmatprep.mubr.bf16.mxu0 %v1440_v6  ;;  %749 = vmatprep.mubr.bf16.mxu1 %v1443_v8  ;;  %v1431_v12 = vld [vmem:[%s1853_s1 + $0x70] sm:$0xff]   ;;  %v1432_v13 = vld [vmem:[%s1853_s1 + $0x68] sm:$0xff]   ;;  %v1433_v14 = vld [vmem:[%s1853_s1 + $0x60] sm:$0xff]  }
  0x10   : > { %v1434_v15 = vld [vmem:[%s1853_s1 + $0x58] sm:$0xff]   ;;  %v1435_v16 = vld [vmem:[%s1853_s1 + $0x50] sm:$0xff]   ;;  %v1436_v17 = vld [vmem:[%s1853_s1 + $0x48] sm:$0xff]  }
  0x11   : > { %616 = vmatpush1.bf16.msra.mxu0 %v1423_v2  ;;  %1398 = vmatpush1.bf16.msra.mxu1 %v1423_v2  ;;  %v1437_v18 = vld [vmem:[%s1853_s1 + $0x40] sm:$0xff]   ;;  %v1441_v20 = vld [vmem:[%s1579_s28 + $0xd0] ss:$8 sps:$4 sm:$0xff]   ;;  %v1444_v21 = vld [vmem:[%s1579_s28 + $0x14] ss:$8 sps:$4 sm:$0xff]  }
  0x12   : > { %617 = vmatprep.subr.bf16.mxu0 %v1521_v1  ;;  %1383 = vmatprep.subr.bf16.mxu1 %v1521_v1  ;;  %v1447_v22 = vld [vmem:[%s1579_s28 + $0xe4] ss:$8 sps:$4 sm:$0xff]   ;;  %v1446_v23 = vld [vmem:[%s1579_s28 + $0x10] ss:$8 sps:$4 sm:$0xff]   ;;  %v1449_v24 = vld [vmem:[%s1579_s28 + $0xe0] ss:$8 sps:$4 sm:$0xff]  }
  0x13   : > { %v1450_v25 = vld [vmem:[%s1579_s28 + $0x24] ss:$8 sps:$4 sm:$0xff]   ;;  %v1453_v26 = vld [vmem:[%s1579_s28 + $0xf4] ss:$8 sps:$4 sm:$0xff]   ;;  %v1452_v27 = vld [vmem:[%s1579_s28 + $0x20] ss:$8 sps:$4 sm:$0xff]  }
  0x14   : > { %v1455_v28 = vld [vmem:[%s1579_s28 + $0xf0] ss:$8 sps:$4 sm:$0xff]   ;;  %v1456_v29 = vld [vmem:[%s1579_s28 + $0x34] ss:$8 sps:$4 sm:$0xff]   ;;  %v1459_v30 = vld [vmem:[%s1579_s28 + $0x104] ss:$8 sps:$4 sm:$0xff]  }
  0x15   : > { %618 = vmatpush1.bf16.msra.mxu0 %v1424_v3  ;;  %1399 = vmatpush1.bf16.msra.mxu1 %v1424_v3  ;;  %v1458_v31 = vld [vmem:[%s1579_s28 + $0x30] ss:$8 sps:$4 sm:$0xff]   ;;  %v1461_v32 = vld [vmem:[%s1579_s28 + $0x100] ss:$8 sps:$4 sm:$0xff]   ;;  %v1462_v33 = vld [vmem:[%s1579_s28 + $0x44] ss:$8 sps:$4 sm:$0xff]  }
  0x16   : > { %619 = vmatprep.subr.bf16.mxu0 %v1521_v1  ;;  %1384 = vmatprep.subr.bf16.mxu1 %v1521_v1  ;;  %v1465_v34 = vld [vmem:[%s1579_s28 + $0x114] ss:$8 sps:$4 sm:$0xff]   ;;  %v1464_v35 = vld [vmem:[%s1579_s28 + $0x40] ss:$8 sps:$4 sm:$0xff]   ;;  %v1467_v36 = vld [vmem:[%s1579_s28 + $0x110] ss:$8 sps:$4 sm:$0xff]  }
  0x17   : > { %v1468_v37 = vld [vmem:[%s1579_s28 + $0x54] ss:$8 sps:$4 sm:$0xff]   ;;  %v1471_v38 = vld [vmem:[%s1579_s28 + $0x124] ss:$8 sps:$4 sm:$0xff]   ;;  %v1470_v39 = vld [vmem:[%s1579_s28 + $0x50] ss:$8 sps:$4 sm:$0xff]  }
  0x18   : > { %v1473_v40 = vld [vmem:[%s1579_s28 + $0x120] ss:$8 sps:$4 sm:$0xff]   ;;  %v1474_v41 = vld [vmem:[%s1579_s28 + $0x64] ss:$8 sps:$4 sm:$0xff]   ;;  %v1477_v42 = vld [vmem:[%s1579_s28 + $0x134] ss:$8 sps:$4 sm:$0xff]  }
  0x19   : > { %620 = vmatpush1.bf16.msra.mxu0 %v1425_v4  ;;  %1400 = vmatpush1.bf16.msra.mxu1 %v1425_v4  ;;  %v1476_v43 = vld [vmem:[%s1579_s28 + $0x60] ss:$8 sps:$4 sm:$0xff]   ;;  %v1479_v44 = vld [vmem:[%s1579_s28 + $0x130] ss:$8 sps:$4 sm:$0xff]   ;;  %v1480_v45 = vld [vmem:[%s1579_s28 + $0x74] ss:$8 sps:$4 sm:$0xff]  }
  0x1a   : > { %621 = vmatprep.subr.bf16.mxu0 %v1521_v1  ;;  %1385 = vmatprep.subr.bf16.mxu1 %v1521_v1  ;;  %v1483_v46 = vld [vmem:[%s1579_s28 + $0x144] ss:$8 sps:$4 sm:$0xff]   ;;  %v1482_v47 = vld [vmem:[%s1579_s28 + $0x70] ss:$8 sps:$4 sm:$0xff]   ;;  %v1485_v48 = vld [vmem:[%s1579_s28 + $0x140] ss:$8 sps:$4 sm:$0xff]  }
  0x1b   : > { %v1486_v49 = vld [vmem:[%s1579_s28 + $0x84] ss:$8 sps:$4 sm:$0xff]   ;;  %v1489_v50 = vld [vmem:[%s1579_s28 + $0x154] ss:$8 sps:$4 sm:$0xff]   ;;  %v1488_v51 = vld [vmem:[%s1579_s28 + $0x80] ss:$8 sps:$4 sm:$0xff]  }
  0x1c   : > { %v1491_v52 = vld [vmem:[%s1579_s28 + $0x150] ss:$8 sps:$4 sm:$0xff]   ;;  %v1492_v53 = vld [vmem:[%s1579_s28 + $0x94] ss:$8 sps:$4 sm:$0xff]   ;;  %v1495_v54 = vld [vmem:[%s1579_s28 + $0x164] ss:$8 sps:$4 sm:$0xff]  }
  0x1d   : > { %622 = vmatpush1.bf16.msra.mxu0 %v1426_v5  ;;  %1401 = vmatpush1.bf16.msra.mxu1 %v1426_v5  ;;  %v1494_v55 = vld [vmem:[%s1579_s28 + $0x90] ss:$8 sps:$4 sm:$0xff]   ;;  %v1497_v56 = vld [vmem:[%s1579_s28 + $0x160] ss:$8 sps:$4 sm:$0xff]   ;;  %v1498_v57 = vld [vmem:[%s1579_s28 + $0xa4] ss:$8 sps:$4 sm:$0xff]  }
  0x1e   : > { %623 = vmatprep.subr.bf16.mxu0 %v1521_v1  ;;  %1386 = vmatprep.subr.bf16.mxu1 %v1521_v1  ;;  %v1501_v58 = vld [vmem:[%s1579_s28 + $0x174] ss:$8 sps:$4 sm:$0xff]   ;;  %v1500_v59 = vld [vmem:[%s1579_s28 + $0xa0] ss:$8 sps:$4 sm:$0xff]   ;;  %v1503_v60 = vld [vmem:[%s1579_s28 + $0x170] ss:$8 sps:$4 sm:$0xff]  }
  0x1f   : > { %v1504_v61 = vld [vmem:[%s1579_s28 + $0xb4] ss:$8 sps:$4 sm:$0xff]   ;;  %v1507_v62 = vld [vmem:[%s1579_s28 + $0x184] ss:$8 sps:$4 sm:$0xff]   ;;  %v1506_v63 = vld [vmem:[%s1579_s28 + $0xb0] ss:$8 sps:$4 sm:$0xff]  }
  0x20   : > { %v1509_v0 = vld [vmem:[%s1579_s28 + $0x180] ss:$8 sps:$4 sm:$0xff]  }
  0x21   : > { %624 = vmatpush1.bf16.msra.mxu0 %v1427_v7  ;;  %1402 = vmatpush1.bf16.msra.mxu1 %v1427_v7  ;;  %v1512_v2 = vld [vmem:[%s1579_s28 + $0xc0] ss:$8 sps:$4 sm:$0xff]  }
  0x22   : > { %625 = vmatprep.subr.bf16.mxu0 %v1521_v1  ;;  %1387 = vmatprep.subr.bf16.mxu1 %v1521_v1  ;;  %v1691_v3 = vld [vmem:[%s1854_s2] ss:$0 sm:$0xff] }
  0x25   : > { %626 = vmatpush1.bf16.msra.mxu0 %v1428_v9  ;;  %1403 = vmatpush1.bf16.msra.mxu1 %v1428_v9 }
  0x26   : > { %627 = vmatprep.subr.bf16.mxu0 %v1521_v1  ;;  %1388 = vmatprep.subr.bf16.mxu1 %v1521_v1 }
  0x29   : > { %628 = vmatpush1.bf16.msra.mxu0 %v1429_v10  ;;  %1404 = vmatpush1.bf16.msra.mxu1 %v1429_v10 }
  0x2a   : > { %629 = vmatprep.subr.bf16.mxu0 %v1521_v1  ;;  %1389 = vmatprep.subr.bf16.mxu1 %v1521_v1 }
  0x2d   : > { %630 = vmatpush2.bf16.msra.mxu0 %v1430_v11  ;;  %1405 = vmatpush2.bf16.msra.mxu1 %v1430_v11 }
  0x2e   : > { %631 = vmatprep.subr.bf16.mxu0 %v1521_v1  ;;  %1390 = vmatprep.subr.bf16.mxu1 %v1521_v1 }
  0x31   : > { %632 = vmatpush2.bf16.msra.mxu0 %v1431_v12  ;;  %1406 = vmatpush2.bf16.msra.mxu1 %v1431_v12 }
  0x32   : > { %633 = vmatprep.subr.bf16.mxu0 %v1521_v1  ;;  %1391 = vmatprep.subr.bf16.mxu1 %v1521_v1 }
  0x35   : > { %634 = vmatpush2.bf16.msra.mxu0 %v1432_v13  ;;  %1407 = vmatpush2.bf16.msra.mxu1 %v1432_v13 }
  0x36   : > { %635 = vmatprep.subr.bf16.mxu0 %v1521_v1  ;;  %1392 = vmatprep.subr.bf16.mxu1 %v1521_v1 }
  0x39   : > { %636 = vmatpush2.bf16.msra.mxu0 %v1433_v14  ;;  %1408 = vmatpush2.bf16.msra.mxu1 %v1433_v14 }
  0x3a   : > { %637 = vmatprep.subr.bf16.mxu0 %v1521_v1  ;;  %1393 = vmatprep.subr.bf16.mxu1 %v1521_v1 }
  0x3d   : > { %638 = vmatpush2.bf16.msra.mxu0 %v1434_v15  ;;  %1409 = vmatpush2.bf16.msra.mxu1 %v1434_v15 }
  0x3e   : > { %639 = vmatprep.subr.bf16.mxu0 %v1521_v1  ;;  %1394 = vmatprep.subr.bf16.mxu1 %v1521_v1 }
  0x41   : > { %640 = vmatpush2.bf16.msra.mxu0 %v1435_v16  ;;  %1410 = vmatpush2.bf16.msra.mxu1 %v1435_v16 }
  0x42   : > { %641 = vmatprep.subr.bf16.mxu0 %v1521_v1  ;;  %1395 = vmatprep.subr.bf16.mxu1 %v1521_v1 }
  0x45   : > { %642 = vmatpush2.bf16.msra.mxu0 %v1436_v17  ;;  %1411 = vmatpush2.bf16.msra.mxu1 %v1436_v17 }
  0x46   : > { %643 = vmatprep.subr.bf16.mxu0 %v1521_v1  ;;  %1396 = vmatprep.subr.bf16.mxu1 %v1521_v1  ;;  %v1510_v1 = vld [vmem:[%s1579_s28 + $0xc4] ss:$8 sps:$4 sm:$0xff]   ;;  %s1699_s28 = scalar_lea.vmem %s1855_s3, %s1210_s29 }
  0x49   : > { %644 = vmatpush2.bf16.msra.mxu0 %v1437_v18  ;;  %1412 = vmatpush2.bf16.msra.mxu1 %v1437_v18 }
  0x4c   : > { %646 = vmatmul.mubr.bf16.vlgmr.msra.gmra.mxu0 %v1438_v19  ;;  %750 = vmatmul.mubr.bf16.vlgmr.msra.gmra.mxu1 %v1441_v20 }
  0x4d   : > { %653 = vmatprep.mubr.bf16.mxu0 %v1444_v21  ;;  %757 = vmatprep.mubr.bf16.mxu1 %v1447_v22 }
  0x54   : > { %654 = vmatmul.mubr.bf16.gmra.mxu0 %v1446_v23  ;;  %758 = vmatmul.mubr.bf16.gmra.mxu1 %v1449_v24 }
  0x55   : > { %661 = vmatprep.mubr.bf16.mxu0 %v1450_v25  ;;  %765 = vmatprep.mubr.bf16.mxu1 %v1453_v26 }
  0x5c   : > { %662 = vmatmul.mubr.bf16.gmra.mxu0 %v1452_v27  ;;  %766 = vmatmul.mubr.bf16.gmra.mxu1 %v1455_v28 }
  0x5d   : > { %669 = vmatprep.mubr.bf16.mxu0 %v1456_v29  ;;  %773 = vmatprep.mubr.bf16.mxu1 %v1459_v30 }
  0x64   : > { %670 = vmatmul.mubr.bf16.gmra.mxu0 %v1458_v31  ;;  %774 = vmatmul.mubr.bf16.gmra.mxu1 %v1461_v32 }
  0x65   : > { %677 = vmatprep.mubr.bf16.mxu0 %v1462_v33  ;;  %781 = vmatprep.mubr.bf16.mxu1 %v1465_v34 }
  0x6c   : > { %678 = vmatmul.mubr.bf16.gmra.mxu0 %v1464_v35  ;;  %782 = vmatmul.mubr.bf16.gmra.mxu1 %v1467_v36 }
  0x6d   : > { %685 = vmatprep.mubr.bf16.mxu0 %v1468_v37  ;;  %789 = vmatprep.mubr.bf16.mxu1 %v1471_v38 }
  0x74   : > { %686 = vmatmul.mubr.bf16.gmra.mxu0 %v1470_v39  ;;  %790 = vmatmul.mubr.bf16.gmra.mxu1 %v1473_v40 }
  0x75   : > { %693 = vmatprep.mubr.bf16.mxu0 %v1474_v41  ;;  %797 = vmatprep.mubr.bf16.mxu1 %v1477_v42 }
  0x7c   : > { %694 = vmatmul.mubr.bf16.gmra.mxu0 %v1476_v43  ;;  %798 = vmatmul.mubr.bf16.gmra.mxu1 %v1479_v44 }
  0x7d   : > { %701 = vmatprep.mubr.bf16.mxu0 %v1480_v45  ;;  %805 = vmatprep.mubr.bf16.mxu1 %v1483_v46 }
  0x84   : > { %702 = vmatmul.mubr.bf16.gmra.mxu0 %v1482_v47  ;;  %806 = vmatmul.mubr.bf16.gmra.mxu1 %v1485_v48 }
  0x85   : > { %709 = vmatprep.mubr.bf16.mxu0 %v1486_v49  ;;  %813 = vmatprep.mubr.bf16.mxu1 %v1489_v50 }
  0x8c   : > { %710 = vmatmul.mubr.bf16.gmra.mxu0 %v1488_v51  ;;  %814 = vmatmul.mubr.bf16.gmra.mxu1 %v1491_v52 }
  0x8d   : > { %717 = vmatprep.mubr.bf16.mxu0 %v1492_v53  ;;  %821 = vmatprep.mubr.bf16.mxu1 %v1495_v54 }
  0x94   : > { %718 = vmatmul.mubr.bf16.gmra.mxu0 %v1494_v55  ;;  %822 = vmatmul.mubr.bf16.gmra.mxu1 %v1497_v56 }
  0x95   : > { %725 = vmatprep.mubr.bf16.mxu0 %v1498_v57  ;;  %829 = vmatprep.mubr.bf16.mxu1 %v1501_v58 }
  0x9c   : > { %726 = vmatmul.mubr.bf16.gmra.mxu0 %v1500_v59  ;;  %830 = vmatmul.mubr.bf16.gmra.mxu1 %v1503_v60 }
  0x9d   : > { %733 = vmatprep.mubr.bf16.mxu0 %v1504_v61  ;;  %837 = vmatprep.mubr.bf16.mxu1 %v1507_v62 }
  0xa4   : > { %734 = vmatmul.mubr.bf16.gmra.mxu0 %v1506_v63  ;;  %838 = vmatmul.mubr.bf16.gmra.mxu1 %v1509_v0 }
  0xa5   : > { %741 = vmatprep.mubr.bf16.mxu0 %v1510_v1 }
  0xac   : > { %742 = vmatmul.mubr.bf16.gmra.mxu0 %v1512_v2 }
 0x10c   : > { %v647_v4 = vpop.f32.mrf.mxu0  ;;  %v751_v5 = vpop.f32.mrf.mxu1 }
 0x10d   : > { %v648_v6 = vadd.f32 %v1691_v3, %v647_v4  ;;  %v752_v7 = vadd.f32 %v1691_v3, %v751_v5 }
 0x10e   : > { %v649_v8 = vpop.f32.mrf.mxu0  ;;  %v753_v9 = vpop.f32.mrf.mxu1 }
 0x10f   : > { %v846_v10 = vmax.f32 %v648_v6, 0.0  ;;  %v872_v11 = vmax.f32 %v752_v7, 0.0 }
 0x110   : > { %v650_v12 = vpop.f32.mrf.mxu0  ;;  %v754_v13 = vpop.f32.mrf.mxu1 }
 0x111   : > { %v1331_v14 = vpack.c.bf16 %v846_v10, %v846_v10  ;;  %v1357_v15 = vpack.c.bf16 %v872_v11, %v872_v11  ;;  %v651_v16 = vadd.f32 %v1691_v3, %v650_v12  ;;  %v755_v17 = vadd.f32 %v1691_v3, %v754_v13 }
 0x112   : > { %v652_v18 = vpop.f32.mrf.mxu0  ;;  %v756_v19 = vpop.f32.mrf.mxu1 }
 0x113   : > { %1097 = vst.msk [vmem:[%s1699_s28] sm:$0xf] %vm1096_vm0, %v1331_v14  ;;  %1123 = vst.msk [vmem:[%s1699_s28 + $0x68] sm:$0xf] %vm1096_vm0, %v1357_v15  ;;  %v847_v20 = vmax.f32 %v651_v16, 0.0  ;;  %v873_v21 = vmax.f32 %v755_v17, 0.0 }
 0x114   : > { %v655_v22 = vpop.f32.mrf.mxu0  ;;  %v759_v23 = vpop.f32.mrf.mxu1 }
 0x115   : > { %v1332_v24 = vpack.c.bf16 %v847_v20, %v847_v20  ;;  %v1358_v25 = vpack.c.bf16 %v873_v21, %v873_v21  ;;  %v656_v26 = vadd.f32 %v1691_v3, %v655_v22  ;;  %v760_v27 = vadd.f32 %v1691_v3, %v759_v23 }
 0x116   : > { %v657_v28 = vpop.f32.mrf.mxu0  ;;  %v761_v29 = vpop.f32.mrf.mxu1 }
 0x117   : > { %1098 = vst.msk [vmem:[%s1699_s28 + $0x4] sm:$0xf] %vm1096_vm0, %v1332_v24  ;;  %1124 = vst.msk [vmem:[%s1699_s28 + $0x6c] sm:$0xf] %vm1096_vm0, %v1358_v25  ;;  %v848_v30 = vmax.f32 %v656_v26, 0.0  ;;  %v874_v31 = vmax.f32 %v760_v27, 0.0 }
 0x118   : > { %v658_v32 = vpop.f32.mrf.mxu0  ;;  %v762_v33 = vpop.f32.mrf.mxu1 }
 0x119   : > { %v1333_v34 = vpack.c.bf16 %v848_v30, %v848_v30  ;;  %v1359_v35 = vpack.c.bf16 %v874_v31, %v874_v31  ;;  %v659_v36 = vadd.f32 %v1691_v3, %v658_v32  ;;  %v763_v37 = vadd.f32 %v1691_v3, %v762_v33 }
 0x11a   : > { %v660_v38 = vpop.f32.mrf.mxu0  ;;  %v764_v39 = vpop.f32.mrf.mxu1 }
 0x11b   : > { %1099 = vst.msk [vmem:[%s1699_s28 + $0x8] sm:$0xf] %vm1096_vm0, %v1333_v34  ;;  %1125 = vst.msk [vmem:[%s1699_s28 + $0x70] sm:$0xf] %vm1096_vm0, %v1359_v35  ;;  %v849_v40 = vmax.f32 %v659_v36, 0.0  ;;  %v875_v41 = vmax.f32 %v763_v37, 0.0 }
 0x11c   : > { %v663_v42 = vpop.f32.mrf.mxu0  ;;  %v767_v43 = vpop.f32.mrf.mxu1 }
 0x11d   : > { %v1334_v44 = vpack.c.bf16 %v849_v40, %v849_v40  ;;  %v1360_v45 = vpack.c.bf16 %v875_v41, %v875_v41  ;;  %v664_v46 = vadd.f32 %v1691_v3, %v663_v42  ;;  %v768_v47 = vadd.f32 %v1691_v3, %v767_v43 }
 0x11e   : > { %v665_v48 = vpop.f32.mrf.mxu0  ;;  %v769_v49 = vpop.f32.mrf.mxu1 }
 0x11f   : > { %1100 = vst.msk [vmem:[%s1699_s28 + $0xc] sm:$0xf] %vm1096_vm0, %v1334_v44  ;;  %1126 = vst.msk [vmem:[%s1699_s28 + $0x74] sm:$0xf] %vm1096_vm0, %v1360_v45  ;;  %v850_v50 = vmax.f32 %v664_v46, 0.0  ;;  %v876_v51 = vmax.f32 %v768_v47, 0.0 }
 0x120   : > { %v666_v52 = vpop.f32.mrf.mxu0  ;;  %v770_v53 = vpop.f32.mrf.mxu1 }
 0x121   : > { %v1335_v54 = vpack.c.bf16 %v850_v50, %v850_v50  ;;  %v1361_v55 = vpack.c.bf16 %v876_v51, %v876_v51  ;;  %v667_v56 = vadd.f32 %v1691_v3, %v666_v52  ;;  %v771_v57 = vadd.f32 %v1691_v3, %v770_v53 }
 0x122   : > { %v668_v58 = vpop.f32.mrf.mxu0  ;;  %v772_v59 = vpop.f32.mrf.mxu1 }
 0x123   : > { %1101 = vst.msk [vmem:[%s1699_s28 + $0x10] sm:$0xf] %vm1096_vm0, %v1335_v54  ;;  %1127 = vst.msk [vmem:[%s1699_s28 + $0x78] sm:$0xf] %vm1096_vm0, %v1361_v55  ;;  %v851_v60 = vmax.f32 %v667_v56, 0.0  ;;  %v877_v61 = vmax.f32 %v771_v57, 0.0 }
 0x124   : > { %v671_v62 = vpop.f32.mrf.mxu0  ;;  %v775_v63 = vpop.f32.mrf.mxu1 }
 0x125   : > { %v1336_v0 = vpack.c.bf16 %v851_v60, %v851_v60  ;;  %v1362_v1 = vpack.c.bf16 %v877_v61, %v877_v61  ;;  %v672_v2 = vadd.f32 %v1691_v3, %v671_v62  ;;  %v776_v4 = vadd.f32 %v1691_v3, %v775_v63 }
 0x126   : > { %v673_v5 = vpop.f32.mrf.mxu0  ;;  %v777_v6 = vpop.f32.mrf.mxu1 }
 0x127   : > { %1102 = vst.msk [vmem:[%s1699_s28 + $0x14] sm:$0xf] %vm1096_vm0, %v1336_v0  ;;  %1128 = vst.msk [vmem:[%s1699_s28 + $0x7c] sm:$0xf] %vm1096_vm0, %v1362_v1  ;;  %v852_v7 = vmax.f32 %v672_v2, 0.0  ;;  %v878_v8 = vmax.f32 %v776_v4, 0.0 }
 0x128   : > { %v674_v9 = vpop.f32.mrf.mxu0  ;;  %v778_v10 = vpop.f32.mrf.mxu1 }
 0x129   : > { %v1337_v11 = vpack.c.bf16 %v852_v7, %v852_v7  ;;  %v1363_v12 = vpack.c.bf16 %v878_v8, %v878_v8  ;;  %v675_v13 = vadd.f32 %v1691_v3, %v674_v9  ;;  %v779_v14 = vadd.f32 %v1691_v3, %v778_v10 }
 0x12a   : > { %v676_v15 = vpop.f32.mrf.mxu0  ;;  %v780_v16 = vpop.f32.mrf.mxu1 }
 0x12b   : > { %1103 = vst.msk [vmem:[%s1699_s28 + $0x18] sm:$0xf] %vm1096_vm0, %v1337_v11  ;;  %1129 = vst.msk [vmem:[%s1699_s28 + $0x80] sm:$0xf] %vm1096_vm0, %v1363_v12  ;;  %v853_v17 = vmax.f32 %v675_v13, 0.0  ;;  %v879_v18 = vmax.f32 %v779_v14, 0.0 }
 0x12c   : > { %v679_v19 = vpop.f32.mrf.mxu0  ;;  %v783_v20 = vpop.f32.mrf.mxu1 }
 0x12d   : > { %v1338_v21 = vpack.c.bf16 %v853_v17, %v853_v17  ;;  %v1364_v22 = vpack.c.bf16 %v879_v18, %v879_v18  ;;  %v680_v23 = vadd.f32 %v1691_v3, %v679_v19  ;;  %v784_v24 = vadd.f32 %v1691_v3, %v783_v20 }
 0x12e   : > { %v681_v25 = vpop.f32.mrf.mxu0  ;;  %v785_v26 = vpop.f32.mrf.mxu1 }
 0x12f   : > { %1104 = vst.msk [vmem:[%s1699_s28 + $0x1c] sm:$0xf] %vm1096_vm0, %v1338_v21  ;;  %1130 = vst.msk [vmem:[%s1699_s28 + $0x84] sm:$0xf] %vm1096_vm0, %v1364_v22  ;;  %v854_v27 = vmax.f32 %v680_v23, 0.0  ;;  %v880_v28 = vmax.f32 %v784_v24, 0.0 }
 0x130   : > { %v682_v29 = vpop.f32.mrf.mxu0  ;;  %v786_v30 = vpop.f32.mrf.mxu1 }
 0x131   : > { %v1339_v31 = vpack.c.bf16 %v854_v27, %v854_v27  ;;  %v1365_v32 = vpack.c.bf16 %v880_v28, %v880_v28  ;;  %v683_v33 = vadd.f32 %v1691_v3, %v682_v29  ;;  %v787_v34 = vadd.f32 %v1691_v3, %v786_v30 }
 0x132   : > { %v684_v35 = vpop.f32.mrf.mxu0  ;;  %v788_v36 = vpop.f32.mrf.mxu1 }
 0x133   : > { %1105 = vst.msk [vmem:[%s1699_s28 + $0x20] sm:$0xf] %vm1096_vm0, %v1339_v31  ;;  %1131 = vst.msk [vmem:[%s1699_s28 + $0x88] sm:$0xf] %vm1096_vm0, %v1365_v32  ;;  %v855_v37 = vmax.f32 %v683_v33, 0.0  ;;  %v881_v38 = vmax.f32 %v787_v34, 0.0 }
 0x134   : > { %v687_v39 = vpop.f32.mrf.mxu0  ;;  %v791_v40 = vpop.f32.mrf.mxu1 }
 0x135   : > { %v1340_v41 = vpack.c.bf16 %v855_v37, %v855_v37  ;;  %v1366_v42 = vpack.c.bf16 %v881_v38, %v881_v38  ;;  %v688_v43 = vadd.f32 %v1691_v3, %v687_v39  ;;  %v792_v44 = vadd.f32 %v1691_v3, %v791_v40 }
 0x136   : > { %v689_v45 = vpop.f32.mrf.mxu0  ;;  %v793_v46 = vpop.f32.mrf.mxu1 }
 0x137   : > { %1106 = vst.msk [vmem:[%s1699_s28 + $0x24] sm:$0xf] %vm1096_vm0, %v1340_v41  ;;  %1132 = vst.msk [vmem:[%s1699_s28 + $0x8c] sm:$0xf] %vm1096_vm0, %v1366_v42  ;;  %v856_v47 = vmax.f32 %v688_v43, 0.0  ;;  %v882_v48 = vmax.f32 %v792_v44, 0.0 }
 0x138   : > { %v690_v49 = vpop.f32.mrf.mxu0  ;;  %v794_v50 = vpop.f32.mrf.mxu1 }
 0x139   : > { %v1341_v51 = vpack.c.bf16 %v856_v47, %v856_v47  ;;  %v1367_v52 = vpack.c.bf16 %v882_v48, %v882_v48  ;;  %v691_v53 = vadd.f32 %v1691_v3, %v690_v49  ;;  %v795_v54 = vadd.f32 %v1691_v3, %v794_v50 }
 0x13a   : > { %v692_v55 = vpop.f32.mrf.mxu0  ;;  %v796_v56 = vpop.f32.mrf.mxu1 }
 0x13b   : > { %1107 = vst.msk [vmem:[%s1699_s28 + $0x28] sm:$0xf] %vm1096_vm0, %v1341_v51  ;;  %1133 = vst.msk [vmem:[%s1699_s28 + $0x90] sm:$0xf] %vm1096_vm0, %v1367_v52  ;;  %v857_v57 = vmax.f32 %v691_v53, 0.0  ;;  %v883_v58 = vmax.f32 %v795_v54, 0.0 }
 0x13c   : > { %v695_v59 = vpop.f32.mrf.mxu0  ;;  %v799_v60 = vpop.f32.mrf.mxu1 }
 0x13d   : > { %v1342_v61 = vpack.c.bf16 %v857_v57, %v857_v57  ;;  %v1368_v62 = vpack.c.bf16 %v883_v58, %v883_v58  ;;  %v696_v63 = vadd.f32 %v1691_v3, %v695_v59  ;;  %v800_v0 = vadd.f32 %v1691_v3, %v799_v60 }
 0x13e   : > { %v697_v1 = vpop.f32.mrf.mxu0  ;;  %v801_v2 = vpop.f32.mrf.mxu1 }
 0x13f   : > { %1108 = vst.msk [vmem:[%s1699_s28 + $0x2c] sm:$0xf] %vm1096_vm0, %v1342_v61  ;;  %1134 = vst.msk [vmem:[%s1699_s28 + $0x94] sm:$0xf] %vm1096_vm0, %v1368_v62  ;;  %v858_v4 = vmax.f32 %v696_v63, 0.0  ;;  %v884_v5 = vmax.f32 %v800_v0, 0.0 }
 0x140   : > { %v698_v6 = vpop.f32.mrf.mxu0  ;;  %v802_v7 = vpop.f32.mrf.mxu1 }
 0x141   : > { %v1343_v8 = vpack.c.bf16 %v858_v4, %v858_v4  ;;  %v1369_v9 = vpack.c.bf16 %v884_v5, %v884_v5  ;;  %v699_v10 = vadd.f32 %v1691_v3, %v698_v6  ;;  %v803_v11 = vadd.f32 %v1691_v3, %v802_v7 }
 0x142   : > { %v700_v12 = vpop.f32.mrf.mxu0  ;;  %v804_v13 = vpop.f32.mrf.mxu1 }
 0x143   : > { %1109 = vst.msk [vmem:[%s1699_s28 + $0x30] sm:$0xf] %vm1096_vm0, %v1343_v8  ;;  %1135 = vst.msk [vmem:[%s1699_s28 + $0x98] sm:$0xf] %vm1096_vm0, %v1369_v9  ;;  %v859_v14 = vmax.f32 %v699_v10, 0.0  ;;  %v885_v15 = vmax.f32 %v803_v11, 0.0 }
 0x144   : > { %v703_v16 = vpop.f32.mrf.mxu0  ;;  %v807_v17 = vpop.f32.mrf.mxu1 }
 0x145   : > { %v1344_v18 = vpack.c.bf16 %v859_v14, %v859_v14  ;;  %v1370_v19 = vpack.c.bf16 %v885_v15, %v885_v15  ;;  %v704_v20 = vadd.f32 %v1691_v3, %v703_v16  ;;  %v808_v21 = vadd.f32 %v1691_v3, %v807_v17 }
 0x146   : > { %v705_v22 = vpop.f32.mrf.mxu0  ;;  %v809_v23 = vpop.f32.mrf.mxu1 }
 0x147   : > { %1110 = vst.msk [vmem:[%s1699_s28 + $0x34] sm:$0xf] %vm1096_vm0, %v1344_v18  ;;  %1136 = vst.msk [vmem:[%s1699_s28 + $0x9c] sm:$0xf] %vm1096_vm0, %v1370_v19  ;;  %v860_v24 = vmax.f32 %v704_v20, 0.0  ;;  %v886_v25 = vmax.f32 %v808_v21, 0.0 }
 0x148   : > { %v706_v26 = vpop.f32.mrf.mxu0  ;;  %v810_v27 = vpop.f32.mrf.mxu1 }
 0x149   : > { %v1345_v28 = vpack.c.bf16 %v860_v24, %v860_v24  ;;  %v1371_v29 = vpack.c.bf16 %v886_v25, %v886_v25  ;;  %v707_v30 = vadd.f32 %v1691_v3, %v706_v26  ;;  %v811_v31 = vadd.f32 %v1691_v3, %v810_v27 }
 0x14a   : > { %v708_v32 = vpop.f32.mrf.mxu0  ;;  %v812_v33 = vpop.f32.mrf.mxu1 }
 0x14b   : > { %1111 = vst.msk [vmem:[%s1699_s28 + $0x38] sm:$0xf] %vm1096_vm0, %v1345_v28  ;;  %1137 = vst.msk [vmem:[%s1699_s28 + $0xa0] sm:$0xf] %vm1096_vm0, %v1371_v29  ;;  %v861_v34 = vmax.f32 %v707_v30, 0.0  ;;  %v887_v35 = vmax.f32 %v811_v31, 0.0 }
 0x14c   : > { %v711_v36 = vpop.f32.mrf.mxu0  ;;  %v815_v37 = vpop.f32.mrf.mxu1 }
 0x14d   : > { %v1346_v38 = vpack.c.bf16 %v861_v34, %v861_v34  ;;  %v1372_v39 = vpack.c.bf16 %v887_v35, %v887_v35  ;;  %v712_v40 = vadd.f32 %v1691_v3, %v711_v36  ;;  %v816_v41 = vadd.f32 %v1691_v3, %v815_v37 }
 0x14e   : > { %v713_v42 = vpop.f32.mrf.mxu0  ;;  %v817_v43 = vpop.f32.mrf.mxu1 }
 0x14f   : > { %1112 = vst.msk [vmem:[%s1699_s28 + $0x3c] sm:$0xf] %vm1096_vm0, %v1346_v38  ;;  %1138 = vst.msk [vmem:[%s1699_s28 + $0xa4] sm:$0xf] %vm1096_vm0, %v1372_v39  ;;  %v862_v44 = vmax.f32 %v712_v40, 0.0  ;;  %v888_v45 = vmax.f32 %v816_v41, 0.0 }
 0x150   : > { %v714_v46 = vpop.f32.mrf.mxu0  ;;  %v818_v47 = vpop.f32.mrf.mxu1 }
 0x151   : > { %v1347_v48 = vpack.c.bf16 %v862_v44, %v862_v44  ;;  %v1373_v49 = vpack.c.bf16 %v888_v45, %v888_v45  ;;  %v715_v50 = vadd.f32 %v1691_v3, %v714_v46  ;;  %v819_v51 = vadd.f32 %v1691_v3, %v818_v47 }
 0x152   : > { %v716_v52 = vpop.f32.mrf.mxu0  ;;  %v820_v53 = vpop.f32.mrf.mxu1 }
 0x153   : > { %1113 = vst.msk [vmem:[%s1699_s28 + $0x40] sm:$0xf] %vm1096_vm0, %v1347_v48  ;;  %1139 = vst.msk [vmem:[%s1699_s28 + $0xa8] sm:$0xf] %vm1096_vm0, %v1373_v49  ;;  %v863_v54 = vmax.f32 %v715_v50, 0.0  ;;  %v889_v55 = vmax.f32 %v819_v51, 0.0 }
 0x154   : > { %v719_v56 = vpop.f32.mrf.mxu0  ;;  %v823_v57 = vpop.f32.mrf.mxu1 }
 0x155   : > { %v1348_v58 = vpack.c.bf16 %v863_v54, %v863_v54  ;;  %v1374_v59 = vpack.c.bf16 %v889_v55, %v889_v55  ;;  %v720_v60 = vadd.f32 %v1691_v3, %v719_v56  ;;  %v824_v61 = vadd.f32 %v1691_v3, %v823_v57 }
 0x156   : > { %v721_v62 = vpop.f32.mrf.mxu0  ;;  %v825_v63 = vpop.f32.mrf.mxu1 }
 0x157   : > { %1114 = vst.msk [vmem:[%s1699_s28 + $0x44] sm:$0xf] %vm1096_vm0, %v1348_v58  ;;  %1140 = vst.msk [vmem:[%s1699_s28 + $0xac] sm:$0xf] %vm1096_vm0, %v1374_v59  ;;  %v864_v0 = vmax.f32 %v720_v60, 0.0  ;;  %v890_v1 = vmax.f32 %v824_v61, 0.0 }
 0x158   : > { %v722_v2 = vpop.f32.mrf.mxu0  ;;  %v826_v4 = vpop.f32.mrf.mxu1 }
 0x159   : > { %v1349_v5 = vpack.c.bf16 %v864_v0, %v864_v0  ;;  %v1375_v6 = vpack.c.bf16 %v890_v1, %v890_v1  ;;  %v723_v7 = vadd.f32 %v1691_v3, %v722_v2  ;;  %v827_v8 = vadd.f32 %v1691_v3, %v826_v4 }
 0x15a   : > { %v724_v9 = vpop.f32.mrf.mxu0  ;;  %v828_v10 = vpop.f32.mrf.mxu1 }
 0x15b   : > { %1115 = vst.msk [vmem:[%s1699_s28 + $0x48] sm:$0xf] %vm1096_vm0, %v1349_v5  ;;  %1141 = vst.msk [vmem:[%s1699_s28 + $0xb0] sm:$0xf] %vm1096_vm0, %v1375_v6  ;;  %v865_v11 = vmax.f32 %v723_v7, 0.0  ;;  %v891_v12 = vmax.f32 %v827_v8, 0.0 }
 0x15c   : > { %v727_v13 = vpop.f32.mrf.mxu0  ;;  %v831_v14 = vpop.f32.mrf.mxu1 }
 0x15d   : > { %v1350_v15 = vpack.c.bf16 %v865_v11, %v865_v11  ;;  %v1376_v16 = vpack.c.bf16 %v891_v12, %v891_v12  ;;  %v728_v17 = vadd.f32 %v1691_v3, %v727_v13  ;;  %v832_v18 = vadd.f32 %v1691_v3, %v831_v14 }
 0x15e   : > { %v729_v19 = vpop.f32.mrf.mxu0  ;;  %v833_v20 = vpop.f32.mrf.mxu1 }
 0x15f   : > { %1116 = vst.msk [vmem:[%s1699_s28 + $0x4c] sm:$0xf] %vm1096_vm0, %v1350_v15  ;;  %1142 = vst.msk [vmem:[%s1699_s28 + $0xb4] sm:$0xf] %vm1096_vm0, %v1376_v16  ;;  %v866_v21 = vmax.f32 %v728_v17, 0.0  ;;  %v892_v22 = vmax.f32 %v832_v18, 0.0 }
 0x160   : > { %v730_v23 = vpop.f32.mrf.mxu0  ;;  %v834_v24 = vpop.f32.mrf.mxu1 }
 0x161   : > { %v1351_v25 = vpack.c.bf16 %v866_v21, %v866_v21  ;;  %v1377_v26 = vpack.c.bf16 %v892_v22, %v892_v22  ;;  %v731_v27 = vadd.f32 %v1691_v3, %v730_v23  ;;  %v835_v28 = vadd.f32 %v1691_v3, %v834_v24 }
 0x162   : > { %v732_v29 = vpop.f32.mrf.mxu0  ;;  %v836_v30 = vpop.f32.mrf.mxu1 }
 0x163   : > { %1117 = vst.msk [vmem:[%s1699_s28 + $0x50] sm:$0xf] %vm1096_vm0, %v1351_v25  ;;  %1143 = vst.msk [vmem:[%s1699_s28 + $0xb8] sm:$0xf] %vm1096_vm0, %v1377_v26  ;;  %v867_v31 = vmax.f32 %v731_v27, 0.0  ;;  %v893_v32 = vmax.f32 %v835_v28, 0.0 }
 0x164   : > { %v735_v33 = vpop.f32.mrf.mxu0  ;;  %v839_v34 = vpop.f32.mrf.mxu1 }
 0x165   : > { %v1352_v35 = vpack.c.bf16 %v867_v31, %v867_v31  ;;  %v1378_v36 = vpack.c.bf16 %v893_v32, %v893_v32  ;;  %v736_v37 = vadd.f32 %v1691_v3, %v735_v33  ;;  %v840_v38 = vadd.f32 %v1691_v3, %v839_v34 }
 0x166   : > { %v737_v39 = vpop.f32.mrf.mxu0  ;;  %v841_v40 = vpop.f32.mrf.mxu1 }
 0x167   : > { %1118 = vst.msk [vmem:[%s1699_s28 + $0x54] sm:$0xf] %vm1096_vm0, %v1352_v35  ;;  %1144 = vst.msk [vmem:[%s1699_s28 + $0xbc] sm:$0xf] %vm1096_vm0, %v1378_v36  ;;  %v868_v41 = vmax.f32 %v736_v37, 0.0  ;;  %v894_v42 = vmax.f32 %v840_v38, 0.0 }
 0x168   : > { %v738_v43 = vpop.f32.mrf.mxu0  ;;  %v842_v44 = vpop.f32.mrf.mxu1 }
 0x169   : > { %v1353_v45 = vpack.c.bf16 %v868_v41, %v868_v41  ;;  %v1379_v46 = vpack.c.bf16 %v894_v42, %v894_v42  ;;  %v739_v47 = vadd.f32 %v1691_v3, %v738_v43  ;;  %v843_v48 = vadd.f32 %v1691_v3, %v842_v44 }
 0x16a   : > { %v740_v49 = vpop.f32.mrf.mxu0  ;;  %v844_v50 = vpop.f32.mrf.mxu1 }
 0x16b   : > { %1119 = vst.msk [vmem:[%s1699_s28 + $0x58] sm:$0xf] %vm1096_vm0, %v1353_v45  ;;  %1145 = vst.msk [vmem:[%s1699_s28 + $0xc0] sm:$0xf] %vm1096_vm0, %v1379_v46  ;;  %v869_v51 = vmax.f32 %v739_v47, 0.0  ;;  %v895_v52 = vmax.f32 %v843_v48, 0.0 }
 0x16c   : > { %v743_v53 = vpop.f32.mrf.mxu0 }
 0x16d   : > { %v1354_v54 = vpack.c.bf16 %v869_v51, %v869_v51  ;;  %v1380_v55 = vpack.c.bf16 %v895_v52, %v895_v52  ;;  %v744_v56 = vadd.f32 %v1691_v3, %v743_v53 }
 0x16e   : > { %v745_v57 = vpop.f32.mrf.mxu0 }
 0x16f   : > { %1120 = vst.msk [vmem:[%s1699_s28 + $0x5c] sm:$0xf] %vm1096_vm0, %v1354_v54  ;;  %1146 = vst.msk [vmem:[%s1699_s28 + $0xc4] sm:$0xf] %vm1096_vm0, %v1380_v55  ;;  %v870_v58 = vmax.f32 %v744_v56, 0.0 }
 0x170   : > { %v746_v59 = vpop.f32.mrf.mxu0 }
 0x171   : > { %v1355_v60 = vpack.c.bf16 %v870_v58, %v870_v58  ;;  %v747_v61 = vadd.f32 %v1691_v3, %v746_v59 }
 0x172   : > { %v748_v62 = vpop.f32.mrf.mxu0 }
 0x173   : > { %1121 = vst.msk [vmem:[%s1699_s28 + $0x60] sm:$0xf] %vm1096_vm0, %v1355_v60  ;;  %v871_v63 = vmax.f32 %v747_v61, 0.0 }
 0x175   : > { %v1356_v0 = vpack.c.bf16 %v871_v63, %v871_v63 }
 0x177   : > { %1122 = vst.msk [vmem:[%s1699_s28 + $0x64] sm:$0xf] %vm1096_vm0, %v1356_v0 }
 0x178 PF: > { %s13_s12 = sadd.s32 1, %s1519_s12  }
 0x179   : > { %p10_p4 = scmp.ge.s32.totalorder %s13_s12, 4  }
 0x17b   :  { %12 = sbr.rel (!%p10_p4) target bundleno = 1 (0x1), region = 62 }

// kernel: state_to_q_values.5
= control target key start
LH: loop header
LB: loop body
LE: loop exit
PB: predicated region body
PF: predicated region fallthrough
CT: control target
= control target key end

     0   :  { %s1176_s12 = smov 0   ;;  %s1364_s0 = inlined_call_operand.vmem [shape: bf16[192,512], index: 0, kind: input, shape index: {}]   ;;  %s1365_s1 = inlined_call_operand.vmem [shape: bf16[512,128], index: 1, kind: input, shape index: {}]   ;;  %s1366_s2 = inlined_call_operand.vmem [shape: f32[1,128], index: 2, kind: input, shape index: {}]   ;;  %s1367_s3 = inlined_call_operand.vmem [shape: bf16[192,64], index: 3, kind: output, shape index: {}]  }
   0x1 LB: > { %s876_s13 = sadd.s32 4294967295, %s1154_s12   ;;  %p880_p0 = scmp.ge.s32.totalorder %s1154_s12, 1  ;;  %s1154_s12 = sphi %s1176_s12, %s13_s12  }
   0x2   : > { %p139_p1 = scmp.lt.s32.totalorder %s1154_s12, 3 }
   0x4   : > { %p140_p2 = pnand %p880_p0, %p139_p1 }
   0x5   : > { %s164_s19 = smul.u32 (!%p140_p2), 12, %s876_s13 }
   0x6   : > { %143 = sbr.rel (%p140_p2) target bundleno = 295 (0x127), region = 32 }
   0x7   : > { %p165_p3 = scmp.lt.s32.totalorder (!%p140_p2), %s164_s19, 23 }
   0xb   : > { %v1080_v0 = vld [vmem:[%s1365_s1 + $0x78] sm:$0xff]   ;;  %v1084_v4 = vld [vmem:[%s1365_s1 + $0x70] sm:$0xff]   ;;  %v1088_v8 = vld [vmem:[%s1365_s1 + $0x68] sm:$0xff]   ;;  %s1369_s19 = smov (!%p165_p3, %s164_s19), 23  ;;  %vm807_vm0 = vcmask 519168  }
   0xc   : > { %v1081_v1 = vld [vmem:[%s1365_s1 + $0xf8] sm:$0xff]   ;;  %968 = vmatprep.subr.bf16.mxu0 %v1080_v0  ;;  %v1085_v5 = vld [vmem:[%s1365_s1 + $0xf0] sm:$0xff]   ;;  %v1089_v9 = vld [vmem:[%s1365_s1 + $0xe8] sm:$0xff]   ;;  %s955_s18 = sshll.u32 %s1369_s19, 4  ;;  %s883_s7 = sshll.u32 %s1369_s19, 2 }
   0xd   : > { %v1082_v2 = vld [vmem:[%s1365_s1 + $0x38] sm:$0xff]   ;;  %1020 = vmatprep.subr.bf16.mxu1 %v1081_v1  ;;  %v1086_v6 = vld [vmem:[%s1365_s1 + $0x30] sm:$0xff]   ;;  %v1090_v10 = vld [vmem:[%s1365_s1 + $0x28] sm:$0xff]   ;;  %s1282_s13 = scalar_lea.vmem %s1364_s0, %s955_s18  ;;  %s1325_s10 = scalar_lea.vmem %s1367_s3, %s883_s7 }
   0xe   : > { %v1083_v3 = vld [vmem:[%s1365_s1 + $0xb8] sm:$0xff]   ;;  %969 = vmatpush3.bf16.msra.mxu0 %v1082_v2  ;;  %v1087_v7 = vld [vmem:[%s1365_s1 + $0xb0] sm:$0xff]   ;;  %v1091_v11 = vld [vmem:[%s1365_s1 + $0xa8] sm:$0xff]  }
   0xf   : > { %1021 = vmatpush3.bf16.msra.mxu1 %v1083_v3  ;;  %970 = vmatprep.subr.bf16.mxu0 %v1084_v4  ;;  %v1092_v12 = vld [vmem:[%s1365_s1 + $0x60] sm:$0xff]   ;;  %v1096_v16 = vld [vmem:[%s1365_s1 + $0x58] sm:$0xff]   ;;  %v1100_v20 = vld [vmem:[%s1365_s1 + $0x50] sm:$0xff]  }
  0x10   : > { %1022 = vmatprep.subr.bf16.mxu1 %v1085_v5  ;;  %v1093_v13 = vld [vmem:[%s1365_s1 + $0xe0] sm:$0xff]   ;;  %v1097_v17 = vld [vmem:[%s1365_s1 + $0xd8] sm:$0xff]   ;;  %v1101_v21 = vld [vmem:[%s1365_s1 + $0xd0] sm:$0xff]  }
  0x11   : > { %v1094_v14 = vld [vmem:[%s1365_s1 + $0x20] sm:$0xff]   ;;  %v1098_v18 = vld [vmem:[%s1365_s1 + $0x18] sm:$0xff]   ;;  %v1102_v22 = vld [vmem:[%s1365_s1 + $0x10] sm:$0xff]  }
  0x12   : > { %971 = vmatpush3.bf16.msra.mxu0 %v1086_v6  ;;  %v1095_v15 = vld [vmem:[%s1365_s1 + $0xa0] sm:$0xff]   ;;  %v1099_v19 = vld [vmem:[%s1365_s1 + $0x98] sm:$0xff]   ;;  %v1103_v23 = vld [vmem:[%s1365_s1 + $0x90] sm:$0xff]  }
  0x13   : > { %1023 = vmatpush3.bf16.msra.mxu1 %v1087_v7  ;;  %972 = vmatprep.subr.bf16.mxu0 %v1088_v8  ;;  %v1104_v24 = vld [vmem:[%s1365_s1 + $0x48] sm:$0xff]   ;;  %v1108_v28 = vld [vmem:[%s1365_s1 + $0x40] sm:$0xff]  }
  0x14   : > { %1024 = vmatprep.subr.bf16.mxu1 %v1089_v9  ;;  %v1105_v25 = vld [vmem:[%s1365_s1 + $0xc8] sm:$0xff]   ;;  %v1109_v29 = vld [vmem:[%s1365_s1 + $0xc0] sm:$0xff]  }
  0x15   : > { %v1106_v26 = vld [vmem:[%s1365_s1 + $0x8] sm:$0xff]   ;;  %v1110_v30 = vld [vmem:[%s1365_s1] sm:$0xff]  }
  0x16   : > { %973 = vmatpush3.bf16.msra.mxu0 %v1090_v10  ;;  %v1107_v27 = vld [vmem:[%s1365_s1 + $0x88] sm:$0xff]   ;;  %v1111_v31 = vld [vmem:[%s1365_s1 + $0x80] sm:$0xff]  }
  0x17   : > { %1025 = vmatpush3.bf16.msra.mxu1 %v1091_v11  ;;  %974 = vmatprep.subr.bf16.mxu0 %v1092_v12  ;;  %v1112_v32 = vld [vmem:[%s1282_s13] ss:$16 sps:$4 sm:$0xff]   ;;  %v1114_v33 = vld [vmem:[%s1282_s13 + $0x4] ss:$16 sps:$4 sm:$0xff]   ;;  %v1115_v34 = vld [vmem:[%s1282_s13 + $0x8] ss:$16 sps:$4 sm:$0xff]  }
  0x18   : > { %1026 = vmatprep.subr.bf16.mxu1 %v1093_v13  ;;  %v1117_v35 = vld [vmem:[%s1282_s13 + $0xc] ss:$16 sps:$4 sm:$0xff]   ;;  %617 = vmatprep.mubr.bf16.mxu0 %v1114_v33  ;;  %v1118_v36 = vld [vmem:[%s1282_s13 + $0x24] ss:$16 sps:$4 sm:$0xff]   ;;  %v1122_v38 = vld [vmem:[%s1282_s13 + $0x20] ss:$16 sps:$4 sm:$0xff]  }
  0x19   : > { %698 = vmatprep.mubr.bf16.mxu1 %v1117_v35  ;;  %v1120_v37 = vld [vmem:[%s1282_s13 + $0x2c] ss:$16 sps:$4 sm:$0xff]   ;;  %v1123_v39 = vld [vmem:[%s1282_s13 + $0x28] ss:$16 sps:$4 sm:$0xff]   ;;  %v1124_v40 = vld [vmem:[%s1282_s13 + $0x44] ss:$16 sps:$4 sm:$0xff]  }
  0x1a   : > { %975 = vmatpush3.bf16.msra.mxu0 %v1094_v14  ;;  %v1126_v41 = vld [vmem:[%s1282_s13 + $0x4c] ss:$16 sps:$4 sm:$0xff]   ;;  %v1128_v42 = vld [vmem:[%s1282_s13 + $0x40] ss:$16 sps:$4 sm:$0xff]   ;;  %v1129_v43 = vld [vmem:[%s1282_s13 + $0x48] ss:$16 sps:$4 sm:$0xff]  }
  0x1b   : > { %1027 = vmatpush3.bf16.msra.mxu1 %v1095_v15  ;;  %976 = vmatprep.subr.bf16.mxu0 %v1096_v16  ;;  %v1130_v44 = vld [vmem:[%s1282_s13 + $0x64] ss:$16 sps:$4 sm:$0xff]   ;;  %v1132_v45 = vld [vmem:[%s1282_s13 + $0x6c] ss:$16 sps:$4 sm:$0xff]   ;;  %v1134_v46 = vld [vmem:[%s1282_s13 + $0x60] ss:$16 sps:$4 sm:$0xff]  }
  0x1c   : > { %1028 = vmatprep.subr.bf16.mxu1 %v1097_v17  ;;  %v1135_v47 = vld [vmem:[%s1282_s13 + $0x68] ss:$16 sps:$4 sm:$0xff]   ;;  %v1136_v48 = vld [vmem:[%s1282_s13 + $0x84] ss:$16 sps:$4 sm:$0xff]   ;;  %v1138_v49 = vld [vmem:[%s1282_s13 + $0x8c] ss:$16 sps:$4 sm:$0xff]  }
  0x1d   : > { %v1140_v50 = vld [vmem:[%s1282_s13 + $0x80] ss:$16 sps:$4 sm:$0xff]   ;;  %v1141_v51 = vld [vmem:[%s1282_s13 + $0x88] ss:$16 sps:$4 sm:$0xff]   ;;  %v1142_v52 = vld [vmem:[%s1282_s13 + $0xa4] ss:$16 sps:$4 sm:$0xff]  }
  0x1e   : > { %977 = vmatpush3.bf16.msra.mxu0 %v1098_v18  ;;  %v1144_v53 = vld [vmem:[%s1282_s13 + $0xac] ss:$16 sps:$4 sm:$0xff]   ;;  %v1146_v54 = vld [vmem:[%s1282_s13 + $0xa0] ss:$16 sps:$4 sm:$0xff]   ;;  %v1147_v55 = vld [vmem:[%s1282_s13 + $0xa8] ss:$16 sps:$4 sm:$0xff]  }
  0x1f   : > { %1029 = vmatpush3.bf16.msra.mxu1 %v1099_v19  ;;  %978 = vmatprep.subr.bf16.mxu0 %v1100_v20  ;;  %v1317_v58 = vld [vmem:[%s1366_s2] ss:$0 sm:$0xff] }
  0x20   : > { %1030 = vmatprep.subr.bf16.mxu1 %v1101_v21 }
  0x22   : > { %979 = vmatpush3.bf16.msra.mxu0 %v1102_v22 }
  0x23   : > { %1031 = vmatpush3.bf16.msra.mxu1 %v1103_v23  ;;  %980 = vmatprep.subr.bf16.mxu0 %v1104_v24 }
  0x24   : > { %1032 = vmatprep.subr.bf16.mxu1 %v1105_v25 }
  0x26   : > { %981 = vmatpush3.bf16.msra.mxu0 %v1106_v26 }
  0x27   : > { %1033 = vmatpush3.bf16.msra.mxu1 %v1107_v27  ;;  %982 = vmatprep.subr.bf16.mxu0 %v1108_v28 }
  0x28   : > { %1034 = vmatprep.subr.bf16.mxu1 %v1109_v29 }
  0x2a   : > { %983 = vmatpush3.bf16.msra.mxu0 %v1110_v30 }
  0x2b   : > { %1035 = vmatpush3.bf16.msra.mxu1 %v1111_v31 }
  0x2d   : > { %618 = vmatmul.mubr.bf16.vlgmr.msra.gmra.mxu0 %v1112_v32 }
  0x2e   : > { %699 = vmatmul.mubr.bf16.vlgmr.msra.gmra.mxu1 %v1115_v34  ;;  %625 = vmatprep.mubr.bf16.mxu0 %v1118_v36 }
  0x2f   : > { %706 = vmatprep.mubr.bf16.mxu1 %v1120_v37 }
  0x35   : > { %626 = vmatmul.mubr.bf16.gmra.mxu0 %v1122_v38 }
  0x36   : > { %707 = vmatmul.mubr.bf16.gmra.mxu1 %v1123_v39  ;;  %633 = vmatprep.mubr.bf16.mxu0 %v1124_v40 }
  0x37   : > { %714 = vmatprep.mubr.bf16.mxu1 %v1126_v41 }
  0x3d   : > { %634 = vmatmul.mubr.bf16.gmra.mxu0 %v1128_v42 }
  0x3e   : > { %715 = vmatmul.mubr.bf16.gmra.mxu1 %v1129_v43  ;;  %641 = vmatprep.mubr.bf16.mxu0 %v1130_v44 }
  0x3f   : > { %722 = vmatprep.mubr.bf16.mxu1 %v1132_v45 }
  0x45   : > { %642 = vmatmul.mubr.bf16.gmra.mxu0 %v1134_v46 }
  0x46   : > { %723 = vmatmul.mubr.bf16.gmra.mxu1 %v1135_v47  ;;  %649 = vmatprep.mubr.bf16.mxu0 %v1136_v48 }
  0x47   : > { %730 = vmatprep.mubr.bf16.mxu1 %v1138_v49 }
  0x4d   : > { %650 = vmatmul.mubr.bf16.gmra.mxu0 %v1140_v50 }
  0x4e   : > { %731 = vmatmul.mubr.bf16.gmra.mxu1 %v1141_v51  ;;  %657 = vmatprep.mubr.bf16.mxu0 %v1142_v52 }
  0x4f   : > { %738 = vmatprep.mubr.bf16.mxu1 %v1144_v53 }
  0x55   : > { %658 = vmatmul.mubr.bf16.gmra.mxu0 %v1146_v54 }
  0x56   : > { %739 = vmatmul.mubr.bf16.gmra.mxu1 %v1147_v55 }
  0xed   : > { %v984_v56 = vpop.f32.mrf.mxu0 }
  0xee   : > { %v1036_v57 = vpop.f32.mrf.mxu1 }
  0xef   : > { %v985_v59 = vpop.f32.mrf.mxu0 }
  0xf0   : > { %v986_v60 = vadd.f32 %v985_v59, %v984_v56  ;;  %v1037_v61 = vpop.f32.mrf.mxu1 }
  0xf1   : > { %v987_v62 = vpop.f32.mrf.mxu0  ;;  %v1038_v0 = vadd.f32 %v1037_v61, %v1036_v57 }
  0xf2   : > { %v620_v63 = vadd.f32 %v986_v60, %v1317_v58  ;;  %v1039_v1 = vpop.f32.mrf.mxu1 }
  0xf3   : > { %v988_v2 = vpop.f32.mrf.mxu0 }
  0xf4   : > { %v701_v3 = vadd.f32 %v1038_v0, %v620_v63  ;;  %v989_v4 = vadd.f32 %v988_v2, %v987_v62  ;;  %v1040_v5 = vpop.f32.mrf.mxu1 }
  0xf5   : > { %v990_v6 = vpop.f32.mrf.mxu0  ;;  %v1041_v9 = vadd.f32 %v1040_v5, %v1039_v1 }
  0xf6   : > { %v747_v7 = vmax.f32 %v701_v3, 0.0  ;;  %v623_v8 = vadd.f32 %v989_v4, %v1317_v58  ;;  %v1042_v10 = vpop.f32.mrf.mxu1 }
  0xf7   : > { %v991_v11 = vpop.f32.mrf.mxu0 }
  0xf8   : > { %v956_v12 = vpack.c.bf16 %v747_v7, %v747_v7  ;;  %v704_v13 = vadd.f32 %v1041_v9, %v623_v8  ;;  %v992_v14 = vadd.f32 %v991_v11, %v990_v6  ;;  %v1043_v15 = vpop.f32.mrf.mxu1 }
  0xf9   : > { %v993_v16 = vpop.f32.mrf.mxu0  ;;  %v1044_v19 = vadd.f32 %v1043_v15, %v1042_v10 }
  0xfa   : > { %808 = vst.msk [vmem:[%s1325_s10] sm:$0xf] %vm807_vm0, %v956_v12  ;;  %v748_v17 = vmax.f32 %v704_v13, 0.0  ;;  %v628_v18 = vadd.f32 %v992_v14, %v1317_v58  ;;  %v1045_v20 = vpop.f32.mrf.mxu1 }
  0xfb   : > { %v994_v21 = vpop.f32.mrf.mxu0 }
  0xfc   : > { %v957_v22 = vpack.c.bf16 %v748_v17, %v748_v17  ;;  %v709_v23 = vadd.f32 %v1044_v19, %v628_v18  ;;  %v995_v24 = vadd.f32 %v994_v21, %v993_v16  ;;  %v1046_v25 = vpop.f32.mrf.mxu1 }
  0xfd   : > { %v996_v26 = vpop.f32.mrf.mxu0  ;;  %v1047_v29 = vadd.f32 %v1046_v25, %v1045_v20 }
  0xfe   : > { %809 = vst.msk [vmem:[%s1325_s10 + $0x4] sm:$0xf] %vm807_vm0, %v957_v22  ;;  %v749_v27 = vmax.f32 %v709_v23, 0.0  ;;  %v631_v28 = vadd.f32 %v995_v24, %v1317_v58  ;;  %v1048_v30 = vpop.f32.mrf.mxu1 }
  0xff   : > { %v997_v31 = vpop.f32.mrf.mxu0 }
 0x100   : > { %v958_v32 = vpack.c.bf16 %v749_v27, %v749_v27  ;;  %v712_v33 = vadd.f32 %v1047_v29, %v631_v28  ;;  %v998_v34 = vadd.f32 %v997_v31, %v996_v26  ;;  %v1049_v35 = vpop.f32.mrf.mxu1 }
 0x101   : > { %v999_v36 = vpop.f32.mrf.mxu0  ;;  %v1050_v39 = vadd.f32 %v1049_v35, %v1048_v30 }
 0x102   : > { %810 = vst.msk [vmem:[%s1325_s10 + $0x8] sm:$0xf] %vm807_vm0, %v958_v32  ;;  %v750_v37 = vmax.f32 %v712_v33, 0.0  ;;  %v636_v38 = vadd.f32 %v998_v34, %v1317_v58  ;;  %v1051_v40 = vpop.f32.mrf.mxu1 }
 0x103   : > { %v1000_v41 = vpop.f32.mrf.mxu0 }
 0x104   : > { %v959_v42 = vpack.c.bf16 %v750_v37, %v750_v37  ;;  %v717_v43 = vadd.f32 %v1050_v39, %v636_v38  ;;  %v1001_v44 = vadd.f32 %v1000_v41, %v999_v36  ;;  %v1052_v45 = vpop.f32.mrf.mxu1 }
 0x105   : > { %v1002_v46 = vpop.f32.mrf.mxu0  ;;  %v1053_v49 = vadd.f32 %v1052_v45, %v1051_v40 }
 0x106   : > { %811 = vst.msk [vmem:[%s1325_s10 + $0xc] sm:$0xf] %vm807_vm0, %v959_v42  ;;  %v751_v47 = vmax.f32 %v717_v43, 0.0  ;;  %v639_v48 = vadd.f32 %v1001_v44, %v1317_v58  ;;  %v1054_v50 = vpop.f32.mrf.mxu1 }
 0x107   : > { %v1003_v51 = vpop.f32.mrf.mxu0 }
 0x108   : > { %v960_v52 = vpack.c.bf16 %v751_v47, %v751_v47  ;;  %v720_v53 = vadd.f32 %v1053_v49, %v639_v48  ;;  %v1004_v54 = vadd.f32 %v1003_v51, %v1002_v46  ;;  %v1055_v55 = vpop.f32.mrf.mxu1 }
 0x109   : > { %v1005_v56 = vpop.f32.mrf.mxu0  ;;  %v1056_v60 = vadd.f32 %v1055_v55, %v1054_v50 }
 0x10a   : > { %812 = vst.msk [vmem:[%s1325_s10 + $0x10] sm:$0xf] %vm807_vm0, %v960_v52  ;;  %v752_v57 = vmax.f32 %v720_v53, 0.0  ;;  %v644_v59 = vadd.f32 %v1004_v54, %v1317_v58  ;;  %v1057_v61 = vpop.f32.mrf.mxu1 }
 0x10b   : > { %v1006_v62 = vpop.f32.mrf.mxu0 }
 0x10c   : > { %v961_v63 = vpack.c.bf16 %v752_v57, %v752_v57  ;;  %v725_v0 = vadd.f32 %v1056_v60, %v644_v59  ;;  %v1007_v1 = vadd.f32 %v1006_v62, %v1005_v56  ;;  %v1058_v2 = vpop.f32.mrf.mxu1 }
 0x10d   : > { %v1008_v3 = vpop.f32.mrf.mxu0  ;;  %v1059_v6 = vadd.f32 %v1058_v2, %v1057_v61 }
 0x10e   : > { %813 = vst.msk [vmem:[%s1325_s10 + $0x14] sm:$0xf] %vm807_vm0, %v961_v63  ;;  %v753_v4 = vmax.f32 %v725_v0, 0.0  ;;  %v647_v5 = vadd.f32 %v1007_v1, %v1317_v58  ;;  %v1060_v7 = vpop.f32.mrf.mxu1 }
 0x10f   : > { %v1009_v8 = vpop.f32.mrf.mxu0 }
 0x110   : > { %v962_v9 = vpack.c.bf16 %v753_v4, %v753_v4  ;;  %v728_v10 = vadd.f32 %v1059_v6, %v647_v5  ;;  %v1010_v11 = vadd.f32 %v1009_v8, %v1008_v3  ;;  %v1061_v12 = vpop.f32.mrf.mxu1 }
 0x111   : > { %v1011_v13 = vpop.f32.mrf.mxu0  ;;  %v1062_v16 = vadd.f32 %v1061_v12, %v1060_v7 }
 0x112   : > { %814 = vst.msk [vmem:[%s1325_s10 + $0x18] sm:$0xf] %vm807_vm0, %v962_v9  ;;  %v754_v14 = vmax.f32 %v728_v10, 0.0  ;;  %v652_v15 = vadd.f32 %v1010_v11, %v1317_v58  ;;  %v1063_v17 = vpop.f32.mrf.mxu1 }
 0x113   : > { %v1012_v18 = vpop.f32.mrf.mxu0 }
 0x114   : > { %v963_v19 = vpack.c.bf16 %v754_v14, %v754_v14  ;;  %v733_v20 = vadd.f32 %v1062_v16, %v652_v15  ;;  %v1013_v21 = vadd.f32 %v1012_v18, %v1011_v13  ;;  %v1064_v22 = vpop.f32.mrf.mxu1 }
 0x115   : > { %v1014_v23 = vpop.f32.mrf.mxu0  ;;  %v1065_v26 = vadd.f32 %v1064_v22, %v1063_v17 }
 0x116   : > { %815 = vst.msk [vmem:[%s1325_s10 + $0x1c] sm:$0xf] %vm807_vm0, %v963_v19  ;;  %v755_v24 = vmax.f32 %v733_v20, 0.0  ;;  %v655_v25 = vadd.f32 %v1013_v21, %v1317_v58  ;;  %v1066_v27 = vpop.f32.mrf.mxu1 }
 0x117   : > { %v1015_v28 = vpop.f32.mrf.mxu0 }
 0x118   : > { %v964_v29 = vpack.c.bf16 %v755_v24, %v755_v24  ;;  %v736_v30 = vadd.f32 %v1065_v26, %v655_v25  ;;  %v1016_v31 = vadd.f32 %v1015_v28, %v1014_v23  ;;  %v1067_v32 = vpop.f32.mrf.mxu1 }
 0x119   : > { %v1017_v33 = vpop.f32.mrf.mxu0  ;;  %v1068_v36 = vadd.f32 %v1067_v32, %v1066_v27 }
 0x11a   : > { %816 = vst.msk [vmem:[%s1325_s10 + $0x20] sm:$0xf] %vm807_vm0, %v964_v29  ;;  %v756_v34 = vmax.f32 %v736_v30, 0.0  ;;  %v660_v35 = vadd.f32 %v1016_v31, %v1317_v58  ;;  %v1069_v37 = vpop.f32.mrf.mxu1 }
 0x11b   : > { %v1018_v38 = vpop.f32.mrf.mxu0 }
 0x11c   : > { %v965_v39 = vpack.c.bf16 %v756_v34, %v756_v34  ;;  %v741_v40 = vadd.f32 %v1068_v36, %v660_v35  ;;  %v1019_v41 = vadd.f32 %v1018_v38, %v1017_v33  ;;  %v1070_v42 = vpop.f32.mrf.mxu1 }
 0x11d   : > { %v1071_v45 = vadd.f32 %v1070_v42, %v1069_v37 }
 0x11e   : > { %817 = vst.msk [vmem:[%s1325_s10 + $0x24] sm:$0xf] %vm807_vm0, %v965_v39  ;;  %v757_v43 = vmax.f32 %v741_v40, 0.0  ;;  %v663_v44 = vadd.f32 %v1019_v41, %v1317_v58 }
 0x120   : > { %v966_v46 = vpack.c.bf16 %v757_v43, %v757_v43  ;;  %v744_v47 = vadd.f32 %v1071_v45, %v663_v44 }
 0x122   : > { %818 = vst.msk [vmem:[%s1325_s10 + $0x28] sm:$0xf] %vm807_vm0, %v966_v46  ;;  %v758_v48 = vmax.f32 %v744_v47, 0.0 }
 0x124   : > { %v967_v49 = vpack.c.bf16 %v758_v48, %v758_v48 }
 0x126   : > { %819 = vst.msk [vmem:[%s1325_s10 + $0x2c] sm:$0xf] %vm807_vm0, %v967_v49 }
 0x127 PF: > { %s13_s12 = sadd.s32 1, %s1154_s12  }
 0x128   : > { %p10_p4 = scmp.ge.s32.totalorder %s13_s12, 4  }
 0x12a   :  { %12 = sbr.rel (!%p10_p4) target bundleno = 1 (0x1), region = 62 }

// kernel: state_to_q_values.6
= control target key start
LH: loop header
LB: loop body
LE: loop exit
PB: predicated region body
PF: predicated region fallthrough
CT: control target
= control target key end

     0   :  { %s1258_s12 = smov 0   ;;  %s1444_s0 = inlined_call_operand.vmem [shape: bf16[128,640], index: 0, kind: input, shape index: {}]   ;;  %s1445_s1 = inlined_call_operand.vmem [shape: bf16[640,128], index: 1, kind: input, shape index: {}]   ;;  %s1446_s2 = inlined_call_operand.vmem [shape: f32[1,128], index: 2, kind: input, shape index: {}]   ;;  %s1447_s3 = inlined_call_operand.vmem [shape: bf16[128,64], index: 3, kind: output, shape index: {}]  }
   0x1 LB: > { %s933_s13 = sadd.s32 4294967295, %s1236_s12   ;;  %p937_p0 = scmp.ge.s32.totalorder %s1236_s12, 1  ;;  %s1236_s12 = sphi %s1258_s12, %s13_s12  }
   0x2   : > { %p139_p1 = scmp.lt.s32.totalorder %s1236_s12, 3 }
   0x4   : > { %p140_p2 = pnand %p937_p0, %p139_p1 }
   0x5   : > { %s938_s19 = sshll.u32 (!%p140_p2), %s933_s13, 3 }
   0x6   : > { %143 = sbr.rel (%p140_p2) target bundleno = 285 (0x11d), region = 32  ;;  %p165_p3 = scmp.lt.s32.totalorder (!%p140_p2), %s938_s19, 15 }
   0xb   : > { %v1162_v0 = vld [vmem:[%s1445_s1 + $0x78] sm:$0xff]   ;;  %v1166_v4 = vld [vmem:[%s1445_s1 + $0x70] sm:$0xff]   ;;  %v1170_v8 = vld [vmem:[%s1445_s1 + $0x68] sm:$0xff]   ;;  %s1449_s19 = smov (!%p165_p3, %s938_s19), 15  ;;  %vm868_vm0 = vcmask 519168  }
   0xc   : > { %v1163_v1 = vld [vmem:[%s1445_s1 + $0xf8] sm:$0xff]   ;;  %1021 = vmatprep.subr.bf16.mxu0 %v1162_v0  ;;  %v1167_v5 = vld [vmem:[%s1445_s1 + $0xf0] sm:$0xff]   ;;  %v1171_v9 = vld [vmem:[%s1445_s1 + $0xe8] sm:$0xff]   ;;  %s1153_s16 = smul.u32 20, %s1449_s19  ;;  %s941_s26 = sshll.u32 %s1449_s19, 2 }
   0xd   : > { %v1164_v2 = vld [vmem:[%s1445_s1 + $0x38] sm:$0xff]   ;;  %1061 = vmatprep.subr.bf16.mxu1 %v1163_v1  ;;  %v1168_v6 = vld [vmem:[%s1445_s1 + $0x30] sm:$0xff]   ;;  %v1172_v10 = vld [vmem:[%s1445_s1 + $0x28] sm:$0xff]   ;;  %s1423_s28 = scalar_lea.vmem %s1447_s3, %s941_s26 }
   0xe   : > { %v1165_v3 = vld [vmem:[%s1445_s1 + $0xb8] sm:$0xff]   ;;  %1022 = vmatpush3.bf16.msra.mxu0 %v1164_v2  ;;  %v1169_v7 = vld [vmem:[%s1445_s1 + $0xb0] sm:$0xff]   ;;  %v1173_v11 = vld [vmem:[%s1445_s1 + $0xa8] sm:$0xff]   ;;  %s1364_s13 = scalar_lea.vmem %s1444_s0, %s1153_s16 }
   0xf   : > { %1062 = vmatpush3.bf16.msra.mxu1 %v1165_v3  ;;  %1023 = vmatprep.subr.bf16.mxu0 %v1166_v4  ;;  %v1174_v12 = vld [vmem:[%s1445_s1 + $0x60] sm:$0xff]   ;;  %v1178_v16 = vld [vmem:[%s1445_s1 + $0x58] sm:$0xff]   ;;  %v1182_v20 = vld [vmem:[%s1445_s1 + $0x50] sm:$0xff]  }
  0x10   : > { %1063 = vmatprep.subr.bf16.mxu1 %v1167_v5  ;;  %v1175_v13 = vld [vmem:[%s1445_s1 + $0xe0] sm:$0xff]   ;;  %v1179_v17 = vld [vmem:[%s1445_s1 + $0xd8] sm:$0xff]   ;;  %v1183_v21 = vld [vmem:[%s1445_s1 + $0xd0] sm:$0xff]  }
  0x11   : > { %v1176_v14 = vld [vmem:[%s1445_s1 + $0x20] sm:$0xff]   ;;  %v1180_v18 = vld [vmem:[%s1445_s1 + $0x18] sm:$0xff]   ;;  %v1184_v22 = vld [vmem:[%s1445_s1 + $0x10] sm:$0xff]  }
  0x12   : > { %1024 = vmatpush3.bf16.msra.mxu0 %v1168_v6  ;;  %v1177_v15 = vld [vmem:[%s1445_s1 + $0xa0] sm:$0xff]   ;;  %v1181_v19 = vld [vmem:[%s1445_s1 + $0x98] sm:$0xff]   ;;  %v1185_v23 = vld [vmem:[%s1445_s1 + $0x90] sm:$0xff]  }
  0x13   : > { %1064 = vmatpush3.bf16.msra.mxu1 %v1169_v7  ;;  %1025 = vmatprep.subr.bf16.mxu0 %v1170_v8  ;;  %v1186_v24 = vld [vmem:[%s1445_s1 + $0x48] sm:$0xff]   ;;  %v1190_v28 = vld [vmem:[%s1445_s1 + $0x40] sm:$0xff]   ;;  %v1200_v36 = vld [vmem:[%s1445_s1 + $0x138] sm:$0xff]  }
  0x14   : > { %1065 = vmatprep.subr.bf16.mxu1 %v1171_v9  ;;  %v1187_v25 = vld [vmem:[%s1445_s1 + $0xc8] sm:$0xff]   ;;  %v1191_v29 = vld [vmem:[%s1445_s1 + $0xc0] sm:$0xff]   ;;  %v1201_v37 = vld [vmem:[%s1445_s1 + $0x130] sm:$0xff]  }
  0x15   : > { %v1188_v26 = vld [vmem:[%s1445_s1 + $0x8] sm:$0xff]   ;;  %v1192_v30 = vld [vmem:[%s1445_s1] sm:$0xff]   ;;  %v1212_v45 = vld [vmem:[%s1364_s13 + $0x5c] ss:$20 sps:$4 sm:$0xff]  }
  0x16   : > { %1026 = vmatpush3.bf16.msra.mxu0 %v1172_v10  ;;  %v1189_v27 = vld [vmem:[%s1445_s1 + $0x88] sm:$0xff]   ;;  %v1193_v31 = vld [vmem:[%s1445_s1 + $0x80] sm:$0xff]   ;;  %v1216_v46 = vld [vmem:[%s1445_s1 + $0x118] sm:$0xff]  }
  0x17   : > { %1066 = vmatpush3.bf16.msra.mxu1 %v1173_v11  ;;  %1027 = vmatprep.subr.bf16.mxu0 %v1174_v12  ;;  %v1194_v32 = vld [vmem:[%s1364_s13] ss:$20 sps:$4 sm:$0xff]   ;;  %v1196_v33 = vld [vmem:[%s1364_s13 + $0x4] ss:$20 sps:$4 sm:$0xff]   ;;  %v1197_v34 = vld [vmem:[%s1364_s13 + $0x8] ss:$20 sps:$4 sm:$0xff]  }
  0x18   : > { %1067 = vmatprep.subr.bf16.mxu1 %v1175_v13  ;;  %v1199_v35 = vld [vmem:[%s1364_s13 + $0xc] ss:$20 sps:$4 sm:$0xff]   ;;  %665 = vmatprep.mubr.bf16.mxu0 %v1196_v33  ;;  %v1204_v39 = vld [vmem:[%s1364_s13 + $0x34] ss:$20 sps:$4 sm:$0xff]   ;;  %v1207_v42 = vld [vmem:[%s1364_s13 + $0x30] ss:$20 sps:$4 sm:$0xff]  }
  0x19   : > { %730 = vmatprep.mubr.bf16.mxu1 %v1199_v35  ;;  %v1202_v38 = vld [vmem:[%s1364_s13 + $0x2c] ss:$20 sps:$4 sm:$0xff]   ;;  %v1206_v40 = vld [vmem:[%s1364_s13 + $0x28] ss:$20 sps:$4 sm:$0xff]   ;;  %v1214_v47 = vld [vmem:[%s1364_s13 + $0x50] ss:$20 sps:$4 sm:$0xff]  }
  0x1a   : > { %1028 = vmatpush3.bf16.msra.mxu0 %v1176_v14  ;;  %v1208_v41 = vld [vmem:[%s1445_s1 + $0x128] sm:$0xff]   ;;  %v1209_v44 = vld [vmem:[%s1445_s1 + $0x120] sm:$0xff]   ;;  %v1218_v49 = vld [vmem:[%s1364_s13 + $0x7c] ss:$20 sps:$4 sm:$0xff]  }
  0x1b   : > { %1068 = vmatpush3.bf16.msra.mxu1 %v1177_v15  ;;  %1029 = vmatprep.subr.bf16.mxu0 %v1178_v16  ;;  %v1210_v43 = vld [vmem:[%s1364_s13 + $0x54] ss:$20 sps:$4 sm:$0xff]   ;;  %v1215_v48 = vld [vmem:[%s1364_s13 + $0x58] ss:$20 sps:$4 sm:$0xff]   ;;  %v1226_v55 = vld [vmem:[%s1364_s13 + $0x10] ss:$20 sps:$4 sm:$0xff]  }
  0x1c   : > { %1069 = vmatprep.subr.bf16.mxu1 %v1179_v17  ;;  %v1220_v50 = vld [vmem:[%s1364_s13 + $0x84] ss:$20 sps:$4 sm:$0xff]   ;;  %v1217_v51 = vld [vmem:[%s1445_s1 + $0x110] sm:$0xff]   ;;  %v1224_v52 = vld [vmem:[%s1445_s1 + $0x108] sm:$0xff]  }
  0x1d   : > { %v1222_v53 = vld [vmem:[%s1364_s13 + $0x78] ss:$20 sps:$4 sm:$0xff]   ;;  %v1223_v54 = vld [vmem:[%s1364_s13 + $0x80] ss:$20 sps:$4 sm:$0xff]   ;;  %v1229_v59 = vld [vmem:[%s1364_s13 + $0x88] ss:$20 sps:$4 sm:$0xff]  }
  0x1e   : > { %1030 = vmatpush3.bf16.msra.mxu0 %v1180_v18  ;;  %v1227_v56 = vld [vmem:[%s1364_s13 + $0x60] ss:$20 sps:$4 sm:$0xff]   ;;  %v1228_v58 = vld [vmem:[%s1364_s13 + $0x38] ss:$20 sps:$4 sm:$0xff]  }
  0x1f   : > { %1070 = vmatpush3.bf16.msra.mxu1 %v1181_v19  ;;  %1031 = vmatprep.subr.bf16.mxu0 %v1182_v20  ;;  %v1225_v57 = vld [vmem:[%s1445_s1 + $0x100] sm:$0xff]  }
  0x20   : > { %1071 = vmatprep.subr.bf16.mxu1 %v1183_v21 }
  0x22   : > { %1032 = vmatpush3.bf16.msra.mxu0 %v1184_v22 }
  0x23   : > { %1072 = vmatpush3.bf16.msra.mxu1 %v1185_v23  ;;  %1033 = vmatprep.subr.bf16.mxu0 %v1186_v24 }
  0x24   : > { %1073 = vmatprep.subr.bf16.mxu1 %v1187_v25  ;;  %v942_v25 = vld [vmem:[%s1446_s2] ss:$0 sm:$0xff] }
  0x26   : > { %1034 = vmatpush3.bf16.msra.mxu0 %v1188_v26 }
  0x27   : > { %1074 = vmatpush3.bf16.msra.mxu1 %v1189_v27  ;;  %1035 = vmatprep.subr.bf16.mxu0 %v1190_v28 }
  0x28   : > { %1075 = vmatprep.subr.bf16.mxu1 %v1191_v29 }
  0x2a   : > { %1036 = vmatpush3.bf16.msra.mxu0 %v1192_v30 }
  0x2b   : > { %1076 = vmatpush3.bf16.msra.mxu1 %v1193_v31  ;;  %1113 = vmatprep.subr.bf16.mxu0 %v1200_v36 }
  0x2c   : > { %1137 = vmatprep.subr.bf16.mxu1 %v1200_v36 }
  0x2d   : > { %666 = vmatmul.mubr.bf16.vlgmr.msra.gmra.mxu0 %v1194_v32 }
  0x2e   : > { %731 = vmatmul.mubr.bf16.vlgmr.msra.gmra.mxu1 %v1197_v34  ;;  %1114 = vmatpush3.bf16.msra.mxu0 %v1200_v36 }
  0x2f   : > { %1145 = vmatpush3.bf16.msra.mxu1 %v1200_v36  ;;  %1115 = vmatprep.subr.bf16.mxu0 %v1201_v37 }
  0x30   : > { %1138 = vmatprep.subr.bf16.mxu1 %v1201_v37  ;;  %673 = vmatprep.mubr.bf16.mxu0 %v1202_v38 }
  0x31   : > { %738 = vmatprep.mubr.bf16.mxu1 %v1204_v39 }
  0x32   : > { %1116 = vmatpush3.bf16.msra.mxu0 %v1201_v37 }
  0x33   : > { %1146 = vmatpush3.bf16.msra.mxu1 %v1201_v37  ;;  %1117 = vmatprep.subr.bf16.mxu0 %v1208_v41 }
  0x34   : > { %1139 = vmatprep.subr.bf16.mxu1 %v1208_v41 }
  0x35   : > { %674 = vmatmul.mubr.bf16.gmra.mxu0 %v1206_v40 }
  0x36   : > { %739 = vmatmul.mubr.bf16.gmra.mxu1 %v1207_v42  ;;  %681 = vmatprep.mubr.bf16.mxu0 %v1210_v43 }
  0x37   : > { %1118 = vmatpush3.bf16.msra.mxu0 %v1208_v41  ;;  %746 = vmatprep.mubr.bf16.mxu1 %v1212_v45 }
  0x38   : > { %1147 = vmatpush3.bf16.msra.mxu1 %v1208_v41  ;;  %1119 = vmatprep.subr.bf16.mxu0 %v1209_v44 }
  0x39   : > { %1140 = vmatprep.subr.bf16.mxu1 %v1209_v44 }
  0x3b   : > { %1120 = vmatpush3.bf16.msra.mxu0 %v1209_v44 }
  0x3c   : > { %1148 = vmatpush3.bf16.msra.mxu1 %v1209_v44  ;;  %1121 = vmatprep.subr.bf16.mxu0 %v1216_v46 }
  0x3d   : > { %682 = vmatmul.mubr.bf16.gmra.mxu0 %v1214_v47  ;;  %1141 = vmatprep.subr.bf16.mxu1 %v1216_v46 }
  0x3e   : > { %747 = vmatmul.mubr.bf16.gmra.mxu1 %v1215_v48  ;;  %689 = vmatprep.mubr.bf16.mxu0 %v1218_v49 }
  0x3f   : > { %1122 = vmatpush3.bf16.msra.mxu0 %v1216_v46  ;;  %754 = vmatprep.mubr.bf16.mxu1 %v1220_v50 }
  0x40   : > { %1149 = vmatpush3.bf16.msra.mxu1 %v1216_v46  ;;  %1123 = vmatprep.subr.bf16.mxu0 %v1217_v51 }
  0x41   : > { %1142 = vmatprep.subr.bf16.mxu1 %v1217_v51 }
  0x43   : > { %1124 = vmatpush3.bf16.msra.mxu0 %v1217_v51 }
  0x44   : > { %1150 = vmatpush3.bf16.msra.mxu1 %v1217_v51  ;;  %1125 = vmatprep.subr.bf16.mxu0 %v1224_v52 }
  0x45   : > { %690 = vmatmul.mubr.bf16.gmra.mxu0 %v1222_v53  ;;  %1143 = vmatprep.subr.bf16.mxu1 %v1224_v52 }
  0x46   : > { %755 = vmatmul.mubr.bf16.gmra.mxu1 %v1223_v54  ;;  %1129 = vmatprep.mubr.bf16.mxu0 %v1226_v55 }
  0x47   : > { %1126 = vmatpush3.bf16.msra.mxu0 %v1224_v52  ;;  %1133 = vmatprep.mubr.bf16.mxu1 %v1227_v56 }
  0x48   : > { %1151 = vmatpush3.bf16.msra.mxu1 %v1224_v52  ;;  %1127 = vmatprep.subr.bf16.mxu0 %v1225_v57 }
  0x49   : > { %1144 = vmatprep.subr.bf16.mxu1 %v1225_v57 }
  0x4b   : > { %1128 = vmatpush3.bf16.msra.mxu0 %v1225_v57 }
  0x4c   : > { %1152 = vmatpush3.bf16.msra.mxu1 %v1225_v57 }
  0x4e   : > { %1130 = vmatmul.mubr.bf16.vlgmr.msra.gmra.mxu0 %v1228_v58 }
  0x4f   : > { %1134 = vmatmul.mubr.bf16.vlgmr.msra.gmra.mxu1 %v1229_v59 }
  0xed   : > { %v1037_v60 = vpop.f32.mrf.mxu0 }
  0xee   : > { %v1077_v61 = vpop.f32.mrf.mxu1 }
  0xef   : > { %v1038_v62 = vpop.f32.mrf.mxu0 }
  0xf0   : > { %v1078_v63 = vpop.f32.mrf.mxu1  ;;  %v1039_v23 = vadd.f32 %v1038_v62, %v1037_v60 }
  0xf1   : > { %v1040_v0 = vpop.f32.mrf.mxu0  ;;  %v1079_v44 = vadd.f32 %v1078_v63, %v1077_v61 }
  0xf2   : > { %v1080_v1 = vpop.f32.mrf.mxu1  ;;  %v668_v35 = vadd.f32 %v1039_v23, %v942_v25 }
  0xf3   : > { %v1041_v2 = vpop.f32.mrf.mxu0 }
  0xf4   : > { %v1081_v3 = vpop.f32.mrf.mxu1  ;;  %v1042_v36 = vadd.f32 %v1041_v2, %v1040_v0  ;;  %v733_v55 = vadd.f32 %v1079_v44, %v668_v35 }
  0xf5   : > { %v1043_v4 = vpop.f32.mrf.mxu0  ;;  %v1082_v62 = vadd.f32 %v1081_v3, %v1080_v1 }
  0xf6   : > { %v1083_v5 = vpop.f32.mrf.mxu1  ;;  %v671_v51 = vadd.f32 %v1042_v36, %v942_v25 }
  0xf7   : > { %v1044_v6 = vpop.f32.mrf.mxu0 }
  0xf8   : > { %v1084_v7 = vpop.f32.mrf.mxu1  ;;  %v1045_v20 = vadd.f32 %v1044_v6, %v1043_v4  ;;  %v736_v3 = vadd.f32 %v1082_v62, %v671_v51 }
  0xf9   : > { %v1046_v8 = vpop.f32.mrf.mxu0  ;;  %v1085_v37 = vadd.f32 %v1084_v7, %v1083_v5 }
  0xfa   : > { %v1086_v9 = vpop.f32.mrf.mxu1  ;;  %v676_v29 = vadd.f32 %v1045_v20, %v942_v25 }
  0xfb   : > { %v1047_v10 = vpop.f32.mrf.mxu0 }
  0xfc   : > { %v1087_v11 = vpop.f32.mrf.mxu1  ;;  %v1048_v30 = vadd.f32 %v1047_v10, %v1046_v8  ;;  %v741_v46 = vadd.f32 %v1085_v37, %v676_v29 }
  0xfd   : > { %v1049_v12 = vpop.f32.mrf.mxu0  ;;  %v1088_v52 = vadd.f32 %v1087_v11, %v1086_v9 }
  0xfe   : > { %v1089_v13 = vpop.f32.mrf.mxu1  ;;  %v679_v45 = vadd.f32 %v1048_v30, %v942_v25 }
  0xff   : > { %v1050_v14 = vpop.f32.mrf.mxu0 }
 0x100   : > { %v1090_v15 = vpop.f32.mrf.mxu1  ;;  %v1051_v26 = vadd.f32 %v1050_v14, %v1049_v12  ;;  %v744_v2 = vadd.f32 %v1088_v52, %v679_v45 }
 0x101   : > { %v1052_v16 = vpop.f32.mrf.mxu0  ;;  %v1091_v47 = vadd.f32 %v1090_v15, %v1089_v13 }
 0x102   : > { %v1092_v17 = vpop.f32.mrf.mxu1  ;;  %v684_v39 = vadd.f32 %v1051_v26, %v942_v25 }
 0x103   : > { %v1053_v18 = vpop.f32.mrf.mxu0 }
 0x104   : > { %v1093_v19 = vpop.f32.mrf.mxu1  ;;  %v1054_v40 = vadd.f32 %v1053_v18, %v1052_v16  ;;  %v749_v59 = vadd.f32 %v1091_v47, %v684_v39 }
 0x105   : > { %v1055_v21 = vpop.f32.mrf.mxu0  ;;  %v1094_v4 = vadd.f32 %v1093_v19, %v1092_v17 }
 0x106   : > { %v1095_v22 = vpop.f32.mrf.mxu1  ;;  %v687_v56 = vadd.f32 %v1054_v40, %v942_v25 }
 0x107   : > { %v1056_v24 = vpop.f32.mrf.mxu0 }
 0x108   : > { %v1057_v27 = vadd.f32 %v1056_v24, %v1055_v21  ;;  %v1096_v28 = vpop.f32.mrf.mxu1  ;;  %v752_v15 = vadd.f32 %v1094_v4, %v687_v56 }
 0x109   : > { %v1058_v31 = vpop.f32.mrf.mxu0  ;;  %v1097_v33 = vadd.f32 %v1096_v28, %v1095_v22 }
 0x10a   : > { %v692_v32 = vadd.f32 %v1057_v27, %v942_v25  ;;  %v1098_v34 = vpop.f32.mrf.mxu1 }
 0x10b   : > { %v1059_v38 = vpop.f32.mrf.mxu0 }
 0x10c   : > { %v1060_v41 = vadd.f32 %v1059_v38, %v1058_v31  ;;  %v1099_v42 = vpop.f32.mrf.mxu1  ;;  %v757_v43 = vadd.f32 %v1097_v33, %v692_v32 }
 0x10d   : > { %v1100_v49 = vadd.f32 %v1099_v42, %v1098_v34 }
 0x10e   : > { %v695_v48 = vadd.f32 %v1060_v41, %v942_v25  ;;  %v1131_v50 = vpop.f32.mrf.mxu0 }
 0x10f   : > { %v806_v53 = vadd.f32 %v1131_v50, %v741_v46  ;;  %v1135_v54 = vpop.f32.mrf.mxu1 }
 0x110   : > { %v822_v57 = vadd.f32 %v1135_v54, %v757_v43  ;;  %v797_v58 = vpop.f32.mrf.mxu0  ;;  %v760_v60 = vadd.f32 %v1100_v49, %v695_v48 }
 0x111   : > { %v830_v0 = vmax.f32 %v806_v53, 0.0  ;;  %v798_v61 = vadd.f32 %v797_v58, %v733_v55  ;;  %v813_v63 = vpop.f32.mrf.mxu1 }
 0x112   : > { %v834_v5 = vmax.f32 %v822_v57, 0.0  ;;  %v814_v6 = vadd.f32 %v813_v63, %v749_v59  ;;  %v1132_v7 = vpop.f32.mrf.mxu0 }
 0x113   : > { %v1015_v8 = vpack.c.bf16 %v830_v0, %v830_v0  ;;  %v828_v9 = vmax.f32 %v798_v61, 0.0  ;;  %v809_v10 = vadd.f32 %v1132_v7, %v744_v2  ;;  %v1136_v1 = vpop.f32.mrf.mxu1 }
 0x114   : > { %v1019_v11 = vpack.c.bf16 %v834_v5, %v834_v5  ;;  %v832_v12 = vmax.f32 %v814_v6, 0.0  ;;  %v825_v13 = vadd.f32 %v1136_v1, %v760_v60  ;;  %v800_v14 = vpop.f32.mrf.mxu0 }
 0x115   : > { %871 = vst.msk [vmem:[%s1423_s28 + $0x8] sm:$0xf] %vm868_vm0, %v1015_v8  ;;  %v1013_v16 = vpack.c.bf16 %v828_v9, %v828_v9  ;;  %v831_v17 = vmax.f32 %v809_v10, 0.0  ;;  %v801_v18 = vadd.f32 %v800_v14, %v736_v3  ;;  %v816_v19 = vpop.f32.mrf.mxu1 }
 0x116   : > { %875 = vst.msk [vmem:[%s1423_s28 + $0x18] sm:$0xf] %vm868_vm0, %v1019_v11  ;;  %v1017_v20 = vpack.c.bf16 %v832_v12, %v832_v12  ;;  %v835_v21 = vmax.f32 %v825_v13, 0.0  ;;  %v817_v22 = vadd.f32 %v816_v19, %v752_v15 }
 0x117   : > { %869 = vst.msk [vmem:[%s1423_s28] sm:$0xf] %vm868_vm0, %v1013_v16  ;;  %v1016_v23 = vpack.c.bf16 %v831_v17, %v831_v17  ;;  %v829_v24 = vmax.f32 %v801_v18, 0.0 }
 0x118   : > { %873 = vst.msk [vmem:[%s1423_s28 + $0x10] sm:$0xf] %vm868_vm0, %v1017_v20  ;;  %v1020_v25 = vpack.c.bf16 %v835_v21, %v835_v21  ;;  %v833_v26 = vmax.f32 %v817_v22, 0.0 }
 0x119   : > { %872 = vst.msk [vmem:[%s1423_s28 + $0xc] sm:$0xf] %vm868_vm0, %v1016_v23  ;;  %v1014_v27 = vpack.c.bf16 %v829_v24, %v829_v24 }
 0x11a   : > { %876 = vst.msk [vmem:[%s1423_s28 + $0x1c] sm:$0xf] %vm868_vm0, %v1020_v25  ;;  %v1018_v28 = vpack.c.bf16 %v833_v26, %v833_v26 }
 0x11b   : > { %870 = vst.msk [vmem:[%s1423_s28 + $0x4] sm:$0xf] %vm868_vm0, %v1014_v27 }
 0x11c   : > { %874 = vst.msk [vmem:[%s1423_s28 + $0x14] sm:$0xf] %vm868_vm0, %v1018_v28 }
 0x11d PF: > { %s13_s12 = sadd.s32 1, %s1236_s12  }
 0x11e   : > { %p10_p4 = scmp.ge.s32.totalorder %s13_s12, 4  }
 0x120   :  { %12 = sbr.rel (!%p10_p4) target bundleno = 1 (0x1), region = 62 }

// kernel: state_to_q_values.7
= control target key start
LH: loop header
LB: loop body
LE: loop exit
PB: predicated region body
PF: predicated region fallthrough
CT: control target
= control target key end

     0   :  { %vm6470_vm0 = vcmask 146432   ;;  %s11512_s1 = inlined_call_operand.vmem [shape: bf16[3200,512], index: 1, kind: input, shape index: {}]   ;;  %s11513_s0 = inlined_call_operand.vmem [shape: bf16[16,3200], index: 0, kind: input, shape index: {}]   ;;  %s11514_s3 = inlined_call_operand.vmem [shape: bf16[512,128], index: 3, kind: input, shape index: {}]   ;;  %s11515_s2 = inlined_call_operand.vmem [shape: f32[1,512], index: 2, kind: input, shape index: {}]   ;;  %s11516_s4 = inlined_call_operand.vmem [shape: f32[1,128], index: 4, kind: input, shape index: {}]   ;;  %s11517_s5 = inlined_call_operand.vmem [shape: f32[16,18], index: 5, kind: output, shape index: {}]  }
   0x1   :  { %v7380_v0 = vld [vmem:[%s11512_s1 + $0xe4] ss:$16 sps:$4 sm:$0xff]   ;;  %v7384_v2 = vld [vmem:[%s11512_s1 + $0xe0] ss:$16 sps:$4 sm:$0xff]  }
   0x2   :  { %v7382_v1 = vld [vmem:[%s11512_s1 + $0x2e4] ss:$16 sps:$4 sm:$0xff]   ;;  %4995 = vmatprep.subr.bf16.mxu0 %v7380_v0  ;;  %v7385_v3 = vld [vmem:[%s11512_s1 + $0x2e0] ss:$16 sps:$4 sm:$0xff]  }
   0x3   :  { %5038 = vmatprep.subr.bf16.mxu1 %v7382_v1  ;;  %v7386_v4 = vld [vmem:[%s11512_s1 + $0xc4] ss:$16 sps:$4 sm:$0xff]   ;;  %4996 = vmatpush1.bf16.msra.mxu0 %v7384_v2  ;;  %v7390_v6 = vld [vmem:[%s11512_s1 + $0xc0] ss:$16 sps:$4 sm:$0xff]  }
   0x4   :  { %5039 = vmatpush1.bf16.msra.mxu1 %v7385_v3  ;;  %v7388_v5 = vld [vmem:[%s11512_s1 + $0x2c4] ss:$16 sps:$4 sm:$0xff]   ;;  %4997 = vmatprep.subr.bf16.mxu0 %v7386_v4  ;;  %v7391_v7 = vld [vmem:[%s11512_s1 + $0x2c0] ss:$16 sps:$4 sm:$0xff]  }
   0x5   :  { %5040 = vmatprep.subr.bf16.mxu1 %v7388_v5  ;;  %v7392_v8 = vld [vmem:[%s11512_s1 + $0xa4] ss:$16 sps:$4 sm:$0xff]   ;;  %v7396_v10 = vld [vmem:[%s11512_s1 + $0xa0] ss:$16 sps:$4 sm:$0xff]   ;;  %v7479_v5 = vld [vmem:[%s11513_s0 + $0x8] ss:$100 sps:$4 sm:$0xff]  }
   0x6   :  { %v7394_v9 = vld [vmem:[%s11512_s1 + $0x2a4] ss:$16 sps:$4 sm:$0xff]   ;;  %v7397_v11 = vld [vmem:[%s11512_s1 + $0x2a0] ss:$16 sps:$4 sm:$0xff]  }
   0x7   :  { %4998 = vmatpush1.bf16.msra.mxu0 %v7390_v6  ;;  %v7398_v12 = vld [vmem:[%s11512_s1 + $0x84] ss:$16 sps:$4 sm:$0xff]   ;;  %v7402_v14 = vld [vmem:[%s11512_s1 + $0x80] ss:$16 sps:$4 sm:$0xff]  }
   0x8   :  { %5041 = vmatpush1.bf16.msra.mxu1 %v7391_v7  ;;  %4999 = vmatprep.subr.bf16.mxu0 %v7392_v8  ;;  %v7400_v13 = vld [vmem:[%s11512_s1 + $0x284] ss:$16 sps:$4 sm:$0xff]   ;;  %v7403_v15 = vld [vmem:[%s11512_s1 + $0x280] ss:$16 sps:$4 sm:$0xff]  }
   0x9   :  { %5042 = vmatprep.subr.bf16.mxu1 %v7394_v9  ;;  %v7404_v16 = vld [vmem:[%s11512_s1 + $0x64] ss:$16 sps:$4 sm:$0xff]   ;;  %v7408_v18 = vld [vmem:[%s11512_s1 + $0x60] ss:$16 sps:$4 sm:$0xff]  }
   0xa   :  { %v7406_v17 = vld [vmem:[%s11512_s1 + $0x264] ss:$16 sps:$4 sm:$0xff]   ;;  %v7409_v19 = vld [vmem:[%s11512_s1 + $0x260] ss:$16 sps:$4 sm:$0xff]  }
   0xb   :  { %5000 = vmatpush1.bf16.msra.mxu0 %v7396_v10  ;;  %v7410_v20 = vld [vmem:[%s11512_s1 + $0x44] ss:$16 sps:$4 sm:$0xff]   ;;  %v7414_v22 = vld [vmem:[%s11512_s1 + $0x40] ss:$16 sps:$4 sm:$0xff]  }
   0xc   :  { %5043 = vmatpush1.bf16.msra.mxu1 %v7397_v11  ;;  %5001 = vmatprep.subr.bf16.mxu0 %v7398_v12  ;;  %v7412_v21 = vld [vmem:[%s11512_s1 + $0x244] ss:$16 sps:$4 sm:$0xff]   ;;  %v7415_v23 = vld [vmem:[%s11512_s1 + $0x240] ss:$16 sps:$4 sm:$0xff]  }
   0xd   :  { %5044 = vmatprep.subr.bf16.mxu1 %v7400_v13  ;;  %v7416_v24 = vld [vmem:[%s11512_s1 + $0x24] ss:$16 sps:$4 sm:$0xff]   ;;  %v7420_v26 = vld [vmem:[%s11512_s1 + $0x20] ss:$16 sps:$4 sm:$0xff]  }
   0xe   :  { %v7418_v25 = vld [vmem:[%s11512_s1 + $0x224] ss:$16 sps:$4 sm:$0xff]   ;;  %v7421_v27 = vld [vmem:[%s11512_s1 + $0x220] ss:$16 sps:$4 sm:$0xff]  }
   0xf   :  { %5002 = vmatpush1.bf16.msra.mxu0 %v7402_v14  ;;  %v7422_v28 = vld [vmem:[%s11512_s1 + $0x4] ss:$16 sps:$4 sm:$0xff]   ;;  %v7426_v30 = vld [vmem:[%s11512_s1] ss:$16 sps:$4 sm:$0xff]  }
  0x10   :  { %5045 = vmatpush1.bf16.msra.mxu1 %v7403_v15  ;;  %5003 = vmatprep.subr.bf16.mxu0 %v7404_v16  ;;  %v7424_v29 = vld [vmem:[%s11512_s1 + $0x204] ss:$16 sps:$4 sm:$0xff]   ;;  %v7427_v31 = vld [vmem:[%s11512_s1 + $0x200] ss:$16 sps:$4 sm:$0xff]  }
  0x11   :  { %5046 = vmatprep.subr.bf16.mxu1 %v7406_v17  ;;  %v7428_v32 = vld [vmem:[%s11512_s1 + $0x1e4] ss:$16 sps:$4 sm:$0xff]   ;;  %v7432_v34 = vld [vmem:[%s11512_s1 + $0x1e0] ss:$16 sps:$4 sm:$0xff]  }
  0x12   :  { %v7430_v33 = vld [vmem:[%s11512_s1 + $0x3e4] ss:$16 sps:$4 sm:$0xff]   ;;  %v7433_v35 = vld [vmem:[%s11512_s1 + $0x3e0] ss:$16 sps:$4 sm:$0xff]  }
  0x13   :  { %5004 = vmatpush1.bf16.msra.mxu0 %v7408_v18  ;;  %v7434_v36 = vld [vmem:[%s11512_s1 + $0x1c4] ss:$16 sps:$4 sm:$0xff]   ;;  %v7438_v38 = vld [vmem:[%s11512_s1 + $0x1c0] ss:$16 sps:$4 sm:$0xff]  }
  0x14   :  { %5047 = vmatpush1.bf16.msra.mxu1 %v7409_v19  ;;  %5005 = vmatprep.subr.bf16.mxu0 %v7410_v20  ;;  %v7436_v37 = vld [vmem:[%s11512_s1 + $0x3c4] ss:$16 sps:$4 sm:$0xff]   ;;  %v7439_v39 = vld [vmem:[%s11512_s1 + $0x3c0] ss:$16 sps:$4 sm:$0xff]  }
  0x15   :  { %5048 = vmatprep.subr.bf16.mxu1 %v7412_v21  ;;  %v7440_v40 = vld [vmem:[%s11512_s1 + $0x1a4] ss:$16 sps:$4 sm:$0xff]   ;;  %v7444_v42 = vld [vmem:[%s11512_s1 + $0x1a0] ss:$16 sps:$4 sm:$0xff]  }
  0x16   :  { %v7442_v41 = vld [vmem:[%s11512_s1 + $0x3a4] ss:$16 sps:$4 sm:$0xff]   ;;  %v7445_v43 = vld [vmem:[%s11512_s1 + $0x3a0] ss:$16 sps:$4 sm:$0xff]  }
  0x17   :  { %5006 = vmatpush1.bf16.msra.mxu0 %v7414_v22  ;;  %v7446_v44 = vld [vmem:[%s11512_s1 + $0x184] ss:$16 sps:$4 sm:$0xff]   ;;  %v7450_v46 = vld [vmem:[%s11512_s1 + $0x180] ss:$16 sps:$4 sm:$0xff]  }
  0x18   :  { %5049 = vmatpush1.bf16.msra.mxu1 %v7415_v23  ;;  %5007 = vmatprep.subr.bf16.mxu0 %v7416_v24  ;;  %v7448_v45 = vld [vmem:[%s11512_s1 + $0x384] ss:$16 sps:$4 sm:$0xff]   ;;  %v7451_v47 = vld [vmem:[%s11512_s1 + $0x380] ss:$16 sps:$4 sm:$0xff]  }
  0x19   :  { %5050 = vmatprep.subr.bf16.mxu1 %v7418_v25  ;;  %v7452_v48 = vld [vmem:[%s11512_s1 + $0x164] ss:$16 sps:$4 sm:$0xff]   ;;  %v7481_v51 = vld [vmem:[%s11513_s0 + $0xc] ss:$100 sps:$4 sm:$0xff]  }
  0x1a   :  { %v7478_v49 = vld [vmem:[%s11513_s0 + $0x4] ss:$100 sps:$4 sm:$0xff]   ;;  %v7456_v52 = vld [vmem:[%s11512_s1 + $0x160] ss:$16 sps:$4 sm:$0xff]   ;;  %5070 = vmatprep.mubr.bf16.mxu1 %v7481_v51 }
  0x1b   :  { %5008 = vmatpush1.bf16.msra.mxu0 %v7420_v26  ;;  %v7454_v50 = vld [vmem:[%s11512_s1 + $0x364] ss:$16 sps:$4 sm:$0xff]   ;;  %5027 = vmatprep.mubr.bf16.mxu0 %v7478_v49  ;;  %v7457_v53 = vld [vmem:[%s11512_s1 + $0x360] ss:$16 sps:$4 sm:$0xff]  }
  0x1c   :  { %5051 = vmatpush1.bf16.msra.mxu1 %v7421_v27  ;;  %5009 = vmatprep.subr.bf16.mxu0 %v7422_v28  ;;  %v7458_v54 = vld [vmem:[%s11512_s1 + $0x144] ss:$16 sps:$4 sm:$0xff]   ;;  %v7462_v56 = vld [vmem:[%s11512_s1 + $0x140] ss:$16 sps:$4 sm:$0xff]  }
  0x1d   :  { %5052 = vmatprep.subr.bf16.mxu1 %v7424_v29  ;;  %v7460_v55 = vld [vmem:[%s11512_s1 + $0x344] ss:$16 sps:$4 sm:$0xff]   ;;  %v7463_v57 = vld [vmem:[%s11512_s1 + $0x340] ss:$16 sps:$4 sm:$0xff]  }
  0x1e   :  { %v7464_v58 = vld [vmem:[%s11512_s1 + $0x124] ss:$16 sps:$4 sm:$0xff]   ;;  %v7468_v60 = vld [vmem:[%s11512_s1 + $0x120] ss:$16 sps:$4 sm:$0xff]  }
  0x1f   :  { %5010 = vmatpush1.bf16.msra.mxu0 %v7426_v30  ;;  %v7466_v59 = vld [vmem:[%s11512_s1 + $0x324] ss:$16 sps:$4 sm:$0xff]   ;;  %v7469_v61 = vld [vmem:[%s11512_s1 + $0x320] ss:$16 sps:$4 sm:$0xff]  }
  0x20   :  { %5053 = vmatpush1.bf16.msra.mxu1 %v7427_v31  ;;  %5011 = vmatprep.subr.bf16.mxu0 %v7428_v32  ;;  %v7470_v62 = vld [vmem:[%s11512_s1 + $0x104] ss:$16 sps:$4 sm:$0xff]   ;;  %v7474_v0 = vld [vmem:[%s11512_s1 + $0x100] ss:$16 sps:$4 sm:$0xff]  }
  0x21   :  { %5054 = vmatprep.subr.bf16.mxu1 %v7430_v33  ;;  %v7472_v63 = vld [vmem:[%s11512_s1 + $0x304] ss:$16 sps:$4 sm:$0xff]   ;;  %v7475_v1 = vld [vmem:[%s11512_s1 + $0x300] ss:$16 sps:$4 sm:$0xff]  }
  0x22   :  { %v7484_v2 = vld [vmem:[%s11512_s1 + $0x4e4] ss:$16 sps:$4 sm:$0xff]   ;;  %v7482_v6 = vld [vmem:[%s11512_s1 + $0x4e0] ss:$16 sps:$4 sm:$0xff]  }
  0x23   :  { %5012 = vmatpush2.bf16.msra.mxu0 %v7432_v34  ;;  %v7487_v3 = vld [vmem:[%s11512_s1 + $0x6e4] ss:$16 sps:$4 sm:$0xff]   ;;  %v7485_v7 = vld [vmem:[%s11512_s1 + $0x6e0] ss:$16 sps:$4 sm:$0xff]  }
  0x24   :  { %5055 = vmatpush2.bf16.msra.mxu1 %v7433_v35  ;;  %5013 = vmatprep.subr.bf16.mxu0 %v7434_v36  ;;  %v7476_v4 = vld [vmem:[%s11513_s0] ss:$100 sps:$4 sm:$0xff]   ;;  %v7580_v34 = vld [vmem:[%s11513_s0 + $0x14] ss:$100 sps:$4 sm:$0xff]  }
  0x25   :  { %5056 = vmatprep.subr.bf16.mxu1 %v7436_v37  ;;  %v7490_v8 = vld [vmem:[%s11512_s1 + $0x4c4] ss:$16 sps:$4 sm:$0xff]   ;;  %v7488_v10 = vld [vmem:[%s11512_s1 + $0x4c0] ss:$16 sps:$4 sm:$0xff]  }
  0x26   :  { %v7493_v9 = vld [vmem:[%s11512_s1 + $0x6c4] ss:$16 sps:$4 sm:$0xff]   ;;  %v7491_v11 = vld [vmem:[%s11512_s1 + $0x6c0] ss:$16 sps:$4 sm:$0xff]  }
  0x27   :  { %5014 = vmatpush2.bf16.msra.mxu0 %v7438_v38  ;;  %v7496_v12 = vld [vmem:[%s11512_s1 + $0x4a4] ss:$16 sps:$4 sm:$0xff]   ;;  %v7494_v14 = vld [vmem:[%s11512_s1 + $0x4a0] ss:$16 sps:$4 sm:$0xff]  }
  0x28   :  { %5057 = vmatpush2.bf16.msra.mxu1 %v7439_v39  ;;  %5015 = vmatprep.subr.bf16.mxu0 %v7440_v40  ;;  %v7499_v13 = vld [vmem:[%s11512_s1 + $0x6a4] ss:$16 sps:$4 sm:$0xff]   ;;  %v7497_v15 = vld [vmem:[%s11512_s1 + $0x6a0] ss:$16 sps:$4 sm:$0xff]  }
  0x29   :  { %5058 = vmatprep.subr.bf16.mxu1 %v7442_v41  ;;  %v7502_v16 = vld [vmem:[%s11512_s1 + $0x484] ss:$16 sps:$4 sm:$0xff]   ;;  %v7500_v18 = vld [vmem:[%s11512_s1 + $0x480] ss:$16 sps:$4 sm:$0xff]  }
  0x2a   :  { %v7505_v17 = vld [vmem:[%s11512_s1 + $0x684] ss:$16 sps:$4 sm:$0xff]   ;;  %v7503_v19 = vld [vmem:[%s11512_s1 + $0x680] ss:$16 sps:$4 sm:$0xff]  }
  0x2b   :  { %5016 = vmatpush2.bf16.msra.mxu0 %v7444_v42  ;;  %v7508_v20 = vld [vmem:[%s11512_s1 + $0x464] ss:$16 sps:$4 sm:$0xff]   ;;  %v7506_v22 = vld [vmem:[%s11512_s1 + $0x460] ss:$16 sps:$4 sm:$0xff]  }
  0x2c   :  { %5059 = vmatpush2.bf16.msra.mxu1 %v7445_v43  ;;  %5017 = vmatprep.subr.bf16.mxu0 %v7446_v44  ;;  %v7511_v21 = vld [vmem:[%s11512_s1 + $0x664] ss:$16 sps:$4 sm:$0xff]   ;;  %v7509_v23 = vld [vmem:[%s11512_s1 + $0x660] ss:$16 sps:$4 sm:$0xff]  }
  0x2d   :  { %5060 = vmatprep.subr.bf16.mxu1 %v7448_v45  ;;  %v7514_v24 = vld [vmem:[%s11512_s1 + $0x444] ss:$16 sps:$4 sm:$0xff]   ;;  %v7512_v26 = vld [vmem:[%s11512_s1 + $0x440] ss:$16 sps:$4 sm:$0xff]  }
  0x2e   :  { %v7517_v25 = vld [vmem:[%s11512_s1 + $0x644] ss:$16 sps:$4 sm:$0xff]   ;;  %v7515_v27 = vld [vmem:[%s11512_s1 + $0x640] ss:$16 sps:$4 sm:$0xff]  }
  0x2f   :  { %5018 = vmatpush2.bf16.msra.mxu0 %v7450_v46  ;;  %v7520_v28 = vld [vmem:[%s11512_s1 + $0x424] ss:$16 sps:$4 sm:$0xff]   ;;  %v7518_v30 = vld [vmem:[%s11512_s1 + $0x420] ss:$16 sps:$4 sm:$0xff]  }
  0x30   :  { %5061 = vmatpush2.bf16.msra.mxu1 %v7451_v47  ;;  %5019 = vmatprep.subr.bf16.mxu0 %v7452_v48  ;;  %v7523_v29 = vld [vmem:[%s11512_s1 + $0x624] ss:$16 sps:$4 sm:$0xff]   ;;  %v7521_v31 = vld [vmem:[%s11512_s1 + $0x620] ss:$16 sps:$4 sm:$0xff]  }
  0x31   :  { %5062 = vmatprep.subr.bf16.mxu1 %v7454_v50  ;;  %v7526_v32 = vld [vmem:[%s11512_s1 + $0x404] ss:$16 sps:$4 sm:$0xff]   ;;  %v7583_v35 = vld [vmem:[%s11513_s0 + $0x1c] ss:$100 sps:$4 sm:$0xff]  }
  0x32   :  { %v7529_v33 = vld [vmem:[%s11512_s1 + $0x604] ss:$16 sps:$4 sm:$0xff]   ;;  %v7524_v36 = vld [vmem:[%s11512_s1 + $0x400] ss:$16 sps:$4 sm:$0xff]  }
  0x33   :  { %5020 = vmatpush2.bf16.msra.mxu0 %v7456_v52  ;;  %v7527_v37 = vld [vmem:[%s11512_s1 + $0x600] ss:$16 sps:$4 sm:$0xff]   ;;  %v7532_v38 = vld [vmem:[%s11512_s1 + $0x5e4] ss:$16 sps:$4 sm:$0xff]  }
  0x34   :  { %5063 = vmatpush2.bf16.msra.mxu1 %v7457_v53  ;;  %5021 = vmatprep.subr.bf16.mxu0 %v7458_v54  ;;  %v7535_v39 = vld [vmem:[%s11512_s1 + $0x7e4] ss:$16 sps:$4 sm:$0xff]   ;;  %v7530_v40 = vld [vmem:[%s11512_s1 + $0x5e0] ss:$16 sps:$4 sm:$0xff]  }
  0x35   :  { %5064 = vmatprep.subr.bf16.mxu1 %v7460_v55  ;;  %v7533_v41 = vld [vmem:[%s11512_s1 + $0x7e0] ss:$16 sps:$4 sm:$0xff]   ;;  %v7538_v42 = vld [vmem:[%s11512_s1 + $0x5c4] ss:$16 sps:$4 sm:$0xff]  }
  0x36   :  { %v7541_v43 = vld [vmem:[%s11512_s1 + $0x7c4] ss:$16 sps:$4 sm:$0xff]   ;;  %v7536_v44 = vld [vmem:[%s11512_s1 + $0x5c0] ss:$16 sps:$4 sm:$0xff]  }
  0x37   :  { %5022 = vmatpush2.bf16.msra.mxu0 %v7462_v56  ;;  %v7539_v45 = vld [vmem:[%s11512_s1 + $0x7c0] ss:$16 sps:$4 sm:$0xff]   ;;  %v7544_v46 = vld [vmem:[%s11512_s1 + $0x5a4] ss:$16 sps:$4 sm:$0xff]  }
  0x38   :  { %5065 = vmatpush2.bf16.msra.mxu1 %v7463_v57  ;;  %5023 = vmatprep.subr.bf16.mxu0 %v7464_v58  ;;  %v7547_v47 = vld [vmem:[%s11512_s1 + $0x7a4] ss:$16 sps:$4 sm:$0xff]   ;;  %v7542_v48 = vld [vmem:[%s11512_s1 + $0x5a0] ss:$16 sps:$4 sm:$0xff]  }
  0x39   :  { %5066 = vmatprep.subr.bf16.mxu1 %v7466_v59  ;;  %v7545_v49 = vld [vmem:[%s11512_s1 + $0x7a0] ss:$16 sps:$4 sm:$0xff]   ;;  %v7550_v50 = vld [vmem:[%s11512_s1 + $0x584] ss:$16 sps:$4 sm:$0xff]  }
  0x3a   :  { %v7553_v51 = vld [vmem:[%s11512_s1 + $0x784] ss:$16 sps:$4 sm:$0xff]   ;;  %v7548_v52 = vld [vmem:[%s11512_s1 + $0x580] ss:$16 sps:$4 sm:$0xff]  }
  0x3b   :  { %5024 = vmatpush2.bf16.msra.mxu0 %v7468_v60  ;;  %v7551_v53 = vld [vmem:[%s11512_s1 + $0x780] ss:$16 sps:$4 sm:$0xff]   ;;  %v7556_v54 = vld [vmem:[%s11512_s1 + $0x564] ss:$16 sps:$4 sm:$0xff]  }
  0x3c   :  { %5067 = vmatpush2.bf16.msra.mxu1 %v7469_v61  ;;  %5025 = vmatprep.subr.bf16.mxu0 %v7470_v62  ;;  %v7559_v55 = vld [vmem:[%s11512_s1 + $0x764] ss:$16 sps:$4 sm:$0xff]   ;;  %v7554_v56 = vld [vmem:[%s11512_s1 + $0x560] ss:$16 sps:$4 sm:$0xff]  }
  0x3d   :  { %5068 = vmatprep.subr.bf16.mxu1 %v7472_v63  ;;  %v7557_v57 = vld [vmem:[%s11512_s1 + $0x760] ss:$16 sps:$4 sm:$0xff]   ;;  %v7562_v58 = vld [vmem:[%s11512_s1 + $0x544] ss:$16 sps:$4 sm:$0xff]  }
  0x3e   :  { %v7565_v59 = vld [vmem:[%s11512_s1 + $0x744] ss:$16 sps:$4 sm:$0xff]   ;;  %v7560_v60 = vld [vmem:[%s11512_s1 + $0x540] ss:$16 sps:$4 sm:$0xff]  }
  0x3f   :  { %5026 = vmatpush2.bf16.msra.mxu0 %v7474_v0  ;;  %v7563_v61 = vld [vmem:[%s11512_s1 + $0x740] ss:$16 sps:$4 sm:$0xff]   ;;  %v7568_v62 = vld [vmem:[%s11512_s1 + $0x524] ss:$16 sps:$4 sm:$0xff]  }
  0x40   :  { %5069 = vmatpush2.bf16.msra.mxu1 %v7475_v1  ;;  %5081 = vmatprep.subr.bf16.mxu0 %v7484_v2  ;;  %v7571_v63 = vld [vmem:[%s11512_s1 + $0x724] ss:$16 sps:$4 sm:$0xff]   ;;  %v7566_v0 = vld [vmem:[%s11512_s1 + $0x520] ss:$16 sps:$4 sm:$0xff]  }
  0x41   :  { %5124 = vmatprep.subr.bf16.mxu1 %v7487_v3  ;;  %v7569_v1 = vld [vmem:[%s11512_s1 + $0x720] ss:$16 sps:$4 sm:$0xff]   ;;  %v7574_v2 = vld [vmem:[%s11512_s1 + $0x504] ss:$16 sps:$4 sm:$0xff]  }
  0x42   :  { %5028 = vmatmul.mubr.bf16.vlgmr.msra.gmra.mxu0 %v7476_v4  ;;  %v7577_v3 = vld [vmem:[%s11512_s1 + $0x704] ss:$16 sps:$4 sm:$0xff]   ;;  %v7572_v4 = vld [vmem:[%s11512_s1 + $0x500] ss:$16 sps:$4 sm:$0xff]  }
  0x43   :  { %5071 = vmatmul.mubr.bf16.vlgmr.msra.gmra.mxu1 %v7479_v5  ;;  %5082 = vmatpush1.bf16.msra.mxu0 %v7482_v6  ;;  %v7575_v5 = vld [vmem:[%s11512_s1 + $0x700] ss:$16 sps:$4 sm:$0xff]   ;;  %v7586_v6 = vld [vmem:[%s11512_s1 + $0x8e4] ss:$16 sps:$4 sm:$0xff]  }
  0x44   :  { %5125 = vmatpush1.bf16.msra.mxu1 %v7485_v7  ;;  %5083 = vmatprep.subr.bf16.mxu0 %v7490_v8  ;;  %v7589_v7 = vld [vmem:[%s11512_s1 + $0xae4] ss:$16 sps:$4 sm:$0xff]  }
  0x45   :  { %5126 = vmatprep.subr.bf16.mxu1 %v7493_v9  ;;  %5113 = vmatprep.mubr.bf16.mxu0 %v7580_v34  ;;  %v7578_v8 = vld [vmem:[%s11513_s0 + $0x10] ss:$100 sps:$4 sm:$0xff]   ;;  %v7581_v9 = vld [vmem:[%s11513_s0 + $0x18] ss:$100 sps:$4 sm:$0xff]  }
  0x46   :  { %5156 = vmatprep.mubr.bf16.mxu1 %v7583_v35  ;;  %v7622_v34 = vld [vmem:[%s11512_s1 + $0x824] ss:$16 sps:$4 sm:$0xff]  }
  0x47   :  { %5084 = vmatpush1.bf16.msra.mxu0 %v7488_v10  ;;  %v7584_v10 = vld [vmem:[%s11512_s1 + $0x8e0] ss:$16 sps:$4 sm:$0xff]   ;;  %v7625_v35 = vld [vmem:[%s11512_s1 + $0xa24] ss:$16 sps:$4 sm:$0xff]  }
  0x48   :  { %5127 = vmatpush1.bf16.msra.mxu1 %v7491_v11  ;;  %5085 = vmatprep.subr.bf16.mxu0 %v7496_v12  ;;  %v7587_v11 = vld [vmem:[%s11512_s1 + $0xae0] ss:$16 sps:$4 sm:$0xff]   ;;  %v7592_v12 = vld [vmem:[%s11512_s1 + $0x8c4] ss:$16 sps:$4 sm:$0xff]  }
  0x49   :  { %5128 = vmatprep.subr.bf16.mxu1 %v7499_v13  ;;  %v7595_v13 = vld [vmem:[%s11512_s1 + $0xac4] ss:$16 sps:$4 sm:$0xff]  }
  0x4b   :  { %5086 = vmatpush1.bf16.msra.mxu0 %v7494_v14  ;;  %v7590_v14 = vld [vmem:[%s11512_s1 + $0x8c0] ss:$16 sps:$4 sm:$0xff]  }
  0x4c   :  { %5129 = vmatpush1.bf16.msra.mxu1 %v7497_v15  ;;  %5087 = vmatprep.subr.bf16.mxu0 %v7502_v16  ;;  %v7593_v15 = vld [vmem:[%s11512_s1 + $0xac0] ss:$16 sps:$4 sm:$0xff]   ;;  %v7598_v16 = vld [vmem:[%s11512_s1 + $0x8a4] ss:$16 sps:$4 sm:$0xff]  }
  0x4d   :  { %5130 = vmatprep.subr.bf16.mxu1 %v7505_v17  ;;  %v7601_v17 = vld [vmem:[%s11512_s1 + $0xaa4] ss:$16 sps:$4 sm:$0xff]  }
  0x4f   :  { %5088 = vmatpush1.bf16.msra.mxu0 %v7500_v18  ;;  %v7596_v18 = vld [vmem:[%s11512_s1 + $0x8a0] ss:$16 sps:$4 sm:$0xff]  }
  0x50   :  { %5131 = vmatpush1.bf16.msra.mxu1 %v7503_v19  ;;  %5089 = vmatprep.subr.bf16.mxu0 %v7508_v20  ;;  %v7682_v19 = vld [vmem:[%s11513_s0 + $0x24] ss:$100 sps:$4 sm:$0xff]   ;;  %v7599_v20 = vld [vmem:[%s11512_s1 + $0xaa0] ss:$16 sps:$4 sm:$0xff]  }
  0x51   :  { %5132 = vmatprep.subr.bf16.mxu1 %v7511_v21  ;;  %v7685_v21 = vld [vmem:[%s11513_s0 + $0x2c] ss:$100 sps:$4 sm:$0xff]  }
  0x53   :  { %5090 = vmatpush1.bf16.msra.mxu0 %v7506_v22  ;;  %v7604_v22 = vld [vmem:[%s11512_s1 + $0x884] ss:$16 sps:$4 sm:$0xff]  }
  0x54   :  { %5133 = vmatpush1.bf16.msra.mxu1 %v7509_v23  ;;  %5091 = vmatprep.subr.bf16.mxu0 %v7514_v24  ;;  %v7607_v23 = vld [vmem:[%s11512_s1 + $0xa84] ss:$16 sps:$4 sm:$0xff]   ;;  %v7602_v24 = vld [vmem:[%s11512_s1 + $0x880] ss:$16 sps:$4 sm:$0xff]  }
  0x55   :  { %5134 = vmatprep.subr.bf16.mxu1 %v7517_v25  ;;  %v7605_v25 = vld [vmem:[%s11512_s1 + $0xa80] ss:$16 sps:$4 sm:$0xff]  }
  0x57   :  { %5092 = vmatpush1.bf16.msra.mxu0 %v7512_v26  ;;  %v7610_v26 = vld [vmem:[%s11512_s1 + $0x864] ss:$16 sps:$4 sm:$0xff]  }
  0x58   :  { %5135 = vmatpush1.bf16.msra.mxu1 %v7515_v27  ;;  %5093 = vmatprep.subr.bf16.mxu0 %v7520_v28  ;;  %v7613_v27 = vld [vmem:[%s11512_s1 + $0xa64] ss:$16 sps:$4 sm:$0xff]   ;;  %v7608_v28 = vld [vmem:[%s11512_s1 + $0x860] ss:$16 sps:$4 sm:$0xff]  }
  0x59   :  { %5136 = vmatprep.subr.bf16.mxu1 %v7523_v29  ;;  %v7611_v29 = vld [vmem:[%s11512_s1 + $0xa60] ss:$16 sps:$4 sm:$0xff]  }
  0x5b   :  { %5094 = vmatpush1.bf16.msra.mxu0 %v7518_v30  ;;  %v7616_v30 = vld [vmem:[%s11512_s1 + $0x844] ss:$16 sps:$4 sm:$0xff]  }
  0x5c   :  { %5137 = vmatpush1.bf16.msra.mxu1 %v7521_v31  ;;  %5095 = vmatprep.subr.bf16.mxu0 %v7526_v32  ;;  %v7619_v31 = vld [vmem:[%s11512_s1 + $0xa44] ss:$16 sps:$4 sm:$0xff]   ;;  %v7614_v32 = vld [vmem:[%s11512_s1 + $0x840] ss:$16 sps:$4 sm:$0xff]  }
  0x5d   :  { %5138 = vmatprep.subr.bf16.mxu1 %v7529_v33  ;;  %v7617_v33 = vld [vmem:[%s11512_s1 + $0xa40] ss:$16 sps:$4 sm:$0xff]  }
  0x5f   :  { %5096 = vmatpush1.bf16.msra.mxu0 %v7524_v36  ;;  %v7620_v36 = vld [vmem:[%s11512_s1 + $0x820] ss:$16 sps:$4 sm:$0xff]  }
  0x60   :  { %5139 = vmatpush1.bf16.msra.mxu1 %v7527_v37  ;;  %5097 = vmatprep.subr.bf16.mxu0 %v7532_v38  ;;  %v7623_v37 = vld [vmem:[%s11512_s1 + $0xa20] ss:$16 sps:$4 sm:$0xff]   ;;  %v7628_v38 = vld [vmem:[%s11512_s1 + $0x804] ss:$16 sps:$4 sm:$0xff]  }
  0x61   :  { %5140 = vmatprep.subr.bf16.mxu1 %v7535_v39  ;;  %v7631_v39 = vld [vmem:[%s11512_s1 + $0xa04] ss:$16 sps:$4 sm:$0xff]  }
  0x63   :  { %5098 = vmatpush2.bf16.msra.mxu0 %v7530_v40  ;;  %v7626_v40 = vld [vmem:[%s11512_s1 + $0x800] ss:$16 sps:$4 sm:$0xff]  }
  0x64   :  { %5141 = vmatpush2.bf16.msra.mxu1 %v7533_v41  ;;  %5099 = vmatprep.subr.bf16.mxu0 %v7538_v42  ;;  %v7629_v41 = vld [vmem:[%s11512_s1 + $0xa00] ss:$16 sps:$4 sm:$0xff]   ;;  %v7634_v42 = vld [vmem:[%s11512_s1 + $0x9e4] ss:$16 sps:$4 sm:$0xff]  }
  0x65   :  { %5142 = vmatprep.subr.bf16.mxu1 %v7541_v43  ;;  %v7637_v43 = vld [vmem:[%s11512_s1 + $0xbe4] ss:$16 sps:$4 sm:$0xff]  }
  0x67   :  { %5100 = vmatpush2.bf16.msra.mxu0 %v7536_v44  ;;  %v7632_v44 = vld [vmem:[%s11512_s1 + $0x9e0] ss:$16 sps:$4 sm:$0xff]  }
  0x68   :  { %5143 = vmatpush2.bf16.msra.mxu1 %v7539_v45  ;;  %5101 = vmatprep.subr.bf16.mxu0 %v7544_v46  ;;  %v7635_v45 = vld [vmem:[%s11512_s1 + $0xbe0] ss:$16 sps:$4 sm:$0xff]   ;;  %v7640_v46 = vld [vmem:[%s11512_s1 + $0x9c4] ss:$16 sps:$4 sm:$0xff]  }
  0x69   :  { %5144 = vmatprep.subr.bf16.mxu1 %v7547_v47  ;;  %v7643_v47 = vld [vmem:[%s11512_s1 + $0xbc4] ss:$16 sps:$4 sm:$0xff]  }
  0x6b   :  { %5102 = vmatpush2.bf16.msra.mxu0 %v7542_v48  ;;  %v7638_v48 = vld [vmem:[%s11512_s1 + $0x9c0] ss:$16 sps:$4 sm:$0xff]  }
  0x6c   :  { %5145 = vmatpush2.bf16.msra.mxu1 %v7545_v49  ;;  %5103 = vmatprep.subr.bf16.mxu0 %v7550_v50  ;;  %v7641_v49 = vld [vmem:[%s11512_s1 + $0xbc0] ss:$16 sps:$4 sm:$0xff]   ;;  %v7646_v50 = vld [vmem:[%s11512_s1 + $0x9a4] ss:$16 sps:$4 sm:$0xff]  }
  0x6d   :  { %5146 = vmatprep.subr.bf16.mxu1 %v7553_v51  ;;  %v7649_v51 = vld [vmem:[%s11512_s1 + $0xba4] ss:$16 sps:$4 sm:$0xff]  }
  0x6f   :  { %5104 = vmatpush2.bf16.msra.mxu0 %v7548_v52  ;;  %v7644_v52 = vld [vmem:[%s11512_s1 + $0x9a0] ss:$16 sps:$4 sm:$0xff]  }
  0x70   :  { %5147 = vmatpush2.bf16.msra.mxu1 %v7551_v53  ;;  %5105 = vmatprep.subr.bf16.mxu0 %v7556_v54  ;;  %v7647_v53 = vld [vmem:[%s11512_s1 + $0xba0] ss:$16 sps:$4 sm:$0xff]   ;;  %v7652_v54 = vld [vmem:[%s11512_s1 + $0x984] ss:$16 sps:$4 sm:$0xff]  }
  0x71   :  { %5148 = vmatprep.subr.bf16.mxu1 %v7559_v55  ;;  %v7655_v55 = vld [vmem:[%s11512_s1 + $0xb84] ss:$16 sps:$4 sm:$0xff]  }
  0x73   :  { %5106 = vmatpush2.bf16.msra.mxu0 %v7554_v56  ;;  %v7650_v56 = vld [vmem:[%s11512_s1 + $0x980] ss:$16 sps:$4 sm:$0xff]  }
  0x74   :  { %5149 = vmatpush2.bf16.msra.mxu1 %v7557_v57  ;;  %5107 = vmatprep.subr.bf16.mxu0 %v7562_v58  ;;  %v7653_v57 = vld [vmem:[%s11512_s1 + $0xb80] ss:$16 sps:$4 sm:$0xff]   ;;  %v7658_v58 = vld [vmem:[%s11512_s1 + $0x964] ss:$16 sps:$4 sm:$0xff]  }
  0x75   :  { %5150 = vmatprep.subr.bf16.mxu1 %v7565_v59  ;;  %v7661_v59 = vld [vmem:[%s11512_s1 + $0xb64] ss:$16 sps:$4 sm:$0xff]  }
  0x77   :  { %5108 = vmatpush2.bf16.msra.mxu0 %v7560_v60  ;;  %v7656_v60 = vld [vmem:[%s11512_s1 + $0x960] ss:$16 sps:$4 sm:$0xff]  }
  0x78   :  { %5151 = vmatpush2.bf16.msra.mxu1 %v7563_v61  ;;  %5109 = vmatprep.subr.bf16.mxu0 %v7568_v62  ;;  %v7659_v61 = vld [vmem:[%s11512_s1 + $0xb60] ss:$16 sps:$4 sm:$0xff]   ;;  %v7664_v62 = vld [vmem:[%s11512_s1 + $0x944] ss:$16 sps:$4 sm:$0xff]  }
  0x79   :  { %5152 = vmatprep.subr.bf16.mxu1 %v7571_v63  ;;  %v7667_v63 = vld [vmem:[%s11512_s1 + $0xb44] ss:$16 sps:$4 sm:$0xff]  }
  0x7b   :  { %5110 = vmatpush2.bf16.msra.mxu0 %v7566_v0  ;;  %v7662_v0 = vld [vmem:[%s11512_s1 + $0x940] ss:$16 sps:$4 sm:$0xff]  }
  0x7c   :  { %5153 = vmatpush2.bf16.msra.mxu1 %v7569_v1  ;;  %5111 = vmatprep.subr.bf16.mxu0 %v7574_v2  ;;  %v7665_v1 = vld [vmem:[%s11512_s1 + $0xb40] ss:$16 sps:$4 sm:$0xff]   ;;  %v7670_v2 = vld [vmem:[%s11512_s1 + $0x924] ss:$16 sps:$4 sm:$0xff]  }
  0x7d   :  { %5154 = vmatprep.subr.bf16.mxu1 %v7577_v3  ;;  %v7673_v3 = vld [vmem:[%s11512_s1 + $0xb24] ss:$16 sps:$4 sm:$0xff]  }
  0x7f   :  { %5112 = vmatpush2.bf16.msra.mxu0 %v7572_v4  ;;  %v7668_v4 = vld [vmem:[%s11512_s1 + $0x920] ss:$16 sps:$4 sm:$0xff]  }
  0x80   :  { %5155 = vmatpush2.bf16.msra.mxu1 %v7575_v5  ;;  %5167 = vmatprep.subr.bf16.mxu0 %v7586_v6  ;;  %v7671_v5 = vld [vmem:[%s11512_s1 + $0xb20] ss:$16 sps:$4 sm:$0xff]   ;;  %v7676_v6 = vld [vmem:[%s11512_s1 + $0x904] ss:$16 sps:$4 sm:$0xff]  }
  0x81   :  { %5210 = vmatprep.subr.bf16.mxu1 %v7589_v7  ;;  %v7679_v7 = vld [vmem:[%s11512_s1 + $0xb04] ss:$16 sps:$4 sm:$0xff]  }
  0x82   :  { %5114 = vmatmul.mubr.bf16.vlgmr.msra.gmra.mxu0 %v7578_v8  ;;  %v7674_v8 = vld [vmem:[%s11512_s1 + $0x900] ss:$16 sps:$4 sm:$0xff]  }
  0x83   :  { %5157 = vmatmul.mubr.bf16.vlgmr.msra.gmra.mxu1 %v7581_v9  ;;  %5168 = vmatpush1.bf16.msra.mxu0 %v7584_v10  ;;  %v7677_v9 = vld [vmem:[%s11512_s1 + $0xb00] ss:$16 sps:$4 sm:$0xff]   ;;  %v7688_v10 = vld [vmem:[%s11512_s1 + $0xce4] ss:$16 sps:$4 sm:$0xff]  }
  0x84   :  { %5211 = vmatpush1.bf16.msra.mxu1 %v7587_v11  ;;  %5169 = vmatprep.subr.bf16.mxu0 %v7592_v12  ;;  %v7691_v11 = vld [vmem:[%s11512_s1 + $0xee4] ss:$16 sps:$4 sm:$0xff]  }
  0x85   :  { %5212 = vmatprep.subr.bf16.mxu1 %v7595_v13  ;;  %5199 = vmatprep.mubr.bf16.mxu0 %v7682_v19  ;;  %v7680_v12 = vld [vmem:[%s11513_s0 + $0x20] ss:$100 sps:$4 sm:$0xff]   ;;  %v7683_v13 = vld [vmem:[%s11513_s0 + $0x28] ss:$100 sps:$4 sm:$0xff]  }
  0x86   :  { %5242 = vmatprep.mubr.bf16.mxu1 %v7685_v21  ;;  %v7787_v19 = vld [vmem:[%s11513_s0 + $0x3c] ss:$100 sps:$4 sm:$0xff]  }
  0x87   :  { %5170 = vmatpush1.bf16.msra.mxu0 %v7590_v14  ;;  %v7686_v14 = vld [vmem:[%s11512_s1 + $0xce0] ss:$16 sps:$4 sm:$0xff]  }
  0x88   :  { %5213 = vmatpush1.bf16.msra.mxu1 %v7593_v15  ;;  %5171 = vmatprep.subr.bf16.mxu0 %v7598_v16  ;;  %v7689_v15 = vld [vmem:[%s11512_s1 + $0xee0] ss:$16 sps:$4 sm:$0xff]   ;;  %v7694_v16 = vld [vmem:[%s11512_s1 + $0xcc4] ss:$16 sps:$4 sm:$0xff]  }
  0x89   :  { %5214 = vmatprep.subr.bf16.mxu1 %v7601_v17  ;;  %v7697_v17 = vld [vmem:[%s11512_s1 + $0xec4] ss:$16 sps:$4 sm:$0xff]   ;;  %v7695_v21 = vld [vmem:[%s11512_s1 + $0xec0] ss:$16 sps:$4 sm:$0xff]  }
  0x8b   :  { %5172 = vmatpush1.bf16.msra.mxu0 %v7596_v18  ;;  %v7784_v18 = vld [vmem:[%s11513_s0 + $0x34] ss:$100 sps:$4 sm:$0xff]  }
  0x8c   :  { %5215 = vmatpush1.bf16.msra.mxu1 %v7599_v20  ;;  %5173 = vmatprep.subr.bf16.mxu0 %v7604_v22  ;;  %v7692_v20 = vld [vmem:[%s11512_s1 + $0xcc0] ss:$16 sps:$4 sm:$0xff]   ;;  %v7700_v22 = vld [vmem:[%s11512_s1 + $0xca4] ss:$16 sps:$4 sm:$0xff]  }
  0x8d   :  { %5216 = vmatprep.subr.bf16.mxu1 %v7607_v23  ;;  %v7703_v23 = vld [vmem:[%s11512_s1 + $0xea4] ss:$16 sps:$4 sm:$0xff]  }
  0x8f   :  { %5174 = vmatpush1.bf16.msra.mxu0 %v7602_v24  ;;  %v7698_v24 = vld [vmem:[%s11512_s1 + $0xca0] ss:$16 sps:$4 sm:$0xff]  }
  0x90   :  { %5217 = vmatpush1.bf16.msra.mxu1 %v7605_v25  ;;  %5175 = vmatprep.subr.bf16.mxu0 %v7610_v26  ;;  %v7701_v25 = vld [vmem:[%s11512_s1 + $0xea0] ss:$16 sps:$4 sm:$0xff]   ;;  %v7706_v26 = vld [vmem:[%s11512_s1 + $0xc84] ss:$16 sps:$4 sm:$0xff]  }
  0x91   :  { %5218 = vmatprep.subr.bf16.mxu1 %v7613_v27  ;;  %v7709_v27 = vld [vmem:[%s11512_s1 + $0xe84] ss:$16 sps:$4 sm:$0xff]  }
  0x93   :  { %5176 = vmatpush1.bf16.msra.mxu0 %v7608_v28  ;;  %v7704_v28 = vld [vmem:[%s11512_s1 + $0xc80] ss:$16 sps:$4 sm:$0xff]  }
  0x94   :  { %5219 = vmatpush1.bf16.msra.mxu1 %v7611_v29  ;;  %5177 = vmatprep.subr.bf16.mxu0 %v7616_v30  ;;  %v7707_v29 = vld [vmem:[%s11512_s1 + $0xe80] ss:$16 sps:$4 sm:$0xff]   ;;  %v7712_v30 = vld [vmem:[%s11512_s1 + $0xc64] ss:$16 sps:$4 sm:$0xff]  }
  0x95   :  { %5220 = vmatprep.subr.bf16.mxu1 %v7619_v31  ;;  %v7715_v31 = vld [vmem:[%s11512_s1 + $0xe64] ss:$16 sps:$4 sm:$0xff]  }
  0x97   :  { %5178 = vmatpush1.bf16.msra.mxu0 %v7614_v32  ;;  %v7710_v32 = vld [vmem:[%s11512_s1 + $0xc60] ss:$16 sps:$4 sm:$0xff]  }
  0x98   :  { %5221 = vmatpush1.bf16.msra.mxu1 %v7617_v33  ;;  %5179 = vmatprep.subr.bf16.mxu0 %v7622_v34  ;;  %v7713_v33 = vld [vmem:[%s11512_s1 + $0xe60] ss:$16 sps:$4 sm:$0xff]   ;;  %v7718_v34 = vld [vmem:[%s11512_s1 + $0xc44] ss:$16 sps:$4 sm:$0xff]  }
  0x99   :  { %5222 = vmatprep.subr.bf16.mxu1 %v7625_v35  ;;  %v7721_v35 = vld [vmem:[%s11512_s1 + $0xe44] ss:$16 sps:$4 sm:$0xff]  }
  0x9b   :  { %5180 = vmatpush1.bf16.msra.mxu0 %v7620_v36  ;;  %v7716_v36 = vld [vmem:[%s11512_s1 + $0xc40] ss:$16 sps:$4 sm:$0xff]  }
  0x9c   :  { %5223 = vmatpush1.bf16.msra.mxu1 %v7623_v37  ;;  %5181 = vmatprep.subr.bf16.mxu0 %v7628_v38  ;;  %v7719_v37 = vld [vmem:[%s11512_s1 + $0xe40] ss:$16 sps:$4 sm:$0xff]   ;;  %v7724_v38 = vld [vmem:[%s11512_s1 + $0xc24] ss:$16 sps:$4 sm:$0xff]  }
  0x9d   :  { %5224 = vmatprep.subr.bf16.mxu1 %v7631_v39  ;;  %v7727_v39 = vld [vmem:[%s11512_s1 + $0xe24] ss:$16 sps:$4 sm:$0xff]  }
  0x9f   :  { %5182 = vmatpush1.bf16.msra.mxu0 %v7626_v40  ;;  %v7722_v40 = vld [vmem:[%s11512_s1 + $0xc20] ss:$16 sps:$4 sm:$0xff]  }
  0xa0   :  { %5225 = vmatpush1.bf16.msra.mxu1 %v7629_v41  ;;  %5183 = vmatprep.subr.bf16.mxu0 %v7634_v42  ;;  %v7725_v41 = vld [vmem:[%s11512_s1 + $0xe20] ss:$16 sps:$4 sm:$0xff]   ;;  %v7730_v42 = vld [vmem:[%s11512_s1 + $0xc04] ss:$16 sps:$4 sm:$0xff]  }
  0xa1   :  { %5226 = vmatprep.subr.bf16.mxu1 %v7637_v43  ;;  %v7733_v43 = vld [vmem:[%s11512_s1 + $0xe04] ss:$16 sps:$4 sm:$0xff]  }
  0xa3   :  { %5184 = vmatpush2.bf16.msra.mxu0 %v7632_v44  ;;  %v7728_v44 = vld [vmem:[%s11512_s1 + $0xc00] ss:$16 sps:$4 sm:$0xff]  }
  0xa4   :  { %5227 = vmatpush2.bf16.msra.mxu1 %v7635_v45  ;;  %5185 = vmatprep.subr.bf16.mxu0 %v7640_v46  ;;  %v7731_v45 = vld [vmem:[%s11512_s1 + $0xe00] ss:$16 sps:$4 sm:$0xff]   ;;  %v7736_v46 = vld [vmem:[%s11512_s1 + $0xde4] ss:$16 sps:$4 sm:$0xff]  }
  0xa5   :  { %5228 = vmatprep.subr.bf16.mxu1 %v7643_v47  ;;  %v7739_v47 = vld [vmem:[%s11512_s1 + $0xfe4] ss:$16 sps:$4 sm:$0xff]  }
  0xa7   :  { %5186 = vmatpush2.bf16.msra.mxu0 %v7638_v48  ;;  %v7734_v48 = vld [vmem:[%s11512_s1 + $0xde0] ss:$16 sps:$4 sm:$0xff]  }
  0xa8   :  { %5229 = vmatpush2.bf16.msra.mxu1 %v7641_v49  ;;  %5187 = vmatprep.subr.bf16.mxu0 %v7646_v50  ;;  %v7737_v49 = vld [vmem:[%s11512_s1 + $0xfe0] ss:$16 sps:$4 sm:$0xff]   ;;  %v7742_v50 = vld [vmem:[%s11512_s1 + $0xdc4] ss:$16 sps:$4 sm:$0xff]  }
  0xa9   :  { %5230 = vmatprep.subr.bf16.mxu1 %v7649_v51  ;;  %v7745_v51 = vld [vmem:[%s11512_s1 + $0xfc4] ss:$16 sps:$4 sm:$0xff]  }
  0xab   :  { %5188 = vmatpush2.bf16.msra.mxu0 %v7644_v52  ;;  %v7740_v52 = vld [vmem:[%s11512_s1 + $0xdc0] ss:$16 sps:$4 sm:$0xff]  }
  0xac   :  { %5231 = vmatpush2.bf16.msra.mxu1 %v7647_v53  ;;  %5189 = vmatprep.subr.bf16.mxu0 %v7652_v54  ;;  %v7743_v53 = vld [vmem:[%s11512_s1 + $0xfc0] ss:$16 sps:$4 sm:$0xff]   ;;  %v7748_v54 = vld [vmem:[%s11512_s1 + $0xda4] ss:$16 sps:$4 sm:$0xff]  }
  0xad   :  { %5232 = vmatprep.subr.bf16.mxu1 %v7655_v55  ;;  %v7751_v55 = vld [vmem:[%s11512_s1 + $0xfa4] ss:$16 sps:$4 sm:$0xff]  }
  0xaf   :  { %5190 = vmatpush2.bf16.msra.mxu0 %v7650_v56  ;;  %v7746_v56 = vld [vmem:[%s11512_s1 + $0xda0] ss:$16 sps:$4 sm:$0xff]  }
  0xb0   :  { %5233 = vmatpush2.bf16.msra.mxu1 %v7653_v57  ;;  %5191 = vmatprep.subr.bf16.mxu0 %v7658_v58  ;;  %v7749_v57 = vld [vmem:[%s11512_s1 + $0xfa0] ss:$16 sps:$4 sm:$0xff]   ;;  %v7754_v58 = vld [vmem:[%s11512_s1 + $0xd84] ss:$16 sps:$4 sm:$0xff]  }
  0xb1   :  { %5234 = vmatprep.subr.bf16.mxu1 %v7661_v59  ;;  %v7757_v59 = vld [vmem:[%s11512_s1 + $0xf84] ss:$16 sps:$4 sm:$0xff]  }
  0xb3   :  { %5192 = vmatpush2.bf16.msra.mxu0 %v7656_v60  ;;  %v7752_v60 = vld [vmem:[%s11512_s1 + $0xd80] ss:$16 sps:$4 sm:$0xff]  }
  0xb4   :  { %5235 = vmatpush2.bf16.msra.mxu1 %v7659_v61  ;;  %5193 = vmatprep.subr.bf16.mxu0 %v7664_v62  ;;  %v7755_v61 = vld [vmem:[%s11512_s1 + $0xf80] ss:$16 sps:$4 sm:$0xff]   ;;  %v7760_v62 = vld [vmem:[%s11512_s1 + $0xd64] ss:$16 sps:$4 sm:$0xff]  }
  0xb5   :  { %5236 = vmatprep.subr.bf16.mxu1 %v7667_v63  ;;  %v7763_v63 = vld [vmem:[%s11512_s1 + $0xf64] ss:$16 sps:$4 sm:$0xff]  }
  0xb7   :  { %5194 = vmatpush2.bf16.msra.mxu0 %v7662_v0  ;;  %v7758_v0 = vld [vmem:[%s11512_s1 + $0xd60] ss:$16 sps:$4 sm:$0xff]  }
  0xb8   :  { %5237 = vmatpush2.bf16.msra.mxu1 %v7665_v1  ;;  %5195 = vmatprep.subr.bf16.mxu0 %v7670_v2  ;;  %v7761_v1 = vld [vmem:[%s11512_s1 + $0xf60] ss:$16 sps:$4 sm:$0xff]   ;;  %v7766_v2 = vld [vmem:[%s11512_s1 + $0xd44] ss:$16 sps:$4 sm:$0xff]  }
  0xb9   :  { %5238 = vmatprep.subr.bf16.mxu1 %v7673_v3  ;;  %v7769_v3 = vld [vmem:[%s11512_s1 + $0xf44] ss:$16 sps:$4 sm:$0xff]  }
  0xbb   :  { %5196 = vmatpush2.bf16.msra.mxu0 %v7668_v4  ;;  %v7764_v4 = vld [vmem:[%s11512_s1 + $0xd40] ss:$16 sps:$4 sm:$0xff]  }
  0xbc   :  { %5239 = vmatpush2.bf16.msra.mxu1 %v7671_v5  ;;  %5197 = vmatprep.subr.bf16.mxu0 %v7676_v6  ;;  %v7767_v5 = vld [vmem:[%s11512_s1 + $0xf40] ss:$16 sps:$4 sm:$0xff]   ;;  %v7772_v6 = vld [vmem:[%s11512_s1 + $0xd24] ss:$16 sps:$4 sm:$0xff]  }
  0xbd   :  { %5240 = vmatprep.subr.bf16.mxu1 %v7679_v7  ;;  %v7775_v7 = vld [vmem:[%s11512_s1 + $0xf24] ss:$16 sps:$4 sm:$0xff]  }
  0xbf   :  { %5198 = vmatpush2.bf16.msra.mxu0 %v7674_v8  ;;  %v7770_v8 = vld [vmem:[%s11512_s1 + $0xd20] ss:$16 sps:$4 sm:$0xff]  }
  0xc0   :  { %5241 = vmatpush2.bf16.msra.mxu1 %v7677_v9  ;;  %5253 = vmatprep.subr.bf16.mxu0 %v7688_v10  ;;  %v7773_v9 = vld [vmem:[%s11512_s1 + $0xf20] ss:$16 sps:$4 sm:$0xff]   ;;  %v7778_v10 = vld [vmem:[%s11512_s1 + $0xd04] ss:$16 sps:$4 sm:$0xff]  }
  0xc1   :  { %5296 = vmatprep.subr.bf16.mxu1 %v7691_v11  ;;  %v7781_v11 = vld [vmem:[%s11512_s1 + $0xf04] ss:$16 sps:$4 sm:$0xff]  }
  0xc2   :  { %5200 = vmatmul.mubr.bf16.vlgmr.msra.gmra.mxu0 %v7680_v12  ;;  %v7776_v12 = vld [vmem:[%s11512_s1 + $0xd00] ss:$16 sps:$4 sm:$0xff]  }
  0xc3   :  { %5243 = vmatmul.mubr.bf16.vlgmr.msra.gmra.mxu1 %v7683_v13  ;;  %5254 = vmatpush1.bf16.msra.mxu0 %v7686_v14  ;;  %v7779_v13 = vld [vmem:[%s11512_s1 + $0xf00] ss:$16 sps:$4 sm:$0xff]   ;;  %v7790_v14 = vld [vmem:[%s11512_s1 + $0x10e4] ss:$16 sps:$4 sm:$0xff]  }
  0xc4   :  { %5297 = vmatpush1.bf16.msra.mxu1 %v7689_v15  ;;  %5255 = vmatprep.subr.bf16.mxu0 %v7694_v16  ;;  %v7793_v15 = vld [vmem:[%s11512_s1 + $0x12e4] ss:$16 sps:$4 sm:$0xff]  }
  0xc5   :  { %5298 = vmatprep.subr.bf16.mxu1 %v7697_v17  ;;  %5285 = vmatprep.mubr.bf16.mxu0 %v7784_v18  ;;  %v7782_v16 = vld [vmem:[%s11513_s0 + $0x30] ss:$100 sps:$4 sm:$0xff]   ;;  %v7785_v17 = vld [vmem:[%s11513_s0 + $0x38] ss:$100 sps:$4 sm:$0xff]  }
  0xc6   :  { %5328 = vmatprep.mubr.bf16.mxu1 %v7787_v19  ;;  %v7788_v18 = vld [vmem:[%s11512_s1 + $0x10e0] ss:$16 sps:$4 sm:$0xff]  }
  0xc7   :  { %5256 = vmatpush1.bf16.msra.mxu0 %v7692_v20  ;;  %v7791_v19 = vld [vmem:[%s11512_s1 + $0x12e0] ss:$16 sps:$4 sm:$0xff]   ;;  %v7796_v20 = vld [vmem:[%s11512_s1 + $0x10c4] ss:$16 sps:$4 sm:$0xff]  }
  0xc8   :  { %5299 = vmatpush1.bf16.msra.mxu1 %v7695_v21  ;;  %5257 = vmatprep.subr.bf16.mxu0 %v7700_v22  ;;  %v7799_v21 = vld [vmem:[%s11512_s1 + $0x12c4] ss:$16 sps:$4 sm:$0xff]  }
  0xc9   :  { %5300 = vmatprep.subr.bf16.mxu1 %v7703_v23  ;;  %v7886_v22 = vld [vmem:[%s11513_s0 + $0x44] ss:$100 sps:$4 sm:$0xff]   ;;  %v7889_v23 = vld [vmem:[%s11513_s0 + $0x4c] ss:$100 sps:$4 sm:$0xff]  }
  0xcb   :  { %5258 = vmatpush1.bf16.msra.mxu0 %v7698_v24  ;;  %v7794_v24 = vld [vmem:[%s11512_s1 + $0x10c0] ss:$16 sps:$4 sm:$0xff]  }
  0xcc   :  { %5301 = vmatpush1.bf16.msra.mxu1 %v7701_v25  ;;  %5259 = vmatprep.subr.bf16.mxu0 %v7706_v26  ;;  %v7797_v25 = vld [vmem:[%s11512_s1 + $0x12c0] ss:$16 sps:$4 sm:$0xff]   ;;  %v7802_v26 = vld [vmem:[%s11512_s1 + $0x10a4] ss:$16 sps:$4 sm:$0xff]  }
  0xcd   :  { %5302 = vmatprep.subr.bf16.mxu1 %v7709_v27  ;;  %v7805_v27 = vld [vmem:[%s11512_s1 + $0x12a4] ss:$16 sps:$4 sm:$0xff]  }
  0xcf   :  { %5260 = vmatpush1.bf16.msra.mxu0 %v7704_v28  ;;  %v7800_v28 = vld [vmem:[%s11512_s1 + $0x10a0] ss:$16 sps:$4 sm:$0xff]  }
  0xd0   :  { %5303 = vmatpush1.bf16.msra.mxu1 %v7707_v29  ;;  %5261 = vmatprep.subr.bf16.mxu0 %v7712_v30  ;;  %v7803_v29 = vld [vmem:[%s11512_s1 + $0x12a0] ss:$16 sps:$4 sm:$0xff]   ;;  %v7808_v30 = vld [vmem:[%s11512_s1 + $0x1084] ss:$16 sps:$4 sm:$0xff]  }
  0xd1   :  { %5304 = vmatprep.subr.bf16.mxu1 %v7715_v31  ;;  %v7811_v31 = vld [vmem:[%s11512_s1 + $0x1284] ss:$16 sps:$4 sm:$0xff]  }
  0xd3   :  { %5262 = vmatpush1.bf16.msra.mxu0 %v7710_v32  ;;  %v7806_v32 = vld [vmem:[%s11512_s1 + $0x1080] ss:$16 sps:$4 sm:$0xff]  }
  0xd4   :  { %5305 = vmatpush1.bf16.msra.mxu1 %v7713_v33  ;;  %5263 = vmatprep.subr.bf16.mxu0 %v7718_v34  ;;  %v7809_v33 = vld [vmem:[%s11512_s1 + $0x1280] ss:$16 sps:$4 sm:$0xff]   ;;  %v7814_v34 = vld [vmem:[%s11512_s1 + $0x1064] ss:$16 sps:$4 sm:$0xff]  }
  0xd5   :  { %5306 = vmatprep.subr.bf16.mxu1 %v7721_v35  ;;  %v7817_v35 = vld [vmem:[%s11512_s1 + $0x1264] ss:$16 sps:$4 sm:$0xff]  }
  0xd7   :  { %5264 = vmatpush1.bf16.msra.mxu0 %v7716_v36  ;;  %v7812_v36 = vld [vmem:[%s11512_s1 + $0x1060] ss:$16 sps:$4 sm:$0xff]  }
  0xd8   :  { %5307 = vmatpush1.bf16.msra.mxu1 %v7719_v37  ;;  %5265 = vmatprep.subr.bf16.mxu0 %v7724_v38  ;;  %v7815_v37 = vld [vmem:[%s11512_s1 + $0x1260] ss:$16 sps:$4 sm:$0xff]   ;;  %v7820_v38 = vld [vmem:[%s11512_s1 + $0x1044] ss:$16 sps:$4 sm:$0xff]  }
  0xd9   :  { %5308 = vmatprep.subr.bf16.mxu1 %v7727_v39  ;;  %v7823_v39 = vld [vmem:[%s11512_s1 + $0x1244] ss:$16 sps:$4 sm:$0xff]  }
  0xdb   :  { %5266 = vmatpush1.bf16.msra.mxu0 %v7722_v40  ;;  %v7818_v40 = vld [vmem:[%s11512_s1 + $0x1040] ss:$16 sps:$4 sm:$0xff]  }
  0xdc   :  { %5309 = vmatpush1.bf16.msra.mxu1 %v7725_v41  ;;  %5267 = vmatprep.subr.bf16.mxu0 %v7730_v42  ;;  %v7821_v41 = vld [vmem:[%s11512_s1 + $0x1240] ss:$16 sps:$4 sm:$0xff]   ;;  %v7826_v42 = vld [vmem:[%s11512_s1 + $0x1024] ss:$16 sps:$4 sm:$0xff]  }
  0xdd   :  { %5310 = vmatprep.subr.bf16.mxu1 %v7733_v43  ;;  %v7829_v43 = vld [vmem:[%s11512_s1 + $0x1224] ss:$16 sps:$4 sm:$0xff]  }
  0xdf   :  { %5268 = vmatpush1.bf16.msra.mxu0 %v7728_v44  ;;  %v7824_v44 = vld [vmem:[%s11512_s1 + $0x1020] ss:$16 sps:$4 sm:$0xff]  }
  0xe0   :  { %5311 = vmatpush1.bf16.msra.mxu1 %v7731_v45  ;;  %5269 = vmatprep.subr.bf16.mxu0 %v7736_v46  ;;  %v7827_v45 = vld [vmem:[%s11512_s1 + $0x1220] ss:$16 sps:$4 sm:$0xff]   ;;  %v7832_v46 = vld [vmem:[%s11512_s1 + $0x1004] ss:$16 sps:$4 sm:$0xff]  }
  0xe1   :  { %5312 = vmatprep.subr.bf16.mxu1 %v7739_v47  ;;  %v7835_v47 = vld [vmem:[%s11512_s1 + $0x1204] ss:$16 sps:$4 sm:$0xff]  }
  0xe3   :  { %5270 = vmatpush2.bf16.msra.mxu0 %v7734_v48  ;;  %v7830_v48 = vld [vmem:[%s11512_s1 + $0x1000] ss:$16 sps:$4 sm:$0xff]  }
  0xe4   :  { %5313 = vmatpush2.bf16.msra.mxu1 %v7737_v49  ;;  %5271 = vmatprep.subr.bf16.mxu0 %v7742_v50  ;;  %v7833_v49 = vld [vmem:[%s11512_s1 + $0x1200] ss:$16 sps:$4 sm:$0xff]   ;;  %v7838_v50 = vld [vmem:[%s11512_s1 + $0x11e4] ss:$16 sps:$4 sm:$0xff]  }
  0xe5   :  { %5314 = vmatprep.subr.bf16.mxu1 %v7745_v51  ;;  %v7841_v51 = vld [vmem:[%s11512_s1 + $0x13e4] ss:$16 sps:$4 sm:$0xff]  }
  0xe7   :  { %5272 = vmatpush2.bf16.msra.mxu0 %v7740_v52  ;;  %v7836_v52 = vld [vmem:[%s11512_s1 + $0x11e0] ss:$16 sps:$4 sm:$0xff]  }
  0xe8   :  { %5315 = vmatpush2.bf16.msra.mxu1 %v7743_v53  ;;  %5273 = vmatprep.subr.bf16.mxu0 %v7748_v54  ;;  %v7839_v53 = vld [vmem:[%s11512_s1 + $0x13e0] ss:$16 sps:$4 sm:$0xff]   ;;  %v7844_v54 = vld [vmem:[%s11512_s1 + $0x11c4] ss:$16 sps:$4 sm:$0xff]  }
  0xe9   :  { %5316 = vmatprep.subr.bf16.mxu1 %v7751_v55  ;;  %v7847_v55 = vld [vmem:[%s11512_s1 + $0x13c4] ss:$16 sps:$4 sm:$0xff]  }
  0xeb   :  { %5274 = vmatpush2.bf16.msra.mxu0 %v7746_v56  ;;  %v7842_v56 = vld [vmem:[%s11512_s1 + $0x11c0] ss:$16 sps:$4 sm:$0xff]  }
  0xec   :  { %5317 = vmatpush2.bf16.msra.mxu1 %v7749_v57  ;;  %5275 = vmatprep.subr.bf16.mxu0 %v7754_v58  ;;  %v7845_v57 = vld [vmem:[%s11512_s1 + $0x13c0] ss:$16 sps:$4 sm:$0xff]   ;;  %v7850_v58 = vld [vmem:[%s11512_s1 + $0x11a4] ss:$16 sps:$4 sm:$0xff]  }
  0xed   :  { %5318 = vmatprep.subr.bf16.mxu1 %v7757_v59  ;;  %v7853_v59 = vld [vmem:[%s11512_s1 + $0x13a4] ss:$16 sps:$4 sm:$0xff]  }
  0xef   :  { %5276 = vmatpush2.bf16.msra.mxu0 %v7752_v60  ;;  %v7848_v60 = vld [vmem:[%s11512_s1 + $0x11a0] ss:$16 sps:$4 sm:$0xff]  }
  0xf0   :  { %5319 = vmatpush2.bf16.msra.mxu1 %v7755_v61  ;;  %5277 = vmatprep.subr.bf16.mxu0 %v7760_v62  ;;  %v7851_v61 = vld [vmem:[%s11512_s1 + $0x13a0] ss:$16 sps:$4 sm:$0xff]   ;;  %v7856_v62 = vld [vmem:[%s11512_s1 + $0x1184] ss:$16 sps:$4 sm:$0xff]  }
  0xf1   :  { %5320 = vmatprep.subr.bf16.mxu1 %v7763_v63  ;;  %v7859_v63 = vld [vmem:[%s11512_s1 + $0x1384] ss:$16 sps:$4 sm:$0xff]  }
  0xf3   :  { %5278 = vmatpush2.bf16.msra.mxu0 %v7758_v0  ;;  %v7854_v0 = vld [vmem:[%s11512_s1 + $0x1180] ss:$16 sps:$4 sm:$0xff]  }
  0xf4   :  { %5321 = vmatpush2.bf16.msra.mxu1 %v7761_v1  ;;  %5279 = vmatprep.subr.bf16.mxu0 %v7766_v2  ;;  %v7857_v1 = vld [vmem:[%s11512_s1 + $0x1380] ss:$16 sps:$4 sm:$0xff]   ;;  %v7862_v2 = vld [vmem:[%s11512_s1 + $0x1164] ss:$16 sps:$4 sm:$0xff]  }
  0xf5   :  { %5322 = vmatprep.subr.bf16.mxu1 %v7769_v3  ;;  %v7865_v3 = vld [vmem:[%s11512_s1 + $0x1364] ss:$16 sps:$4 sm:$0xff]  }
  0xf7   :  { %5280 = vmatpush2.bf16.msra.mxu0 %v7764_v4  ;;  %v7860_v4 = vld [vmem:[%s11512_s1 + $0x1160] ss:$16 sps:$4 sm:$0xff]  }
  0xf8   :  { %5323 = vmatpush2.bf16.msra.mxu1 %v7767_v5  ;;  %5281 = vmatprep.subr.bf16.mxu0 %v7772_v6  ;;  %v7863_v5 = vld [vmem:[%s11512_s1 + $0x1360] ss:$16 sps:$4 sm:$0xff]   ;;  %v7868_v6 = vld [vmem:[%s11512_s1 + $0x1144] ss:$16 sps:$4 sm:$0xff]  }
  0xf9   :  { %5324 = vmatprep.subr.bf16.mxu1 %v7775_v7  ;;  %v7871_v7 = vld [vmem:[%s11512_s1 + $0x1344] ss:$16 sps:$4 sm:$0xff]  }
  0xfb   :  { %5282 = vmatpush2.bf16.msra.mxu0 %v7770_v8  ;;  %v7866_v8 = vld [vmem:[%s11512_s1 + $0x1140] ss:$16 sps:$4 sm:$0xff]  }
  0xfc   :  { %5325 = vmatpush2.bf16.msra.mxu1 %v7773_v9  ;;  %5283 = vmatprep.subr.bf16.mxu0 %v7778_v10  ;;  %v7869_v9 = vld [vmem:[%s11512_s1 + $0x1340] ss:$16 sps:$4 sm:$0xff]   ;;  %v7874_v10 = vld [vmem:[%s11512_s1 + $0x1124] ss:$16 sps:$4 sm:$0xff]  }
  0xfd   :  { %5326 = vmatprep.subr.bf16.mxu1 %v7781_v11  ;;  %v7877_v11 = vld [vmem:[%s11512_s1 + $0x1324] ss:$16 sps:$4 sm:$0xff]  }
  0xff   :  { %5284 = vmatpush2.bf16.msra.mxu0 %v7776_v12  ;;  %v7872_v12 = vld [vmem:[%s11512_s1 + $0x1120] ss:$16 sps:$4 sm:$0xff]  }
 0x100   :  { %5327 = vmatpush2.bf16.msra.mxu1 %v7779_v13  ;;  %5339 = vmatprep.subr.bf16.mxu0 %v7790_v14  ;;  %v7875_v13 = vld [vmem:[%s11512_s1 + $0x1320] ss:$16 sps:$4 sm:$0xff]   ;;  %v7880_v14 = vld [vmem:[%s11512_s1 + $0x1104] ss:$16 sps:$4 sm:$0xff]  }
 0x101   :  { %5382 = vmatprep.subr.bf16.mxu1 %v7793_v15  ;;  %v7883_v15 = vld [vmem:[%s11512_s1 + $0x1304] ss:$16 sps:$4 sm:$0xff]  }
 0x102   :  { %5286 = vmatmul.mubr.bf16.vlgmr.msra.gmra.mxu0 %v7782_v16  ;;  %v7878_v16 = vld [vmem:[%s11512_s1 + $0x1100] ss:$16 sps:$4 sm:$0xff]  }
 0x103   :  { %5329 = vmatmul.mubr.bf16.vlgmr.msra.gmra.mxu1 %v7785_v17  ;;  %5340 = vmatpush1.bf16.msra.mxu0 %v7788_v18  ;;  %v7881_v17 = vld [vmem:[%s11512_s1 + $0x1300] ss:$16 sps:$4 sm:$0xff]  }
 0x104   :  { %5383 = vmatpush1.bf16.msra.mxu1 %v7791_v19  ;;  %5341 = vmatprep.subr.bf16.mxu0 %v7796_v20  ;;  %v7884_v18 = vld [vmem:[%s11513_s0 + $0x40] ss:$100 sps:$4 sm:$0xff]   ;;  %v7887_v19 = vld [vmem:[%s11513_s0 + $0x48] ss:$100 sps:$4 sm:$0xff]  }
 0x105   :  { %5384 = vmatprep.subr.bf16.mxu1 %v7799_v21  ;;  %5371 = vmatprep.mubr.bf16.mxu0 %v7886_v22  ;;  %v7892_v20 = vld [vmem:[%s11512_s1 + $0x14e4] ss:$16 sps:$4 sm:$0xff]   ;;  %v7890_v22 = vld [vmem:[%s11512_s1 + $0x14e0] ss:$16 sps:$4 sm:$0xff]  }
 0x106   :  { %5414 = vmatprep.mubr.bf16.mxu1 %v7889_v23  ;;  %v7895_v21 = vld [vmem:[%s11512_s1 + $0x16e4] ss:$16 sps:$4 sm:$0xff]   ;;  %v7893_v23 = vld [vmem:[%s11512_s1 + $0x16e0] ss:$16 sps:$4 sm:$0xff]  }
 0x107   :  { %5342 = vmatpush1.bf16.msra.mxu0 %v7794_v24  ;;  %v7898_v24 = vld [vmem:[%s11512_s1 + $0x14c4] ss:$16 sps:$4 sm:$0xff]  }
 0x108   :  { %5385 = vmatpush1.bf16.msra.mxu1 %v7797_v25  ;;  %5343 = vmatprep.subr.bf16.mxu0 %v7802_v26  ;;  %v7901_v25 = vld [vmem:[%s11512_s1 + $0x16c4] ss:$16 sps:$4 sm:$0xff]   ;;  %v7896_v26 = vld [vmem:[%s11512_s1 + $0x14c0] ss:$16 sps:$4 sm:$0xff]  }
 0x109   :  { %5386 = vmatprep.subr.bf16.mxu1 %v7805_v27  ;;  %v7899_v27 = vld [vmem:[%s11512_s1 + $0x16c0] ss:$16 sps:$4 sm:$0xff]  }
 0x10b   :  { %5344 = vmatpush1.bf16.msra.mxu0 %v7800_v28  ;;  %v7988_v28 = vld [vmem:[%s11513_s0 + $0x54] ss:$100 sps:$4 sm:$0xff]  }
 0x10c   :  { %5387 = vmatpush1.bf16.msra.mxu1 %v7803_v29  ;;  %5345 = vmatprep.subr.bf16.mxu0 %v7808_v30  ;;  %v7991_v29 = vld [vmem:[%s11513_s0 + $0x5c] ss:$100 sps:$4 sm:$0xff]   ;;  %v7904_v30 = vld [vmem:[%s11512_s1 + $0x14a4] ss:$16 sps:$4 sm:$0xff]  }
 0x10d   :  { %5388 = vmatprep.subr.bf16.mxu1 %v7811_v31  ;;  %v7907_v31 = vld [vmem:[%s11512_s1 + $0x16a4] ss:$16 sps:$4 sm:$0xff]  }
 0x10f   :  { %5346 = vmatpush1.bf16.msra.mxu0 %v7806_v32  ;;  %v7902_v32 = vld [vmem:[%s11512_s1 + $0x14a0] ss:$16 sps:$4 sm:$0xff]  }
 0x110   :  { %5389 = vmatpush1.bf16.msra.mxu1 %v7809_v33  ;;  %5347 = vmatprep.subr.bf16.mxu0 %v7814_v34  ;;  %v7905_v33 = vld [vmem:[%s11512_s1 + $0x16a0] ss:$16 sps:$4 sm:$0xff]   ;;  %v7910_v34 = vld [vmem:[%s11512_s1 + $0x1484] ss:$16 sps:$4 sm:$0xff]  }
 0x111   :  { %5390 = vmatprep.subr.bf16.mxu1 %v7817_v35  ;;  %v7913_v35 = vld [vmem:[%s11512_s1 + $0x1684] ss:$16 sps:$4 sm:$0xff]  }
 0x113   :  { %5348 = vmatpush1.bf16.msra.mxu0 %v7812_v36  ;;  %v7908_v36 = vld [vmem:[%s11512_s1 + $0x1480] ss:$16 sps:$4 sm:$0xff]  }
 0x114   :  { %5391 = vmatpush1.bf16.msra.mxu1 %v7815_v37  ;;  %5349 = vmatprep.subr.bf16.mxu0 %v7820_v38  ;;  %v7911_v37 = vld [vmem:[%s11512_s1 + $0x1680] ss:$16 sps:$4 sm:$0xff]   ;;  %v7916_v38 = vld [vmem:[%s11512_s1 + $0x1464] ss:$16 sps:$4 sm:$0xff]  }
 0x115   :  { %5392 = vmatprep.subr.bf16.mxu1 %v7823_v39  ;;  %v7919_v39 = vld [vmem:[%s11512_s1 + $0x1664] ss:$16 sps:$4 sm:$0xff]  }
 0x117   :  { %5350 = vmatpush1.bf16.msra.mxu0 %v7818_v40  ;;  %v7914_v40 = vld [vmem:[%s11512_s1 + $0x1460] ss:$16 sps:$4 sm:$0xff]  }
 0x118   :  { %5393 = vmatpush1.bf16.msra.mxu1 %v7821_v41  ;;  %5351 = vmatprep.subr.bf16.mxu0 %v7826_v42  ;;  %v7917_v41 = vld [vmem:[%s11512_s1 + $0x1660] ss:$16 sps:$4 sm:$0xff]   ;;  %v7922_v42 = vld [vmem:[%s11512_s1 + $0x1444] ss:$16 sps:$4 sm:$0xff]  }
 0x119   :  { %5394 = vmatprep.subr.bf16.mxu1 %v7829_v43  ;;  %v7925_v43 = vld [vmem:[%s11512_s1 + $0x1644] ss:$16 sps:$4 sm:$0xff]  }
 0x11b   :  { %5352 = vmatpush1.bf16.msra.mxu0 %v7824_v44  ;;  %v7920_v44 = vld [vmem:[%s11512_s1 + $0x1440] ss:$16 sps:$4 sm:$0xff]  }
 0x11c   :  { %5395 = vmatpush1.bf16.msra.mxu1 %v7827_v45  ;;  %5353 = vmatprep.subr.bf16.mxu0 %v7832_v46  ;;  %v7923_v45 = vld [vmem:[%s11512_s1 + $0x1640] ss:$16 sps:$4 sm:$0xff]   ;;  %v7928_v46 = vld [vmem:[%s11512_s1 + $0x1424] ss:$16 sps:$4 sm:$0xff]  }
 0x11d   :  { %5396 = vmatprep.subr.bf16.mxu1 %v7835_v47  ;;  %v7931_v47 = vld [vmem:[%s11512_s1 + $0x1624] ss:$16 sps:$4 sm:$0xff]  }
 0x11f   :  { %5354 = vmatpush1.bf16.msra.mxu0 %v7830_v48  ;;  %v7926_v48 = vld [vmem:[%s11512_s1 + $0x1420] ss:$16 sps:$4 sm:$0xff]  }
 0x120   :  { %5397 = vmatpush1.bf16.msra.mxu1 %v7833_v49  ;;  %5355 = vmatprep.subr.bf16.mxu0 %v7838_v50  ;;  %v7929_v49 = vld [vmem:[%s11512_s1 + $0x1620] ss:$16 sps:$4 sm:$0xff]   ;;  %v7934_v50 = vld [vmem:[%s11512_s1 + $0x1404] ss:$16 sps:$4 sm:$0xff]  }
 0x121   :  { %5398 = vmatprep.subr.bf16.mxu1 %v7841_v51  ;;  %v7937_v51 = vld [vmem:[%s11512_s1 + $0x1604] ss:$16 sps:$4 sm:$0xff]  }
 0x123   :  { %5356 = vmatpush2.bf16.msra.mxu0 %v7836_v52  ;;  %v7932_v52 = vld [vmem:[%s11512_s1 + $0x1400] ss:$16 sps:$4 sm:$0xff]  }
 0x124   :  { %5399 = vmatpush2.bf16.msra.mxu1 %v7839_v53  ;;  %5357 = vmatprep.subr.bf16.mxu0 %v7844_v54  ;;  %v7935_v53 = vld [vmem:[%s11512_s1 + $0x1600] ss:$16 sps:$4 sm:$0xff]   ;;  %v7940_v54 = vld [vmem:[%s11512_s1 + $0x15e4] ss:$16 sps:$4 sm:$0xff]  }
 0x125   :  { %5400 = vmatprep.subr.bf16.mxu1 %v7847_v55  ;;  %v7943_v55 = vld [vmem:[%s11512_s1 + $0x17e4] ss:$16 sps:$4 sm:$0xff]  }
 0x127   :  { %5358 = vmatpush2.bf16.msra.mxu0 %v7842_v56  ;;  %v7938_v56 = vld [vmem:[%s11512_s1 + $0x15e0] ss:$16 sps:$4 sm:$0xff]  }
 0x128   :  { %5401 = vmatpush2.bf16.msra.mxu1 %v7845_v57  ;;  %5359 = vmatprep.subr.bf16.mxu0 %v7850_v58  ;;  %v7941_v57 = vld [vmem:[%s11512_s1 + $0x17e0] ss:$16 sps:$4 sm:$0xff]   ;;  %v7946_v58 = vld [vmem:[%s11512_s1 + $0x15c4] ss:$16 sps:$4 sm:$0xff]  }
 0x129   :  { %5402 = vmatprep.subr.bf16.mxu1 %v7853_v59  ;;  %v7949_v59 = vld [vmem:[%s11512_s1 + $0x17c4] ss:$16 sps:$4 sm:$0xff]  }
 0x12b   :  { %5360 = vmatpush2.bf16.msra.mxu0 %v7848_v60  ;;  %v7944_v60 = vld [vmem:[%s11512_s1 + $0x15c0] ss:$16 sps:$4 sm:$0xff]  }
 0x12c   :  { %5403 = vmatpush2.bf16.msra.mxu1 %v7851_v61  ;;  %5361 = vmatprep.subr.bf16.mxu0 %v7856_v62  ;;  %v7947_v61 = vld [vmem:[%s11512_s1 + $0x17c0] ss:$16 sps:$4 sm:$0xff]   ;;  %v7952_v62 = vld [vmem:[%s11512_s1 + $0x15a4] ss:$16 sps:$4 sm:$0xff]  }
 0x12d   :  { %5404 = vmatprep.subr.bf16.mxu1 %v7859_v63  ;;  %v7955_v63 = vld [vmem:[%s11512_s1 + $0x17a4] ss:$16 sps:$4 sm:$0xff]  }
 0x12f   :  { %5362 = vmatpush2.bf16.msra.mxu0 %v7854_v0  ;;  %v7950_v0 = vld [vmem:[%s11512_s1 + $0x15a0] ss:$16 sps:$4 sm:$0xff]  }
 0x130   :  { %5405 = vmatpush2.bf16.msra.mxu1 %v7857_v1  ;;  %5363 = vmatprep.subr.bf16.mxu0 %v7862_v2  ;;  %v7953_v1 = vld [vmem:[%s11512_s1 + $0x17a0] ss:$16 sps:$4 sm:$0xff]   ;;  %v7958_v2 = vld [vmem:[%s11512_s1 + $0x1584] ss:$16 sps:$4 sm:$0xff]  }
 0x131   :  { %5406 = vmatprep.subr.bf16.mxu1 %v7865_v3  ;;  %v7961_v3 = vld [vmem:[%s11512_s1 + $0x1784] ss:$16 sps:$4 sm:$0xff]  }
 0x133   :  { %5364 = vmatpush2.bf16.msra.mxu0 %v7860_v4  ;;  %v7956_v4 = vld [vmem:[%s11512_s1 + $0x1580] ss:$16 sps:$4 sm:$0xff]  }
 0x134   :  { %5407 = vmatpush2.bf16.msra.mxu1 %v7863_v5  ;;  %5365 = vmatprep.subr.bf16.mxu0 %v7868_v6  ;;  %v7959_v5 = vld [vmem:[%s11512_s1 + $0x1780] ss:$16 sps:$4 sm:$0xff]   ;;  %v7964_v6 = vld [vmem:[%s11512_s1 + $0x1564] ss:$16 sps:$4 sm:$0xff]  }
 0x135   :  { %5408 = vmatprep.subr.bf16.mxu1 %v7871_v7  ;;  %v7967_v7 = vld [vmem:[%s11512_s1 + $0x1764] ss:$16 sps:$4 sm:$0xff]  }
 0x137   :  { %5366 = vmatpush2.bf16.msra.mxu0 %v7866_v8  ;;  %v7962_v8 = vld [vmem:[%s11512_s1 + $0x1560] ss:$16 sps:$4 sm:$0xff]  }
 0x138   :  { %5409 = vmatpush2.bf16.msra.mxu1 %v7869_v9  ;;  %5367 = vmatprep.subr.bf16.mxu0 %v7874_v10  ;;  %v7965_v9 = vld [vmem:[%s11512_s1 + $0x1760] ss:$16 sps:$4 sm:$0xff]   ;;  %v7970_v10 = vld [vmem:[%s11512_s1 + $0x1544] ss:$16 sps:$4 sm:$0xff]  }
 0x139   :  { %5410 = vmatprep.subr.bf16.mxu1 %v7877_v11  ;;  %v7973_v11 = vld [vmem:[%s11512_s1 + $0x1744] ss:$16 sps:$4 sm:$0xff]  }
 0x13b   :  { %5368 = vmatpush2.bf16.msra.mxu0 %v7872_v12  ;;  %v7968_v12 = vld [vmem:[%s11512_s1 + $0x1540] ss:$16 sps:$4 sm:$0xff]  }
 0x13c   :  { %5411 = vmatpush2.bf16.msra.mxu1 %v7875_v13  ;;  %5369 = vmatprep.subr.bf16.mxu0 %v7880_v14  ;;  %v7971_v13 = vld [vmem:[%s11512_s1 + $0x1740] ss:$16 sps:$4 sm:$0xff]   ;;  %v7976_v14 = vld [vmem:[%s11512_s1 + $0x1524] ss:$16 sps:$4 sm:$0xff]  }
 0x13d   :  { %5412 = vmatprep.subr.bf16.mxu1 %v7883_v15  ;;  %v7979_v15 = vld [vmem:[%s11512_s1 + $0x1724] ss:$16 sps:$4 sm:$0xff]  }
 0x13f   :  { %5370 = vmatpush2.bf16.msra.mxu0 %v7878_v16  ;;  %v7974_v16 = vld [vmem:[%s11512_s1 + $0x1520] ss:$16 sps:$4 sm:$0xff]  }
 0x140   :  { %5413 = vmatpush2.bf16.msra.mxu1 %v7881_v17  ;;  %5425 = vmatprep.subr.bf16.mxu0 %v7892_v20  ;;  %v7977_v17 = vld [vmem:[%s11512_s1 + $0x1720] ss:$16 sps:$4 sm:$0xff]  }
 0x141   :  { %5468 = vmatprep.subr.bf16.mxu1 %v7895_v21  ;;  %v7980_v20 = vld [vmem:[%s11512_s1 + $0x1500] ss:$16 sps:$4 sm:$0xff]  }
 0x142   :  { %5372 = vmatmul.mubr.bf16.vlgmr.msra.gmra.mxu0 %v7884_v18  ;;  %v7982_v18 = vld [vmem:[%s11512_s1 + $0x1504] ss:$16 sps:$4 sm:$0xff]   ;;  %v7983_v21 = vld [vmem:[%s11512_s1 + $0x1700] ss:$16 sps:$4 sm:$0xff]  }
 0x143   :  { %5415 = vmatmul.mubr.bf16.vlgmr.msra.gmra.mxu1 %v7887_v19  ;;  %5426 = vmatpush1.bf16.msra.mxu0 %v7890_v22  ;;  %v7985_v19 = vld [vmem:[%s11512_s1 + $0x1704] ss:$16 sps:$4 sm:$0xff]  }
 0x144   :  { %5469 = vmatpush1.bf16.msra.mxu1 %v7893_v23  ;;  %5427 = vmatprep.subr.bf16.mxu0 %v7898_v24  ;;  %v7986_v22 = vld [vmem:[%s11513_s0 + $0x50] ss:$100 sps:$4 sm:$0xff]   ;;  %v7989_v23 = vld [vmem:[%s11513_s0 + $0x58] ss:$100 sps:$4 sm:$0xff]  }
 0x145   :  { %5470 = vmatprep.subr.bf16.mxu1 %v7901_v25  ;;  %5457 = vmatprep.mubr.bf16.mxu0 %v7988_v28  ;;  %v7994_v24 = vld [vmem:[%s11512_s1 + $0x18e4] ss:$16 sps:$4 sm:$0xff]   ;;  %v7997_v25 = vld [vmem:[%s11512_s1 + $0xec] ss:$16 sps:$4 sm:$0xff]  }
 0x146   :  { %5500 = vmatprep.mubr.bf16.mxu1 %v7991_v29  ;;  %v8000_v28 = vld [vmem:[%s11512_s1 + $0x18c4] ss:$16 sps:$4 sm:$0xff]   ;;  %v8003_v29 = vld [vmem:[%s11512_s1 + $0xcc] ss:$16 sps:$4 sm:$0xff]  }
 0x147   :  { %5428 = vmatpush1.bf16.msra.mxu0 %v7896_v26  ;;  %v7992_v26 = vld [vmem:[%s11512_s1 + $0x18e0] ss:$16 sps:$4 sm:$0xff]  }
 0x148   :  { %5471 = vmatpush1.bf16.msra.mxu1 %v7899_v27  ;;  %5429 = vmatprep.subr.bf16.mxu0 %v7904_v30  ;;  %v7995_v27 = vld [vmem:[%s11512_s1 + $0xe8] ss:$16 sps:$4 sm:$0xff]   ;;  %v7998_v30 = vld [vmem:[%s11512_s1 + $0x18c0] ss:$16 sps:$4 sm:$0xff]  }
 0x149   :  { %5472 = vmatprep.subr.bf16.mxu1 %v7907_v31  ;;  %v8001_v31 = vld [vmem:[%s11512_s1 + $0xc8] ss:$16 sps:$4 sm:$0xff]  }
 0x14b   :  { %5430 = vmatpush1.bf16.msra.mxu0 %v7902_v32  ;;  %v8006_v32 = vld [vmem:[%s11512_s1 + $0x18a4] ss:$16 sps:$4 sm:$0xff]  }
 0x14c   :  { %5473 = vmatpush1.bf16.msra.mxu1 %v7905_v33  ;;  %5431 = vmatprep.subr.bf16.mxu0 %v7910_v34  ;;  %v8009_v33 = vld [vmem:[%s11512_s1 + $0xac] ss:$16 sps:$4 sm:$0xff]   ;;  %v8004_v34 = vld [vmem:[%s11512_s1 + $0x18a0] ss:$16 sps:$4 sm:$0xff]  }
 0x14d   :  { %5474 = vmatprep.subr.bf16.mxu1 %v7913_v35  ;;  %v8007_v35 = vld [vmem:[%s11512_s1 + $0xa8] ss:$16 sps:$4 sm:$0xff]  }
 0x14f   :  { %5432 = vmatpush1.bf16.msra.mxu0 %v7908_v36  ;;  %v8674_v36 = vmov 0  }
 0x150   :  { %5475 = vmatpush1.bf16.msra.mxu1 %v7911_v37  ;;  %5433 = vmatprep.subr.bf16.mxu0 %v7916_v38  ;;  %v8649_v37 = vld [vmem:[%s11513_s0 + $0x4] ss:$100 sps:$4 sm:$0xff]  }
 0x151   :  { %5476 = vmatprep.subr.bf16.mxu1 %v7919_v39  ;;  %v8012_v38 = vld [vmem:[%s11512_s1 + $0x1884] ss:$16 sps:$4 sm:$0xff]   ;;  %v8015_v39 = vld [vmem:[%s11512_s1 + $0x8c] ss:$16 sps:$4 sm:$0xff]  }
 0x153   :  { %5434 = vmatpush1.bf16.msra.mxu0 %v7914_v40  ;;  %v8010_v40 = vld [vmem:[%s11512_s1 + $0x1880] ss:$16 sps:$4 sm:$0xff]  }
 0x154   :  { %5477 = vmatpush1.bf16.msra.mxu1 %v7917_v41  ;;  %5435 = vmatprep.subr.bf16.mxu0 %v7922_v42  ;;  %v8013_v41 = vld [vmem:[%s11512_s1 + $0x88] ss:$16 sps:$4 sm:$0xff]   ;;  %v8018_v42 = vld [vmem:[%s11512_s1 + $0x1864] ss:$16 sps:$4 sm:$0xff]  }
 0x155   :  { %5478 = vmatprep.subr.bf16.mxu1 %v7925_v43  ;;  %v8021_v43 = vld [vmem:[%s11512_s1 + $0x6c] ss:$16 sps:$4 sm:$0xff]  }
 0x157   :  { %5436 = vmatpush1.bf16.msra.mxu0 %v7920_v44  ;;  %v8016_v44 = vld [vmem:[%s11512_s1 + $0x1860] ss:$16 sps:$4 sm:$0xff]  }
 0x158   :  { %5479 = vmatpush1.bf16.msra.mxu1 %v7923_v45  ;;  %5437 = vmatprep.subr.bf16.mxu0 %v7928_v46  ;;  %v8019_v45 = vld [vmem:[%s11512_s1 + $0x68] ss:$16 sps:$4 sm:$0xff]   ;;  %v8024_v46 = vld [vmem:[%s11512_s1 + $0x1844] ss:$16 sps:$4 sm:$0xff]  }
 0x159   :  { %5480 = vmatprep.subr.bf16.mxu1 %v7931_v47  ;;  %v8027_v47 = vld [vmem:[%s11512_s1 + $0x4c] ss:$16 sps:$4 sm:$0xff]  }
 0x15b   :  { %5438 = vmatpush1.bf16.msra.mxu0 %v7926_v48  ;;  %v8022_v48 = vld [vmem:[%s11512_s1 + $0x1840] ss:$16 sps:$4 sm:$0xff]  }
 0x15c   :  { %5481 = vmatpush1.bf16.msra.mxu1 %v7929_v49  ;;  %5439 = vmatprep.subr.bf16.mxu0 %v7934_v50  ;;  %v8025_v49 = vld [vmem:[%s11512_s1 + $0x48] ss:$16 sps:$4 sm:$0xff]   ;;  %v8030_v50 = vld [vmem:[%s11512_s1 + $0x1824] ss:$16 sps:$4 sm:$0xff]  }
 0x15d   :  { %5482 = vmatprep.subr.bf16.mxu1 %v7937_v51  ;;  %v8033_v51 = vld [vmem:[%s11512_s1 + $0x2c] ss:$16 sps:$4 sm:$0xff]  }
 0x15f   :  { %5440 = vmatpush1.bf16.msra.mxu0 %v7932_v52  ;;  %v8028_v52 = vld [vmem:[%s11512_s1 + $0x1820] ss:$16 sps:$4 sm:$0xff]  }
 0x160   :  { %5483 = vmatpush1.bf16.msra.mxu1 %v7935_v53  ;;  %5441 = vmatprep.subr.bf16.mxu0 %v7940_v54  ;;  %v8031_v53 = vld [vmem:[%s11512_s1 + $0x28] ss:$16 sps:$4 sm:$0xff]   ;;  %v8036_v54 = vld [vmem:[%s11512_s1 + $0x1804] ss:$16 sps:$4 sm:$0xff]  }
 0x161   :  { %5484 = vmatprep.subr.bf16.mxu1 %v7943_v55  ;;  %v8039_v55 = vld [vmem:[%s11512_s1 + $0xc] ss:$16 sps:$4 sm:$0xff]  }
 0x163   :  { %5442 = vmatpush2.bf16.msra.mxu0 %v7938_v56  ;;  %v8034_v56 = vld [vmem:[%s11512_s1 + $0x1800] ss:$16 sps:$4 sm:$0xff]  }
 0x164   :  { %5485 = vmatpush2.bf16.msra.mxu1 %v7941_v57  ;;  %5443 = vmatprep.subr.bf16.mxu0 %v7946_v58  ;;  %v8037_v57 = vld [vmem:[%s11512_s1 + $0x8] ss:$16 sps:$4 sm:$0xff]   ;;  %v8040_v58 = vld [vmem:[%s11513_s0 + $0x60] ss:$100 sps:$4 sm:$0xff]  }
 0x165   :  { %5486 = vmatprep.subr.bf16.mxu1 %v7949_v59  ;;  %v8043_v59 = vld [vmem:[%s11512_s1 + $0x1ec] ss:$16 sps:$4 sm:$0xff]  }
 0x167   :  { %5444 = vmatpush2.bf16.msra.mxu0 %v7944_v60  ;;  %v8046_v60 = vld [vmem:[%s11512_s1 + $0x2ec] ss:$16 sps:$4 sm:$0xff]  }
 0x168   :  { %5487 = vmatpush2.bf16.msra.mxu1 %v7947_v61  ;;  %5445 = vmatprep.subr.bf16.mxu0 %v7952_v62  ;;  %v8041_v61 = vld [vmem:[%s11512_s1 + $0x1e8] ss:$16 sps:$4 sm:$0xff]  }
 0x169   :  { %5488 = vmatprep.subr.bf16.mxu1 %v7955_v63  ;;  %v8044_v62 = vld [vmem:[%s11512_s1 + $0x2e8] ss:$16 sps:$4 sm:$0xff]   ;;  %v8049_v63 = vld [vmem:[%s11512_s1 + $0x1cc] ss:$16 sps:$4 sm:$0xff]  }
 0x16b   :  { %5446 = vmatpush2.bf16.msra.mxu0 %v7950_v0  ;;  %v8052_v0 = vld [vmem:[%s11512_s1 + $0x2cc] ss:$16 sps:$4 sm:$0xff]  }
 0x16c   :  { %5489 = vmatpush2.bf16.msra.mxu1 %v7953_v1  ;;  %5447 = vmatprep.subr.bf16.mxu0 %v7958_v2  ;;  %v8047_v1 = vld [vmem:[%s11512_s1 + $0x1c8] ss:$16 sps:$4 sm:$0xff]  }
 0x16d   :  { %5490 = vmatprep.subr.bf16.mxu1 %v7961_v3  ;;  %v8050_v2 = vld [vmem:[%s11512_s1 + $0x2c8] ss:$16 sps:$4 sm:$0xff]   ;;  %v8055_v3 = vld [vmem:[%s11512_s1 + $0x1ac] ss:$16 sps:$4 sm:$0xff]  }
 0x16f   :  { %5448 = vmatpush2.bf16.msra.mxu0 %v7956_v4  ;;  %v8058_v4 = vld [vmem:[%s11512_s1 + $0x2ac] ss:$16 sps:$4 sm:$0xff]  }
 0x170   :  { %5491 = vmatpush2.bf16.msra.mxu1 %v7959_v5  ;;  %5449 = vmatprep.subr.bf16.mxu0 %v7964_v6  ;;  %v8650_v5 = vld [vmem:[%s11513_s0 + $0xc] ss:$100 sps:$4 sm:$0xff]   ;;  %v8053_v6 = vld [vmem:[%s11512_s1 + $0x1a8] ss:$16 sps:$4 sm:$0xff]  }
 0x171   :  { %5492 = vmatprep.subr.bf16.mxu1 %v7967_v7  ;;  %v8056_v7 = vld [vmem:[%s11512_s1 + $0x2a8] ss:$16 sps:$4 sm:$0xff]  }
 0x173   :  { %5450 = vmatpush2.bf16.msra.mxu0 %v7962_v8  ;;  %v8061_v8 = vld [vmem:[%s11512_s1 + $0x18c] ss:$16 sps:$4 sm:$0xff]  }
 0x174   :  { %5493 = vmatpush2.bf16.msra.mxu1 %v7965_v9  ;;  %5451 = vmatprep.subr.bf16.mxu0 %v7970_v10  ;;  %v8064_v9 = vld [vmem:[%s11512_s1 + $0x28c] ss:$16 sps:$4 sm:$0xff]   ;;  %v8059_v10 = vld [vmem:[%s11512_s1 + $0x188] ss:$16 sps:$4 sm:$0xff]  }
 0x175   :  { %5494 = vmatprep.subr.bf16.mxu1 %v7973_v11  ;;  %v8062_v11 = vld [vmem:[%s11512_s1 + $0x288] ss:$16 sps:$4 sm:$0xff]  }
 0x177   :  { %5452 = vmatpush2.bf16.msra.mxu0 %v7968_v12  ;;  %v8067_v12 = vld [vmem:[%s11512_s1 + $0x16c] ss:$16 sps:$4 sm:$0xff]  }
 0x178   :  { %5495 = vmatpush2.bf16.msra.mxu1 %v7971_v13  ;;  %5453 = vmatprep.subr.bf16.mxu0 %v7976_v14  ;;  %v8070_v13 = vld [vmem:[%s11512_s1 + $0x26c] ss:$16 sps:$4 sm:$0xff]   ;;  %v8065_v14 = vld [vmem:[%s11512_s1 + $0x168] ss:$16 sps:$4 sm:$0xff]  }
 0x179   :  { %5496 = vmatprep.subr.bf16.mxu1 %v7979_v15  ;;  %v8068_v15 = vld [vmem:[%s11512_s1 + $0x268] ss:$16 sps:$4 sm:$0xff]  }
 0x17b   :  { %5454 = vmatpush2.bf16.msra.mxu0 %v7974_v16  ;;  %v8073_v16 = vld [vmem:[%s11512_s1 + $0x14c] ss:$16 sps:$4 sm:$0xff]  }
 0x17c   :  { %5497 = vmatpush2.bf16.msra.mxu1 %v7977_v17  ;;  %5455 = vmatprep.subr.bf16.mxu0 %v7982_v18  ;;  %v8076_v17 = vld [vmem:[%s11512_s1 + $0x24c] ss:$16 sps:$4 sm:$0xff]   ;;  %v8071_v18 = vld [vmem:[%s11512_s1 + $0x148] ss:$16 sps:$4 sm:$0xff]  }
 0x17d   :  { %5498 = vmatprep.subr.bf16.mxu1 %v7985_v19  ;;  %v8074_v19 = vld [vmem:[%s11512_s1 + $0x248] ss:$16 sps:$4 sm:$0xff]  }
 0x17f   :  { %5456 = vmatpush2.bf16.msra.mxu0 %v7980_v20  ;;  %v8079_v20 = vld [vmem:[%s11512_s1 + $0x12c] ss:$16 sps:$4 sm:$0xff]  }
 0x180   :  { %5499 = vmatpush2.bf16.msra.mxu1 %v7983_v21  ;;  %5511 = vmatprep.subr.bf16.mxu0 %v7994_v24  ;;  %v8082_v21 = vld [vmem:[%s11512_s1 + $0x22c] ss:$16 sps:$4 sm:$0xff]  }
 0x181   :  { %5554 = vmatprep.subr.bf16.mxu1 %v7997_v25  ;;  %v8085_v24 = vld [vmem:[%s11512_s1 + $0x10c] ss:$16 sps:$4 sm:$0xff]  }
 0x182   :  { %5458 = vmatmul.mubr.bf16.vlgmr.msra.gmra.mxu0 %v7986_v22  ;;  %v8077_v22 = vld [vmem:[%s11512_s1 + $0x128] ss:$16 sps:$4 sm:$0xff]   ;;  %v8088_v25 = vld [vmem:[%s11512_s1 + $0x20c] ss:$16 sps:$4 sm:$0xff]  }
 0x183   :  { %5501 = vmatmul.mubr.bf16.vlgmr.msra.gmra.mxu1 %v7989_v23  ;;  %5512 = vmatpush1.bf16.msra.mxu0 %v7992_v26  ;;  %v8080_v23 = vld [vmem:[%s11512_s1 + $0x228] ss:$16 sps:$4 sm:$0xff]  }
 0x184   :  { %5555 = vmatpush1.bf16.msra.mxu1 %v7995_v27  ;;  %5513 = vmatprep.subr.bf16.mxu0 %v8000_v28  ;;  %v8083_v26 = vld [vmem:[%s11512_s1 + $0x108] ss:$16 sps:$4 sm:$0xff]   ;;  %v8091_v28 = vld [vmem:[%s11512_s1 + $0x3ec] ss:$16 sps:$4 sm:$0xff]  }
 0x185   :  { %5556 = vmatprep.subr.bf16.mxu1 %v8003_v29  ;;  %5543 = vmatprep.mubr.bf16.mxu0 %v8674_v36  ;;  %v8086_v27 = vld [vmem:[%s11512_s1 + $0x208] ss:$16 sps:$4 sm:$0xff]   ;;  %v8094_v29 = vld [vmem:[%s11512_s1 + $0x4ec] ss:$16 sps:$4 sm:$0xff]  }
 0x186   :  { %5586 = vmatprep.mubr.bf16.mxu1 %v8649_v37  ;;  %v8651_v37 = vld [vmem:[%s11513_s0] ss:$100 sps:$4 sm:$0xff]  }
 0x187   :  { %5514 = vmatpush1.bf16.msra.mxu0 %v7998_v30  ;;  %v8089_v30 = vld [vmem:[%s11512_s1 + $0x3e8] ss:$16 sps:$4 sm:$0xff]  }
 0x188   :  { %5557 = vmatpush1.bf16.msra.mxu1 %v8001_v31  ;;  %5515 = vmatprep.subr.bf16.mxu0 %v8006_v32  ;;  %v8092_v31 = vld [vmem:[%s11512_s1 + $0x4e8] ss:$16 sps:$4 sm:$0xff]   ;;  %v8097_v32 = vld [vmem:[%s11512_s1 + $0x3cc] ss:$16 sps:$4 sm:$0xff]  }
 0x189   :  { %5558 = vmatprep.subr.bf16.mxu1 %v8009_v33  ;;  %v8100_v33 = vld [vmem:[%s11512_s1 + $0x4cc] ss:$16 sps:$4 sm:$0xff]  }
 0x18b   :  { %5516 = vmatpush1.bf16.msra.mxu0 %v8004_v34  ;;  %v8095_v34 = vld [vmem:[%s11512_s1 + $0x3c8] ss:$16 sps:$4 sm:$0xff]  }
 0x18c   :  { %5559 = vmatpush1.bf16.msra.mxu1 %v8007_v35  ;;  %5517 = vmatprep.subr.bf16.mxu0 %v8012_v38  ;;  %v8098_v35 = vld [vmem:[%s11512_s1 + $0x4c8] ss:$16 sps:$4 sm:$0xff]   ;;  %v8103_v38 = vld [vmem:[%s11512_s1 + $0x3ac] ss:$16 sps:$4 sm:$0xff]  }
 0x18d   :  { %5560 = vmatprep.subr.bf16.mxu1 %v8015_v39  ;;  %v8106_v39 = vld [vmem:[%s11512_s1 + $0x4ac] ss:$16 sps:$4 sm:$0xff]  }
 0x18f   :  { %5518 = vmatpush1.bf16.msra.mxu0 %v8010_v40  ;;  %v8101_v40 = vld [vmem:[%s11512_s1 + $0x3a8] ss:$16 sps:$4 sm:$0xff]  }
 0x190   :  { %5561 = vmatpush1.bf16.msra.mxu1 %v8013_v41  ;;  %5519 = vmatprep.subr.bf16.mxu0 %v8018_v42  ;;  %v8104_v41 = vld [vmem:[%s11512_s1 + $0x4a8] ss:$16 sps:$4 sm:$0xff]  }
 0x191   :  { %5562 = vmatprep.subr.bf16.mxu1 %v8021_v43  ;;  %v8652_v42 = vld [vmem:[%s11513_s0 + $0x14] ss:$100 sps:$4 sm:$0xff]   ;;  %v8109_v43 = vld [vmem:[%s11512_s1 + $0x38c] ss:$16 sps:$4 sm:$0xff]  }
 0x193   :  { %5520 = vmatpush1.bf16.msra.mxu0 %v8016_v44  ;;  %v8112_v44 = vld [vmem:[%s11512_s1 + $0x48c] ss:$16 sps:$4 sm:$0xff]  }
 0x194   :  { %5563 = vmatpush1.bf16.msra.mxu1 %v8019_v45  ;;  %5521 = vmatprep.subr.bf16.mxu0 %v8024_v46  ;;  %v8107_v45 = vld [vmem:[%s11512_s1 + $0x388] ss:$16 sps:$4 sm:$0xff]  }
 0x195   :  { %5564 = vmatprep.subr.bf16.mxu1 %v8027_v47  ;;  %v8110_v46 = vld [vmem:[%s11512_s1 + $0x488] ss:$16 sps:$4 sm:$0xff]   ;;  %v8115_v47 = vld [vmem:[%s11512_s1 + $0x36c] ss:$16 sps:$4 sm:$0xff]  }
 0x197   :  { %5522 = vmatpush1.bf16.msra.mxu0 %v8022_v48  ;;  %v8118_v48 = vld [vmem:[%s11512_s1 + $0x46c] ss:$16 sps:$4 sm:$0xff]  }
 0x198   :  { %5565 = vmatpush1.bf16.msra.mxu1 %v8025_v49  ;;  %5523 = vmatprep.subr.bf16.mxu0 %v8030_v50  ;;  %v8113_v49 = vld [vmem:[%s11512_s1 + $0x368] ss:$16 sps:$4 sm:$0xff]  }
 0x199   :  { %5566 = vmatprep.subr.bf16.mxu1 %v8033_v51  ;;  %v8116_v50 = vld [vmem:[%s11512_s1 + $0x468] ss:$16 sps:$4 sm:$0xff]   ;;  %v8121_v51 = vld [vmem:[%s11512_s1 + $0x34c] ss:$16 sps:$4 sm:$0xff]  }
 0x19b   :  { %5524 = vmatpush1.bf16.msra.mxu0 %v8028_v52  ;;  %v8124_v52 = vld [vmem:[%s11512_s1 + $0x44c] ss:$16 sps:$4 sm:$0xff]  }
 0x19c   :  { %5567 = vmatpush1.bf16.msra.mxu1 %v8031_v53  ;;  %5525 = vmatprep.subr.bf16.mxu0 %v8036_v54  ;;  %v8119_v53 = vld [vmem:[%s11512_s1 + $0x348] ss:$16 sps:$4 sm:$0xff]  }
 0x19d   :  { %5568 = vmatprep.subr.bf16.mxu1 %v8039_v55  ;;  %v8122_v54 = vld [vmem:[%s11512_s1 + $0x448] ss:$16 sps:$4 sm:$0xff]   ;;  %v8127_v55 = vld [vmem:[%s11512_s1 + $0x32c] ss:$16 sps:$4 sm:$0xff]  }
 0x19f   :  { %5526 = vmatpush1.bf16.msra.mxu0 %v8034_v56  ;;  %v8130_v56 = vld [vmem:[%s11512_s1 + $0x42c] ss:$16 sps:$4 sm:$0xff]  }
 0x1a0   :  { %5569 = vmatpush1.bf16.msra.mxu1 %v8037_v57  ;;  %5597 = vmatprep.subr.bf16.mxu0 %v8046_v60  ;;  %v8125_v57 = vld [vmem:[%s11512_s1 + $0x328] ss:$16 sps:$4 sm:$0xff]   ;;  %v8136_v60 = vld [vmem:[%s11512_s1 + $0x40c] ss:$16 sps:$4 sm:$0xff]  }
 0x1a1   :  { %5570 = vmatprep.subr.bf16.mxu1 %v8043_v59  ;;  %v8133_v59 = vld [vmem:[%s11512_s1 + $0x30c] ss:$16 sps:$4 sm:$0xff]  }
 0x1a2   :  { %5544 = vmatmul.mubr.bf16.vlgmr.msra.gmra.mxu0 %v8040_v58  ;;  %v8128_v58 = vld [vmem:[%s11512_s1 + $0x428] ss:$16 sps:$4 sm:$0xff]  }
 0x1a3   :  { %5598 = vmatpush1.bf16.msra.mxu0 %v8044_v62  ;;  %5629 = vmatprep.mubr.bf16.mxu0 %v8650_v5  ;;  %v8134_v62 = vld [vmem:[%s11512_s1 + $0x408] ss:$16 sps:$4 sm:$0xff]  }
 0x1a4   :  { %5571 = vmatpush2.bf16.msra.mxu1 %v8041_v61  ;;  %5599 = vmatprep.subr.bf16.mxu0 %v8052_v0  ;;  %v8131_v61 = vld [vmem:[%s11512_s1 + $0x308] ss:$16 sps:$4 sm:$0xff]   ;;  %v8142_v0 = vld [vmem:[%s11512_s1 + $0x6ec] ss:$16 sps:$4 sm:$0xff]  }
 0x1a5   :  { %5572 = vmatprep.subr.bf16.mxu1 %v8049_v63  ;;  %v8139_v63 = vld [vmem:[%s11512_s1 + $0x5ec] ss:$16 sps:$4 sm:$0xff]   ;;  %v8143_v5 = vld [vmem:[%s11512_s1 + $0x5c8] ss:$16 sps:$4 sm:$0xff]  }
 0x1a7   :  { %5600 = vmatpush1.bf16.msra.mxu0 %v8050_v2  ;;  %v8140_v2 = vld [vmem:[%s11512_s1 + $0x6e8] ss:$16 sps:$4 sm:$0xff]  }
 0x1a8   :  { %5573 = vmatpush2.bf16.msra.mxu1 %v8047_v1  ;;  %5601 = vmatprep.subr.bf16.mxu0 %v8058_v4  ;;  %v8137_v1 = vld [vmem:[%s11512_s1 + $0x5e8] ss:$16 sps:$4 sm:$0xff]   ;;  %v8148_v4 = vld [vmem:[%s11512_s1 + $0x6cc] ss:$16 sps:$4 sm:$0xff]  }
 0x1a9   :  { %5574 = vmatprep.subr.bf16.mxu1 %v8055_v3  ;;  %v8145_v3 = vld [vmem:[%s11512_s1 + $0x5cc] ss:$16 sps:$4 sm:$0xff]  }
 0x1ab   :  { %5602 = vmatpush1.bf16.msra.mxu0 %v8056_v7  ;;  %v8653_v7 = vld [vmem:[%s11513_s0 + $0x8] ss:$100 sps:$4 sm:$0xff]  }
 0x1ac   :  { %5575 = vmatpush2.bf16.msra.mxu1 %v8053_v6  ;;  %5603 = vmatprep.subr.bf16.mxu0 %v8064_v9  ;;  %v8146_v6 = vld [vmem:[%s11512_s1 + $0x6c8] ss:$16 sps:$4 sm:$0xff]   ;;  %v8154_v9 = vld [vmem:[%s11512_s1 + $0x6ac] ss:$16 sps:$4 sm:$0xff]  }
 0x1ad   :  { %5576 = vmatprep.subr.bf16.mxu1 %v8061_v8  ;;  %v8151_v8 = vld [vmem:[%s11512_s1 + $0x5ac] ss:$16 sps:$4 sm:$0xff]  }
 0x1af   :  { %5604 = vmatpush1.bf16.msra.mxu0 %v8062_v11  ;;  %v8152_v11 = vld [vmem:[%s11512_s1 + $0x6a8] ss:$16 sps:$4 sm:$0xff]  }
 0x1b0   :  { %5577 = vmatpush2.bf16.msra.mxu1 %v8059_v10  ;;  %5605 = vmatprep.subr.bf16.mxu0 %v8070_v13  ;;  %v8149_v10 = vld [vmem:[%s11512_s1 + $0x5a8] ss:$16 sps:$4 sm:$0xff]   ;;  %v8157_v13 = vld [vmem:[%s11512_s1 + $0x58c] ss:$16 sps:$4 sm:$0xff]  }
 0x1b1   :  { %5578 = vmatprep.subr.bf16.mxu1 %v8067_v12  ;;  %v8654_v12 = vld [vmem:[%s11513_s0 + $0x1c] ss:$100 sps:$4 sm:$0xff]  }
 0x1b3   :  { %5606 = vmatpush1.bf16.msra.mxu0 %v8068_v15  ;;  %v8155_v15 = vld [vmem:[%s11512_s1 + $0x588] ss:$16 sps:$4 sm:$0xff]  }
 0x1b4   :  { %5579 = vmatpush2.bf16.msra.mxu1 %v8065_v14  ;;  %5607 = vmatprep.subr.bf16.mxu0 %v8076_v17  ;;  %v8160_v14 = vld [vmem:[%s11512_s1 + $0x68c] ss:$16 sps:$4 sm:$0xff]  }
 0x1b5   :  { %5580 = vmatprep.subr.bf16.mxu1 %v8073_v16  ;;  %v8158_v16 = vld [vmem:[%s11512_s1 + $0x688] ss:$16 sps:$4 sm:$0xff]   ;;  %v8163_v17 = vld [vmem:[%s11512_s1 + $0x56c] ss:$16 sps:$4 sm:$0xff]  }
 0x1b7   :  { %5608 = vmatpush1.bf16.msra.mxu0 %v8074_v19  ;;  %v8161_v19 = vld [vmem:[%s11512_s1 + $0x568] ss:$16 sps:$4 sm:$0xff]  }
 0x1b8   :  { %5581 = vmatpush2.bf16.msra.mxu1 %v8071_v18  ;;  %5609 = vmatprep.subr.bf16.mxu0 %v8082_v21  ;;  %v8166_v18 = vld [vmem:[%s11512_s1 + $0x66c] ss:$16 sps:$4 sm:$0xff]  }
 0x1b9   :  { %5582 = vmatprep.subr.bf16.mxu1 %v8079_v20  ;;  %v8164_v20 = vld [vmem:[%s11512_s1 + $0x668] ss:$16 sps:$4 sm:$0xff]   ;;  %v8169_v21 = vld [vmem:[%s11512_s1 + $0x54c] ss:$16 sps:$4 sm:$0xff]  }
 0x1bb   :  { %5610 = vmatpush1.bf16.msra.mxu0 %v8080_v23  ;;  %v8167_v23 = vld [vmem:[%s11512_s1 + $0x548] ss:$16 sps:$4 sm:$0xff]  }
 0x1bc   :  { %5583 = vmatpush2.bf16.msra.mxu1 %v8077_v22  ;;  %5611 = vmatprep.subr.bf16.mxu0 %v8088_v25  ;;  %v8172_v22 = vld [vmem:[%s11512_s1 + $0x64c] ss:$16 sps:$4 sm:$0xff]  }
 0x1bd   :  { %5584 = vmatprep.subr.bf16.mxu1 %v8085_v24  ;;  %v8170_v24 = vld [vmem:[%s11512_s1 + $0x648] ss:$16 sps:$4 sm:$0xff]   ;;  %v8175_v25 = vld [vmem:[%s11512_s1 + $0x52c] ss:$16 sps:$4 sm:$0xff]  }
 0x1bf   :  { %5612 = vmatpush1.bf16.msra.mxu0 %v8086_v27  ;;  %v8173_v27 = vld [vmem:[%s11512_s1 + $0x528] ss:$16 sps:$4 sm:$0xff]  }
 0x1c0   :  { %5585 = vmatpush2.bf16.msra.mxu1 %v8083_v26  ;;  %5613 = vmatprep.subr.bf16.mxu0 %v8091_v28  ;;  %v8178_v26 = vld [vmem:[%s11512_s1 + $0x62c] ss:$16 sps:$4 sm:$0xff]   ;;  %v8176_v28 = vld [vmem:[%s11512_s1 + $0x628] ss:$16 sps:$4 sm:$0xff]  }
 0x1c1   :  { %5640 = vmatprep.subr.bf16.mxu1 %v8094_v29  ;;  %v8181_v29 = vld [vmem:[%s11512_s1 + $0x50c] ss:$16 sps:$4 sm:$0xff]  }
 0x1c3   :  { %5587 = vmatmul.mubr.bf16.vlgmr.msra.gmra.mxu1 %v8651_v37  ;;  %5614 = vmatpush2.bf16.msra.mxu0 %v8089_v30  ;;  %v8184_v30 = vld [vmem:[%s11512_s1 + $0x60c] ss:$16 sps:$4 sm:$0xff]   ;;  %v8188_v37 = vld [vmem:[%s11512_s1 + $0x8e8] ss:$16 sps:$4 sm:$0xff]  }
 0x1c4   :  { %5641 = vmatpush1.bf16.msra.mxu1 %v8092_v31  ;;  %5615 = vmatprep.subr.bf16.mxu0 %v8097_v32  ;;  %v8179_v31 = vld [vmem:[%s11512_s1 + $0x508] ss:$16 sps:$4 sm:$0xff]  }
 0x1c5   :  { %5642 = vmatprep.subr.bf16.mxu1 %v8100_v33  ;;  %5672 = vmatprep.mubr.bf16.mxu1 %v8652_v42  ;;  %v8182_v32 = vld [vmem:[%s11512_s1 + $0x608] ss:$16 sps:$4 sm:$0xff]   ;;  %v8187_v33 = vld [vmem:[%s11512_s1 + $0x7ec] ss:$16 sps:$4 sm:$0xff]  }
 0x1c6   :  { %v8194_v42 = vld [vmem:[%s11512_s1 + $0x8c8] ss:$16 sps:$4 sm:$0xff]  }
 0x1c7   :  { %5616 = vmatpush2.bf16.msra.mxu0 %v8095_v34  ;;  %v8190_v34 = vld [vmem:[%s11512_s1 + $0x8ec] ss:$16 sps:$4 sm:$0xff]  }
 0x1c8   :  { %5643 = vmatpush1.bf16.msra.mxu1 %v8098_v35  ;;  %5617 = vmatprep.subr.bf16.mxu0 %v8103_v38  ;;  %v8185_v35 = vld [vmem:[%s11512_s1 + $0x7e8] ss:$16 sps:$4 sm:$0xff]   ;;  %v8193_v38 = vld [vmem:[%s11512_s1 + $0x7cc] ss:$16 sps:$4 sm:$0xff]  }
 0x1c9   :  { %5644 = vmatprep.subr.bf16.mxu1 %v8106_v39  ;;  %v8196_v39 = vld [vmem:[%s11512_s1 + $0x8cc] ss:$16 sps:$4 sm:$0xff]  }
 0x1cb   :  { %5618 = vmatpush2.bf16.msra.mxu0 %v8101_v40  ;;  %v8655_v40 = vld [vmem:[%s11513_s0 + $0x10] ss:$100 sps:$4 sm:$0xff]  }
 0x1cc   :  { %5645 = vmatpush1.bf16.msra.mxu1 %v8104_v41  ;;  %5619 = vmatprep.subr.bf16.mxu0 %v8109_v43  ;;  %v8191_v41 = vld [vmem:[%s11512_s1 + $0x7c8] ss:$16 sps:$4 sm:$0xff]   ;;  %v8199_v43 = vld [vmem:[%s11512_s1 + $0x7ac] ss:$16 sps:$4 sm:$0xff]  }
 0x1cd   :  { %5646 = vmatprep.subr.bf16.mxu1 %v8112_v44  ;;  %v8202_v44 = vld [vmem:[%s11512_s1 + $0x8ac] ss:$16 sps:$4 sm:$0xff]  }
 0x1cf   :  { %5620 = vmatpush2.bf16.msra.mxu0 %v8107_v45  ;;  %v8656_v45 = vld [vmem:[%s11513_s0 + $0x24] ss:$100 sps:$4 sm:$0xff]  }
 0x1d0   :  { %5647 = vmatpush1.bf16.msra.mxu1 %v8110_v46  ;;  %5621 = vmatprep.subr.bf16.mxu0 %v8115_v47  ;;  %v8197_v46 = vld [vmem:[%s11512_s1 + $0x7a8] ss:$16 sps:$4 sm:$0xff]  }
 0x1d1   :  { %5648 = vmatprep.subr.bf16.mxu1 %v8118_v48  ;;  %v8200_v47 = vld [vmem:[%s11512_s1 + $0x8a8] ss:$16 sps:$4 sm:$0xff]   ;;  %v8205_v48 = vld [vmem:[%s11512_s1 + $0x78c] ss:$16 sps:$4 sm:$0xff]  }
 0x1d3   :  { %5622 = vmatpush2.bf16.msra.mxu0 %v8113_v49  ;;  %v8208_v49 = vld [vmem:[%s11512_s1 + $0x88c] ss:$16 sps:$4 sm:$0xff]  }
 0x1d4   :  { %5649 = vmatpush1.bf16.msra.mxu1 %v8116_v50  ;;  %5623 = vmatprep.subr.bf16.mxu0 %v8121_v51  ;;  %v8203_v50 = vld [vmem:[%s11512_s1 + $0x788] ss:$16 sps:$4 sm:$0xff]  }
 0x1d5   :  { %5650 = vmatprep.subr.bf16.mxu1 %v8124_v52  ;;  %v8206_v51 = vld [vmem:[%s11512_s1 + $0x888] ss:$16 sps:$4 sm:$0xff]   ;;  %v8211_v52 = vld [vmem:[%s11512_s1 + $0x76c] ss:$16 sps:$4 sm:$0xff]  }
 0x1d7   :  { %5624 = vmatpush2.bf16.msra.mxu0 %v8119_v53  ;;  %v8214_v53 = vld [vmem:[%s11512_s1 + $0x86c] ss:$16 sps:$4 sm:$0xff]  }
 0x1d8   :  { %5651 = vmatpush1.bf16.msra.mxu1 %v8122_v54  ;;  %5625 = vmatprep.subr.bf16.mxu0 %v8127_v55  ;;  %v8209_v54 = vld [vmem:[%s11512_s1 + $0x768] ss:$16 sps:$4 sm:$0xff]  }
 0x1d9   :  { %5652 = vmatprep.subr.bf16.mxu1 %v8130_v56  ;;  %v8212_v55 = vld [vmem:[%s11512_s1 + $0x868] ss:$16 sps:$4 sm:$0xff]   ;;  %v8217_v56 = vld [vmem:[%s11512_s1 + $0x74c] ss:$16 sps:$4 sm:$0xff]  }
 0x1db   :  { %5626 = vmatpush2.bf16.msra.mxu0 %v8125_v57  ;;  %v8220_v57 = vld [vmem:[%s11512_s1 + $0x84c] ss:$16 sps:$4 sm:$0xff]  }
 0x1dc   :  { %5653 = vmatpush1.bf16.msra.mxu1 %v8128_v58  ;;  %5627 = vmatprep.subr.bf16.mxu0 %v8133_v59  ;;  %v8215_v58 = vld [vmem:[%s11512_s1 + $0x748] ss:$16 sps:$4 sm:$0xff]  }
 0x1dd   :  { %5654 = vmatprep.subr.bf16.mxu1 %v8136_v60  ;;  %v8218_v59 = vld [vmem:[%s11512_s1 + $0x848] ss:$16 sps:$4 sm:$0xff]   ;;  %v8223_v60 = vld [vmem:[%s11512_s1 + $0x72c] ss:$16 sps:$4 sm:$0xff]  }
 0x1df   :  { %5628 = vmatpush2.bf16.msra.mxu0 %v8131_v61  ;;  %v8226_v61 = vld [vmem:[%s11512_s1 + $0x82c] ss:$16 sps:$4 sm:$0xff]  }
 0x1e0   :  { %5655 = vmatpush1.bf16.msra.mxu1 %v8134_v62  ;;  %5683 = vmatprep.subr.bf16.mxu0 %v8142_v0  ;;  %v8221_v62 = vld [vmem:[%s11512_s1 + $0x728] ss:$16 sps:$4 sm:$0xff]   ;;  %v8229_v0 = vld [vmem:[%s11512_s1 + $0x70c] ss:$16 sps:$4 sm:$0xff]  }
 0x1e1   :  { %5656 = vmatprep.subr.bf16.mxu1 %v8139_v63  ;;  %v8224_v63 = vld [vmem:[%s11512_s1 + $0x828] ss:$16 sps:$4 sm:$0xff]  }
 0x1e2   :  { %5630 = vmatmul.mubr.bf16.vlgmr.msra.gmra.mxu0 %v8653_v7  ;;  %v8236_v7 = vld [vmem:[%s11512_s1 + $0xae8] ss:$16 sps:$4 sm:$0xff]  }
 0x1e3   :  { %5684 = vmatpush1.bf16.msra.mxu0 %v8140_v2  ;;  %5715 = vmatprep.mubr.bf16.mxu0 %v8654_v12  ;;  %v8227_v2 = vld [vmem:[%s11512_s1 + $0x708] ss:$16 sps:$4 sm:$0xff]  }
 0x1e4   :  { %5657 = vmatpush2.bf16.msra.mxu1 %v8137_v1  ;;  %5685 = vmatprep.subr.bf16.mxu0 %v8148_v4  ;;  %v8232_v1 = vld [vmem:[%s11512_s1 + $0x80c] ss:$16 sps:$4 sm:$0xff]   ;;  %v8242_v12 = vld [vmem:[%s11512_s1 + $0xac8] ss:$16 sps:$4 sm:$0xff]  }
 0x1e5   :  { %5658 = vmatprep.subr.bf16.mxu1 %v8145_v3  ;;  %v8230_v3 = vld [vmem:[%s11512_s1 + $0x808] ss:$16 sps:$4 sm:$0xff]   ;;  %v8235_v4 = vld [vmem:[%s11512_s1 + $0x9ec] ss:$16 sps:$4 sm:$0xff]  }
 0x1e7   :  { %5686 = vmatpush1.bf16.msra.mxu0 %v8146_v6  ;;  %v8233_v6 = vld [vmem:[%s11512_s1 + $0x9e8] ss:$16 sps:$4 sm:$0xff]  }
 0x1e8   :  { %5659 = vmatpush2.bf16.msra.mxu1 %v8143_v5  ;;  %5687 = vmatprep.subr.bf16.mxu0 %v8154_v9  ;;  %v8238_v5 = vld [vmem:[%s11512_s1 + $0xaec] ss:$16 sps:$4 sm:$0xff]  }
 0x1e9   :  { %5660 = vmatprep.subr.bf16.mxu1 %v8151_v8  ;;  %v8241_v8 = vld [vmem:[%s11512_s1 + $0x9cc] ss:$16 sps:$4 sm:$0xff]  }
 0x1ea   :  { %v8244_v9 = vld [vmem:[%s11512_s1 + $0xacc] ss:$16 sps:$4 sm:$0xff]  }
 0x1eb   :  { %5688 = vmatpush1.bf16.msra.mxu0 %v8152_v11  ;;  %v8239_v11 = vld [vmem:[%s11512_s1 + $0x9c8] ss:$16 sps:$4 sm:$0xff]  }
 0x1ec   :  { %5661 = vmatpush2.bf16.msra.mxu1 %v8149_v10  ;;  %5689 = vmatprep.subr.bf16.mxu0 %v8160_v14  ;;  %v8657_v10 = vld [vmem:[%s11513_s0 + $0x18] ss:$100 sps:$4 sm:$0xff]  }
 0x1ed   :  { %5662 = vmatprep.subr.bf16.mxu1 %v8157_v13  ;;  %v8247_v13 = vld [vmem:[%s11512_s1 + $0x9ac] ss:$16 sps:$4 sm:$0xff]  }
 0x1ee   :  { %v8250_v14 = vld [vmem:[%s11512_s1 + $0xaac] ss:$16 sps:$4 sm:$0xff]  }
 0x1ef   :  { %5690 = vmatpush1.bf16.msra.mxu0 %v8158_v16  ;;  %v8245_v16 = vld [vmem:[%s11512_s1 + $0x9a8] ss:$16 sps:$4 sm:$0xff]  }
 0x1f0   :  { %5663 = vmatpush2.bf16.msra.mxu1 %v8155_v15  ;;  %5691 = vmatprep.subr.bf16.mxu0 %v8166_v18  ;;  %v8658_v15 = vld [vmem:[%s11513_s0 + $0x2c] ss:$100 sps:$4 sm:$0xff]  }
 0x1f1   :  { %5664 = vmatprep.subr.bf16.mxu1 %v8163_v17  ;;  %v8248_v17 = vld [vmem:[%s11512_s1 + $0xaa8] ss:$16 sps:$4 sm:$0xff]   ;;  %v8253_v18 = vld [vmem:[%s11512_s1 + $0x98c] ss:$16 sps:$4 sm:$0xff]  }
 0x1f3   :  { %5692 = vmatpush1.bf16.msra.mxu0 %v8164_v20  ;;  %v8251_v20 = vld [vmem:[%s11512_s1 + $0x988] ss:$16 sps:$4 sm:$0xff]  }
 0x1f4   :  { %5665 = vmatpush2.bf16.msra.mxu1 %v8161_v19  ;;  %5693 = vmatprep.subr.bf16.mxu0 %v8172_v22  ;;  %v8256_v19 = vld [vmem:[%s11512_s1 + $0xa8c] ss:$16 sps:$4 sm:$0xff]  }
 0x1f5   :  { %5666 = vmatprep.subr.bf16.mxu1 %v8169_v21  ;;  %v8254_v21 = vld [vmem:[%s11512_s1 + $0xa88] ss:$16 sps:$4 sm:$0xff]   ;;  %v8259_v22 = vld [vmem:[%s11512_s1 + $0x96c] ss:$16 sps:$4 sm:$0xff]  }
 0x1f7   :  { %5694 = vmatpush1.bf16.msra.mxu0 %v8170_v24  ;;  %v8257_v24 = vld [vmem:[%s11512_s1 + $0x968] ss:$16 sps:$4 sm:$0xff]  }
 0x1f8   :  { %5667 = vmatpush2.bf16.msra.mxu1 %v8167_v23  ;;  %5695 = vmatprep.subr.bf16.mxu0 %v8178_v26  ;;  %v8262_v23 = vld [vmem:[%s11512_s1 + $0xa6c] ss:$16 sps:$4 sm:$0xff]  }
 0x1f9   :  { %5668 = vmatprep.subr.bf16.mxu1 %v8175_v25  ;;  %v8260_v25 = vld [vmem:[%s11512_s1 + $0xa68] ss:$16 sps:$4 sm:$0xff]   ;;  %v8265_v26 = vld [vmem:[%s11512_s1 + $0x94c] ss:$16 sps:$4 sm:$0xff]  }
 0x1fb   :  { %5696 = vmatpush1.bf16.msra.mxu0 %v8176_v28  ;;  %v8263_v28 = vld [vmem:[%s11512_s1 + $0x948] ss:$16 sps:$4 sm:$0xff]  }
 0x1fc   :  { %5669 = vmatpush2.bf16.msra.mxu1 %v8173_v27  ;;  %5697 = vmatprep.subr.bf16.mxu0 %v8184_v30  ;;  %v8268_v27 = vld [vmem:[%s11512_s1 + $0xa4c] ss:$16 sps:$4 sm:$0xff]  }
 0x1fd   :  { %5670 = vmatprep.subr.bf16.mxu1 %v8181_v29  ;;  %v8266_v29 = vld [vmem:[%s11512_s1 + $0xa48] ss:$16 sps:$4 sm:$0xff]   ;;  %v8271_v30 = vld [vmem:[%s11512_s1 + $0x92c] ss:$16 sps:$4 sm:$0xff]  }
 0x1ff   :  { %5698 = vmatpush1.bf16.msra.mxu0 %v8182_v32  ;;  %v8269_v32 = vld [vmem:[%s11512_s1 + $0x928] ss:$16 sps:$4 sm:$0xff]  }
 0x200   :  { %5671 = vmatpush2.bf16.msra.mxu1 %v8179_v31  ;;  %5699 = vmatprep.subr.bf16.mxu0 %v8187_v33  ;;  %v8274_v31 = vld [vmem:[%s11512_s1 + $0xa2c] ss:$16 sps:$4 sm:$0xff]   ;;  %v8272_v33 = vld [vmem:[%s11512_s1 + $0xa28] ss:$16 sps:$4 sm:$0xff]  }
 0x201   :  { %5726 = vmatprep.subr.bf16.mxu1 %v8190_v34  ;;  %v8277_v34 = vld [vmem:[%s11512_s1 + $0x90c] ss:$16 sps:$4 sm:$0xff]  }
 0x203   :  { %5673 = vmatmul.mubr.bf16.vlgmr.msra.gmra.mxu1 %v8655_v40  ;;  %5700 = vmatpush2.bf16.msra.mxu0 %v8185_v35  ;;  %v8280_v35 = vld [vmem:[%s11512_s1 + $0xa0c] ss:$16 sps:$4 sm:$0xff]  }
 0x204   :  { %5727 = vmatpush1.bf16.msra.mxu1 %v8188_v37  ;;  %5701 = vmatprep.subr.bf16.mxu0 %v8193_v38  ;;  %v8275_v37 = vld [vmem:[%s11512_s1 + $0x908] ss:$16 sps:$4 sm:$0xff]   ;;  %v8286_v40 = vld [vmem:[%s11512_s1 + $0xcec] ss:$16 sps:$4 sm:$0xff]  }
 0x205   :  { %5728 = vmatprep.subr.bf16.mxu1 %v8196_v39  ;;  %5758 = vmatprep.mubr.bf16.mxu1 %v8656_v45  ;;  %v8278_v38 = vld [vmem:[%s11512_s1 + $0xa08] ss:$16 sps:$4 sm:$0xff]   ;;  %v8283_v39 = vld [vmem:[%s11512_s1 + $0xbec] ss:$16 sps:$4 sm:$0xff]   ;;  %v8659_v45 = vld [vmem:[%s11513_s0 + $0x20] ss:$100 sps:$4 sm:$0xff]  }
 0x207   :  { %5702 = vmatpush2.bf16.msra.mxu0 %v8191_v41  ;;  %v8281_v41 = vld [vmem:[%s11512_s1 + $0xbe8] ss:$16 sps:$4 sm:$0xff]  }
 0x208   :  { %5729 = vmatpush1.bf16.msra.mxu1 %v8194_v42  ;;  %5703 = vmatprep.subr.bf16.mxu0 %v8199_v43  ;;  %v8284_v42 = vld [vmem:[%s11512_s1 + $0xce8] ss:$16 sps:$4 sm:$0xff]   ;;  %v8289_v43 = vld [vmem:[%s11512_s1 + $0xbcc] ss:$16 sps:$4 sm:$0xff]  }
 0x209   :  { %5730 = vmatprep.subr.bf16.mxu1 %v8202_v44  ;;  %v8292_v44 = vld [vmem:[%s11512_s1 + $0xccc] ss:$16 sps:$4 sm:$0xff]  }
 0x20b   :  { %5704 = vmatpush2.bf16.msra.mxu0 %v8197_v46  ;;  %v8287_v46 = vld [vmem:[%s11512_s1 + $0xbc8] ss:$16 sps:$4 sm:$0xff]  }
 0x20c   :  { %5731 = vmatpush1.bf16.msra.mxu1 %v8200_v47  ;;  %5705 = vmatprep.subr.bf16.mxu0 %v8205_v48  ;;  %v8290_v47 = vld [vmem:[%s11512_s1 + $0xcc8] ss:$16 sps:$4 sm:$0xff]   ;;  %v8295_v48 = vld [vmem:[%s11512_s1 + $0xbac] ss:$16 sps:$4 sm:$0xff]  }
 0x20d   :  { %5732 = vmatprep.subr.bf16.mxu1 %v8208_v49  ;;  %v8298_v49 = vld [vmem:[%s11512_s1 + $0xcac] ss:$16 sps:$4 sm:$0xff]  }
 0x20f   :  { %5706 = vmatpush2.bf16.msra.mxu0 %v8203_v50  ;;  %v8660_v50 = vld [vmem:[%s11513_s0 + $0x34] ss:$100 sps:$4 sm:$0xff]  }
 0x210   :  { %5733 = vmatpush1.bf16.msra.mxu1 %v8206_v51  ;;  %5707 = vmatprep.subr.bf16.mxu0 %v8211_v52  ;;  %v8293_v51 = vld [vmem:[%s11512_s1 + $0xba8] ss:$16 sps:$4 sm:$0xff]  }
 0x211   :  { %5734 = vmatprep.subr.bf16.mxu1 %v8214_v53  ;;  %v8296_v52 = vld [vmem:[%s11512_s1 + $0xca8] ss:$16 sps:$4 sm:$0xff]   ;;  %v8301_v53 = vld [vmem:[%s11512_s1 + $0xb8c] ss:$16 sps:$4 sm:$0xff]  }
 0x213   :  { %5708 = vmatpush2.bf16.msra.mxu0 %v8209_v54  ;;  %v8304_v54 = vld [vmem:[%s11512_s1 + $0xc8c] ss:$16 sps:$4 sm:$0xff]  }
 0x214   :  { %5735 = vmatpush1.bf16.msra.mxu1 %v8212_v55  ;;  %5709 = vmatprep.subr.bf16.mxu0 %v8217_v56  ;;  %v8299_v55 = vld [vmem:[%s11512_s1 + $0xb88] ss:$16 sps:$4 sm:$0xff]  }
 0x215   :  { %5736 = vmatprep.subr.bf16.mxu1 %v8220_v57  ;;  %v8302_v56 = vld [vmem:[%s11512_s1 + $0xc88] ss:$16 sps:$4 sm:$0xff]   ;;  %v8307_v57 = vld [vmem:[%s11512_s1 + $0xb6c] ss:$16 sps:$4 sm:$0xff]  }
 0x217   :  { %5710 = vmatpush2.bf16.msra.mxu0 %v8215_v58  ;;  %v8310_v58 = vld [vmem:[%s11512_s1 + $0xc6c] ss:$16 sps:$4 sm:$0xff]  }
 0x218   :  { %5737 = vmatpush1.bf16.msra.mxu1 %v8218_v59  ;;  %5711 = vmatprep.subr.bf16.mxu0 %v8223_v60  ;;  %v8305_v59 = vld [vmem:[%s11512_s1 + $0xb68] ss:$16 sps:$4 sm:$0xff]  }
 0x219   :  { %5738 = vmatprep.subr.bf16.mxu1 %v8226_v61  ;;  %v8308_v60 = vld [vmem:[%s11512_s1 + $0xc68] ss:$16 sps:$4 sm:$0xff]   ;;  %v8313_v61 = vld [vmem:[%s11512_s1 + $0xb4c] ss:$16 sps:$4 sm:$0xff]  }
 0x21b   :  { %5712 = vmatpush2.bf16.msra.mxu0 %v8221_v62  ;;  %v8316_v62 = vld [vmem:[%s11512_s1 + $0xc4c] ss:$16 sps:$4 sm:$0xff]  }
 0x21c   :  { %5739 = vmatpush1.bf16.msra.mxu1 %v8224_v63  ;;  %5713 = vmatprep.subr.bf16.mxu0 %v8229_v0  ;;  %v8311_v63 = vld [vmem:[%s11512_s1 + $0xb48] ss:$16 sps:$4 sm:$0xff]  }
 0x21d   :  { %5740 = vmatprep.subr.bf16.mxu1 %v8232_v1  ;;  %v8314_v0 = vld [vmem:[%s11512_s1 + $0xc48] ss:$16 sps:$4 sm:$0xff]   ;;  %v8319_v1 = vld [vmem:[%s11512_s1 + $0xb2c] ss:$16 sps:$4 sm:$0xff]  }
 0x21f   :  { %5714 = vmatpush2.bf16.msra.mxu0 %v8227_v2  ;;  %v8322_v2 = vld [vmem:[%s11512_s1 + $0xc2c] ss:$16 sps:$4 sm:$0xff]  }
 0x220   :  { %5741 = vmatpush1.bf16.msra.mxu1 %v8230_v3  ;;  %5769 = vmatprep.subr.bf16.mxu0 %v8238_v5  ;;  %v8317_v3 = vld [vmem:[%s11512_s1 + $0xb28] ss:$16 sps:$4 sm:$0xff]   ;;  %v8325_v5 = vld [vmem:[%s11512_s1 + $0xb0c] ss:$16 sps:$4 sm:$0xff]  }
 0x221   :  { %5742 = vmatprep.subr.bf16.mxu1 %v8235_v4  ;;  %v8320_v4 = vld [vmem:[%s11512_s1 + $0xc28] ss:$16 sps:$4 sm:$0xff]  }
 0x222   :  { %5716 = vmatmul.mubr.bf16.vlgmr.msra.gmra.mxu0 %v8657_v10  ;;  %v8334_v10 = vld [vmem:[%s11512_s1 + $0xeec] ss:$16 sps:$4 sm:$0xff]  }
 0x223   :  { %5770 = vmatpush1.bf16.msra.mxu0 %v8236_v7  ;;  %5801 = vmatprep.mubr.bf16.mxu0 %v8658_v15  ;;  %v8323_v7 = vld [vmem:[%s11512_s1 + $0xb08] ss:$16 sps:$4 sm:$0xff]  }
 0x224   :  { %5743 = vmatpush2.bf16.msra.mxu1 %v8233_v6  ;;  %5771 = vmatprep.subr.bf16.mxu0 %v8244_v9  ;;  %v8328_v6 = vld [vmem:[%s11512_s1 + $0xc0c] ss:$16 sps:$4 sm:$0xff]  }
 0x225   :  { %5744 = vmatprep.subr.bf16.mxu1 %v8241_v8  ;;  %v8326_v8 = vld [vmem:[%s11512_s1 + $0xc08] ss:$16 sps:$4 sm:$0xff]   ;;  %v8331_v9 = vld [vmem:[%s11512_s1 + $0xdec] ss:$16 sps:$4 sm:$0xff]  }
 0x226   :  { %v8661_v15 = vld [vmem:[%s11513_s0 + $0x28] ss:$100 sps:$4 sm:$0xff]  }
 0x227   :  { %5772 = vmatpush1.bf16.msra.mxu0 %v8242_v12  ;;  %v8332_v12 = vld [vmem:[%s11512_s1 + $0xee8] ss:$16 sps:$4 sm:$0xff]  }
 0x228   :  { %5745 = vmatpush2.bf16.msra.mxu1 %v8239_v11  ;;  %5773 = vmatprep.subr.bf16.mxu0 %v8250_v14  ;;  %v8329_v11 = vld [vmem:[%s11512_s1 + $0xde8] ss:$16 sps:$4 sm:$0xff]   ;;  %v8340_v14 = vld [vmem:[%s11512_s1 + $0xecc] ss:$16 sps:$4 sm:$0xff]  }
 0x229   :  { %5746 = vmatprep.subr.bf16.mxu1 %v8247_v13  ;;  %v8337_v13 = vld [vmem:[%s11512_s1 + $0xdcc] ss:$16 sps:$4 sm:$0xff]  }
 0x22b   :  { %5774 = vmatpush1.bf16.msra.mxu0 %v8248_v17  ;;  %v8338_v17 = vld [vmem:[%s11512_s1 + $0xec8] ss:$16 sps:$4 sm:$0xff]  }
 0x22c   :  { %5747 = vmatpush2.bf16.msra.mxu1 %v8245_v16  ;;  %5775 = vmatprep.subr.bf16.mxu0 %v8256_v19  ;;  %v8335_v16 = vld [vmem:[%s11512_s1 + $0xdc8] ss:$16 sps:$4 sm:$0xff]   ;;  %v8346_v19 = vld [vmem:[%s11512_s1 + $0xeac] ss:$16 sps:$4 sm:$0xff]  }
 0x22d   :  { %5748 = vmatprep.subr.bf16.mxu1 %v8253_v18  ;;  %v8343_v18 = vld [vmem:[%s11512_s1 + $0xdac] ss:$16 sps:$4 sm:$0xff]  }
 0x22f   :  { %5776 = vmatpush1.bf16.msra.mxu0 %v8254_v21  ;;  %v8341_v21 = vld [vmem:[%s11512_s1 + $0xda8] ss:$16 sps:$4 sm:$0xff]  }
 0x230   :  { %5749 = vmatpush2.bf16.msra.mxu1 %v8251_v20  ;;  %5777 = vmatprep.subr.bf16.mxu0 %v8262_v23  ;;  %v8662_v20 = vld [vmem:[%s11513_s0 + $0x3c] ss:$100 sps:$4 sm:$0xff]  }
 0x231   :  { %5750 = vmatprep.subr.bf16.mxu1 %v8259_v22  ;;  %v8344_v22 = vld [vmem:[%s11512_s1 + $0xea8] ss:$16 sps:$4 sm:$0xff]   ;;  %v8349_v23 = vld [vmem:[%s11512_s1 + $0xd8c] ss:$16 sps:$4 sm:$0xff]  }
 0x233   :  { %5778 = vmatpush1.bf16.msra.mxu0 %v8260_v25  ;;  %v8347_v25 = vld [vmem:[%s11512_s1 + $0xd88] ss:$16 sps:$4 sm:$0xff]  }
 0x234   :  { %5751 = vmatpush2.bf16.msra.mxu1 %v8257_v24  ;;  %5779 = vmatprep.subr.bf16.mxu0 %v8268_v27  ;;  %v8352_v24 = vld [vmem:[%s11512_s1 + $0xe8c] ss:$16 sps:$4 sm:$0xff]  }
 0x235   :  { %5752 = vmatprep.subr.bf16.mxu1 %v8265_v26  ;;  %v8350_v26 = vld [vmem:[%s11512_s1 + $0xe88] ss:$16 sps:$4 sm:$0xff]   ;;  %v8355_v27 = vld [vmem:[%s11512_s1 + $0xd6c] ss:$16 sps:$4 sm:$0xff]  }
 0x237   :  { %5780 = vmatpush1.bf16.msra.mxu0 %v8266_v29  ;;  %v8353_v29 = vld [vmem:[%s11512_s1 + $0xd68] ss:$16 sps:$4 sm:$0xff]  }
 0x238   :  { %5753 = vmatpush2.bf16.msra.mxu1 %v8263_v28  ;;  %5781 = vmatprep.subr.bf16.mxu0 %v8274_v31  ;;  %v8358_v28 = vld [vmem:[%s11512_s1 + $0xe6c] ss:$16 sps:$4 sm:$0xff]  }
 0x239   :  { %5754 = vmatprep.subr.bf16.mxu1 %v8271_v30  ;;  %v8356_v30 = vld [vmem:[%s11512_s1 + $0xe68] ss:$16 sps:$4 sm:$0xff]   ;;  %v8361_v31 = vld [vmem:[%s11512_s1 + $0xd4c] ss:$16 sps:$4 sm:$0xff]  }
 0x23b   :  { %5782 = vmatpush1.bf16.msra.mxu0 %v8272_v33  ;;  %v8359_v33 = vld [vmem:[%s11512_s1 + $0xd48] ss:$16 sps:$4 sm:$0xff]  }
 0x23c   :  { %5755 = vmatpush2.bf16.msra.mxu1 %v8269_v32  ;;  %5783 = vmatprep.subr.bf16.mxu0 %v8280_v35  ;;  %v8364_v32 = vld [vmem:[%s11512_s1 + $0xe4c] ss:$16 sps:$4 sm:$0xff]  }
 0x23d   :  { %5756 = vmatprep.subr.bf16.mxu1 %v8277_v34  ;;  %v8362_v34 = vld [vmem:[%s11512_s1 + $0xe48] ss:$16 sps:$4 sm:$0xff]   ;;  %v8367_v35 = vld [vmem:[%s11512_s1 + $0xd2c] ss:$16 sps:$4 sm:$0xff]  }
 0x23f   :  { %5784 = vmatpush1.bf16.msra.mxu0 %v8278_v38  ;;  %v8365_v38 = vld [vmem:[%s11512_s1 + $0xd28] ss:$16 sps:$4 sm:$0xff]  }
 0x240   :  { %5757 = vmatpush2.bf16.msra.mxu1 %v8275_v37  ;;  %5785 = vmatprep.subr.bf16.mxu0 %v8283_v39  ;;  %v8370_v37 = vld [vmem:[%s11512_s1 + $0xe2c] ss:$16 sps:$4 sm:$0xff]   ;;  %v8368_v39 = vld [vmem:[%s11512_s1 + $0xe28] ss:$16 sps:$4 sm:$0xff]  }
 0x241   :  { %5812 = vmatprep.subr.bf16.mxu1 %v8286_v40  ;;  %v8373_v40 = vld [vmem:[%s11512_s1 + $0xd0c] ss:$16 sps:$4 sm:$0xff]  }
 0x243   :  { %5759 = vmatmul.mubr.bf16.vlgmr.msra.gmra.mxu1 %v8659_v45  ;;  %5786 = vmatpush2.bf16.msra.mxu0 %v8281_v41  ;;  %v8376_v41 = vld [vmem:[%s11512_s1 + $0xe0c] ss:$16 sps:$4 sm:$0xff]  }
 0x244   :  { %5813 = vmatpush1.bf16.msra.mxu1 %v8284_v42  ;;  %5787 = vmatprep.subr.bf16.mxu0 %v8289_v43  ;;  %v8371_v42 = vld [vmem:[%s11512_s1 + $0xd08] ss:$16 sps:$4 sm:$0xff]   ;;  %v8382_v45 = vld [vmem:[%s11512_s1 + $0x10ec] ss:$16 sps:$4 sm:$0xff]  }
 0x245   :  { %5814 = vmatprep.subr.bf16.mxu1 %v8292_v44  ;;  %5844 = vmatprep.mubr.bf16.mxu1 %v8660_v50  ;;  %v8374_v43 = vld [vmem:[%s11512_s1 + $0xe08] ss:$16 sps:$4 sm:$0xff]   ;;  %v8379_v44 = vld [vmem:[%s11512_s1 + $0xfec] ss:$16 sps:$4 sm:$0xff]   ;;  %v8663_v50 = vld [vmem:[%s11513_s0 + $0x30] ss:$100 sps:$4 sm:$0xff]  }
 0x247   :  { %5788 = vmatpush2.bf16.msra.mxu0 %v8287_v46  ;;  %v8377_v46 = vld [vmem:[%s11512_s1 + $0xfe8] ss:$16 sps:$4 sm:$0xff]  }
 0x248   :  { %5815 = vmatpush1.bf16.msra.mxu1 %v8290_v47  ;;  %5789 = vmatprep.subr.bf16.mxu0 %v8295_v48  ;;  %v8380_v47 = vld [vmem:[%s11512_s1 + $0x10e8] ss:$16 sps:$4 sm:$0xff]   ;;  %v8385_v48 = vld [vmem:[%s11512_s1 + $0xfcc] ss:$16 sps:$4 sm:$0xff]  }
 0x249   :  { %5816 = vmatprep.subr.bf16.mxu1 %v8298_v49  ;;  %v8388_v49 = vld [vmem:[%s11512_s1 + $0x10cc] ss:$16 sps:$4 sm:$0xff]  }
 0x24b   :  { %5790 = vmatpush2.bf16.msra.mxu0 %v8293_v51  ;;  %v8383_v51 = vld [vmem:[%s11512_s1 + $0xfc8] ss:$16 sps:$4 sm:$0xff]  }
 0x24c   :  { %5817 = vmatpush1.bf16.msra.mxu1 %v8296_v52  ;;  %5791 = vmatprep.subr.bf16.mxu0 %v8301_v53  ;;  %v8386_v52 = vld [vmem:[%s11512_s1 + $0x10c8] ss:$16 sps:$4 sm:$0xff]   ;;  %v8391_v53 = vld [vmem:[%s11512_s1 + $0xfac] ss:$16 sps:$4 sm:$0xff]  }
 0x24d   :  { %5818 = vmatprep.subr.bf16.mxu1 %v8304_v54  ;;  %v8394_v54 = vld [vmem:[%s11512_s1 + $0x10ac] ss:$16 sps:$4 sm:$0xff]  }
 0x24f   :  { %5792 = vmatpush2.bf16.msra.mxu0 %v8299_v55  ;;  %v8664_v55 = vld [vmem:[%s11513_s0 + $0x44] ss:$100 sps:$4 sm:$0xff]  }
 0x250   :  { %5819 = vmatpush1.bf16.msra.mxu1 %v8302_v56  ;;  %5793 = vmatprep.subr.bf16.mxu0 %v8307_v57  ;;  %v8389_v56 = vld [vmem:[%s11512_s1 + $0xfa8] ss:$16 sps:$4 sm:$0xff]  }
 0x251   :  { %5820 = vmatprep.subr.bf16.mxu1 %v8310_v58  ;;  %v8392_v57 = vld [vmem:[%s11512_s1 + $0x10a8] ss:$16 sps:$4 sm:$0xff]   ;;  %v8397_v58 = vld [vmem:[%s11512_s1 + $0xf8c] ss:$16 sps:$4 sm:$0xff]  }
 0x253   :  { %5794 = vmatpush2.bf16.msra.mxu0 %v8305_v59  ;;  %v8400_v59 = vld [vmem:[%s11512_s1 + $0x108c] ss:$16 sps:$4 sm:$0xff]  }
 0x254   :  { %5821 = vmatpush1.bf16.msra.mxu1 %v8308_v60  ;;  %5795 = vmatprep.subr.bf16.mxu0 %v8313_v61  ;;  %v8395_v60 = vld [vmem:[%s11512_s1 + $0xf88] ss:$16 sps:$4 sm:$0xff]  }
 0x255   :  { %5822 = vmatprep.subr.bf16.mxu1 %v8316_v62  ;;  %v8398_v61 = vld [vmem:[%s11512_s1 + $0x1088] ss:$16 sps:$4 sm:$0xff]   ;;  %v8403_v62 = vld [vmem:[%s11512_s1 + $0xf6c] ss:$16 sps:$4 sm:$0xff]  }
 0x257   :  { %5796 = vmatpush2.bf16.msra.mxu0 %v8311_v63  ;;  %v8406_v63 = vld [vmem:[%s11512_s1 + $0x106c] ss:$16 sps:$4 sm:$0xff]  }
 0x258   :  { %5823 = vmatpush1.bf16.msra.mxu1 %v8314_v0  ;;  %5797 = vmatprep.subr.bf16.mxu0 %v8319_v1  ;;  %v8401_v0 = vld [vmem:[%s11512_s1 + $0xf68] ss:$16 sps:$4 sm:$0xff]  }
 0x259   :  { %5824 = vmatprep.subr.bf16.mxu1 %v8322_v2  ;;  %v8404_v1 = vld [vmem:[%s11512_s1 + $0x1068] ss:$16 sps:$4 sm:$0xff]   ;;  %v8409_v2 = vld [vmem:[%s11512_s1 + $0xf4c] ss:$16 sps:$4 sm:$0xff]  }
 0x25b   :  { %5798 = vmatpush2.bf16.msra.mxu0 %v8317_v3  ;;  %v8412_v3 = vld [vmem:[%s11512_s1 + $0x104c] ss:$16 sps:$4 sm:$0xff]  }
 0x25c   :  { %5825 = vmatpush1.bf16.msra.mxu1 %v8320_v4  ;;  %5799 = vmatprep.subr.bf16.mxu0 %v8325_v5  ;;  %v8407_v4 = vld [vmem:[%s11512_s1 + $0xf48] ss:$16 sps:$4 sm:$0xff]  }
 0x25d   :  { %5826 = vmatprep.subr.bf16.mxu1 %v8328_v6  ;;  %v8410_v5 = vld [vmem:[%s11512_s1 + $0x1048] ss:$16 sps:$4 sm:$0xff]   ;;  %v8415_v6 = vld [vmem:[%s11512_s1 + $0xf2c] ss:$16 sps:$4 sm:$0xff]  }
 0x25f   :  { %5800 = vmatpush2.bf16.msra.mxu0 %v8323_v7  ;;  %v8418_v7 = vld [vmem:[%s11512_s1 + $0x102c] ss:$16 sps:$4 sm:$0xff]  }
 0x260   :  { %5827 = vmatpush1.bf16.msra.mxu1 %v8326_v8  ;;  %5855 = vmatprep.subr.bf16.mxu0 %v8334_v10  ;;  %v8413_v8 = vld [vmem:[%s11512_s1 + $0xf28] ss:$16 sps:$4 sm:$0xff]   ;;  %v8421_v10 = vld [vmem:[%s11512_s1 + $0xf0c] ss:$16 sps:$4 sm:$0xff]  }
 0x261   :  { %5828 = vmatprep.subr.bf16.mxu1 %v8331_v9  ;;  %v8416_v9 = vld [vmem:[%s11512_s1 + $0x1028] ss:$16 sps:$4 sm:$0xff]  }
 0x262   :  { %5802 = vmatmul.mubr.bf16.vlgmr.msra.gmra.mxu0 %v8661_v15  ;;  %v8430_v15 = vld [vmem:[%s11512_s1 + $0x12ec] ss:$16 sps:$4 sm:$0xff]  }
 0x263   :  { %5856 = vmatpush1.bf16.msra.mxu0 %v8332_v12  ;;  %5887 = vmatprep.mubr.bf16.mxu0 %v8662_v20  ;;  %v8419_v12 = vld [vmem:[%s11512_s1 + $0xf08] ss:$16 sps:$4 sm:$0xff]  }
 0x264   :  { %5829 = vmatpush2.bf16.msra.mxu1 %v8329_v11  ;;  %5857 = vmatprep.subr.bf16.mxu0 %v8340_v14  ;;  %v8424_v11 = vld [vmem:[%s11512_s1 + $0x100c] ss:$16 sps:$4 sm:$0xff]   ;;  %v8431_v20 = vld [vmem:[%s11512_s1 + $0x11c8] ss:$16 sps:$4 sm:$0xff]  }
 0x265   :  { %5830 = vmatprep.subr.bf16.mxu1 %v8337_v13  ;;  %v8422_v13 = vld [vmem:[%s11512_s1 + $0x1008] ss:$16 sps:$4 sm:$0xff]   ;;  %v8427_v14 = vld [vmem:[%s11512_s1 + $0x11ec] ss:$16 sps:$4 sm:$0xff]  }
 0x267   :  { %5858 = vmatpush1.bf16.msra.mxu0 %v8338_v17  ;;  %v8428_v17 = vld [vmem:[%s11512_s1 + $0x12e8] ss:$16 sps:$4 sm:$0xff]  }
 0x268   :  { %5831 = vmatpush2.bf16.msra.mxu1 %v8335_v16  ;;  %5859 = vmatprep.subr.bf16.mxu0 %v8346_v19  ;;  %v8425_v16 = vld [vmem:[%s11512_s1 + $0x11e8] ss:$16 sps:$4 sm:$0xff]   ;;  %v8436_v19 = vld [vmem:[%s11512_s1 + $0x12cc] ss:$16 sps:$4 sm:$0xff]  }
 0x269   :  { %5832 = vmatprep.subr.bf16.mxu1 %v8343_v18  ;;  %v8433_v18 = vld [vmem:[%s11512_s1 + $0x11cc] ss:$16 sps:$4 sm:$0xff]  }
 0x26b   :  { %5860 = vmatpush1.bf16.msra.mxu0 %v8344_v22  ;;  %v8665_v22 = vld [vmem:[%s11513_s0 + $0x38] ss:$100 sps:$4 sm:$0xff]  }
 0x26c   :  { %5833 = vmatpush2.bf16.msra.mxu1 %v8341_v21  ;;  %5861 = vmatprep.subr.bf16.mxu0 %v8352_v24  ;;  %v8434_v21 = vld [vmem:[%s11512_s1 + $0x12c8] ss:$16 sps:$4 sm:$0xff]   ;;  %v8442_v24 = vld [vmem:[%s11512_s1 + $0x12ac] ss:$16 sps:$4 sm:$0xff]  }
 0x26d   :  { %5834 = vmatprep.subr.bf16.mxu1 %v8349_v23  ;;  %v8439_v23 = vld [vmem:[%s11512_s1 + $0x11ac] ss:$16 sps:$4 sm:$0xff]  }
 0x26f   :  { %5862 = vmatpush1.bf16.msra.mxu0 %v8350_v26  ;;  %v8440_v26 = vld [vmem:[%s11512_s1 + $0x12a8] ss:$16 sps:$4 sm:$0xff]  }
 0x270   :  { %5835 = vmatpush2.bf16.msra.mxu1 %v8347_v25  ;;  %5863 = vmatprep.subr.bf16.mxu0 %v8358_v28  ;;  %v8437_v25 = vld [vmem:[%s11512_s1 + $0x11a8] ss:$16 sps:$4 sm:$0xff]   ;;  %v8445_v28 = vld [vmem:[%s11512_s1 + $0x118c] ss:$16 sps:$4 sm:$0xff]  }
 0x271   :  { %5836 = vmatprep.subr.bf16.mxu1 %v8355_v27  ;;  %v8666_v27 = vld [vmem:[%s11513_s0 + $0x4c] ss:$100 sps:$4 sm:$0xff]  }
 0x273   :  { %5864 = vmatpush1.bf16.msra.mxu0 %v8356_v30  ;;  %v8443_v30 = vld [vmem:[%s11512_s1 + $0x1188] ss:$16 sps:$4 sm:$0xff]  }
 0x274   :  { %5837 = vmatpush2.bf16.msra.mxu1 %v8353_v29  ;;  %5865 = vmatprep.subr.bf16.mxu0 %v8364_v32  ;;  %v8448_v29 = vld [vmem:[%s11512_s1 + $0x128c] ss:$16 sps:$4 sm:$0xff]  }
 0x275   :  { %5838 = vmatprep.subr.bf16.mxu1 %v8361_v31  ;;  %v8446_v31 = vld [vmem:[%s11512_s1 + $0x1288] ss:$16 sps:$4 sm:$0xff]   ;;  %v8451_v32 = vld [vmem:[%s11512_s1 + $0x116c] ss:$16 sps:$4 sm:$0xff]  }
 0x277   :  { %5866 = vmatpush1.bf16.msra.mxu0 %v8362_v34  ;;  %v8449_v34 = vld [vmem:[%s11512_s1 + $0x1168] ss:$16 sps:$4 sm:$0xff]  }
 0x278   :  { %5839 = vmatpush2.bf16.msra.mxu1 %v8359_v33  ;;  %5867 = vmatprep.subr.bf16.mxu0 %v8370_v37  ;;  %v8454_v33 = vld [vmem:[%s11512_s1 + $0x126c] ss:$16 sps:$4 sm:$0xff]  }
 0x279   :  { %5840 = vmatprep.subr.bf16.mxu1 %v8367_v35  ;;  %v8452_v35 = vld [vmem:[%s11512_s1 + $0x1268] ss:$16 sps:$4 sm:$0xff]   ;;  %v8457_v37 = vld [vmem:[%s11512_s1 + $0x114c] ss:$16 sps:$4 sm:$0xff]  }
 0x27b   :  { %5868 = vmatpush1.bf16.msra.mxu0 %v8368_v39  ;;  %v8455_v39 = vld [vmem:[%s11512_s1 + $0x1148] ss:$16 sps:$4 sm:$0xff]  }
 0x27c   :  { %5841 = vmatpush2.bf16.msra.mxu1 %v8365_v38  ;;  %5869 = vmatprep.subr.bf16.mxu0 %v8376_v41  ;;  %v8460_v38 = vld [vmem:[%s11512_s1 + $0x124c] ss:$16 sps:$4 sm:$0xff]  }
 0x27d   :  { %5842 = vmatprep.subr.bf16.mxu1 %v8373_v40  ;;  %v8458_v40 = vld [vmem:[%s11512_s1 + $0x1248] ss:$16 sps:$4 sm:$0xff]   ;;  %v8463_v41 = vld [vmem:[%s11512_s1 + $0x112c] ss:$16 sps:$4 sm:$0xff]  }
 0x27f   :  { %5870 = vmatpush1.bf16.msra.mxu0 %v8374_v43  ;;  %v8461_v43 = vld [vmem:[%s11512_s1 + $0x1128] ss:$16 sps:$4 sm:$0xff]  }
 0x280   :  { %5843 = vmatpush2.bf16.msra.mxu1 %v8371_v42  ;;  %5871 = vmatprep.subr.bf16.mxu0 %v8379_v44  ;;  %v8466_v42 = vld [vmem:[%s11512_s1 + $0x122c] ss:$16 sps:$4 sm:$0xff]   ;;  %v8464_v44 = vld [vmem:[%s11512_s1 + $0x1228] ss:$16 sps:$4 sm:$0xff]  }
 0x281   :  { %5898 = vmatprep.subr.bf16.mxu1 %v8382_v45  ;;  %v10935_v45 = vpop.f32.mrf.mxu0 }
 0x283   :  { %5845 = vmatmul.mubr.bf16.vlgmr.msra.gmra.mxu1 %v8663_v50  ;;  %5872 = vmatpush2.bf16.msra.mxu0 %v8377_v46  ;;  %v8469_v46 = vld [vmem:[%s11512_s1 + $0x110c] ss:$16 sps:$4 sm:$0xff]   ;;  %v8470_v50 = vld [vmem:[%s11512_s1 + $0x1208] ss:$16 sps:$4 sm:$0xff]  }
 0x284   :  { %5899 = vmatpush1.bf16.msra.mxu1 %v8380_v47  ;;  %5873 = vmatprep.subr.bf16.mxu0 %v8385_v48  ;;  %v8472_v47 = vld [vmem:[%s11512_s1 + $0x120c] ss:$16 sps:$4 sm:$0xff]   ;;  %v10943_v48 = vpop.f32.mrf.mxu0 }
 0x285   :  { %5900 = vmatprep.subr.bf16.mxu1 %v8388_v49  ;;  %5930 = vmatprep.mubr.bf16.mxu1 %v8664_v55  ;;  %v8467_v49 = vld [vmem:[%s11512_s1 + $0x1108] ss:$16 sps:$4 sm:$0xff]  }
 0x286   :  { %v8476_v55 = vld [vmem:[%s11512_s1 + $0x14e8] ss:$16 sps:$4 sm:$0xff]  }
 0x287   :  { %5874 = vmatpush2.bf16.msra.mxu0 %v8383_v51  ;;  %v8475_v51 = vld [vmem:[%s11512_s1 + $0x13ec] ss:$16 sps:$4 sm:$0xff]  }
 0x288   :  { %5901 = vmatpush1.bf16.msra.mxu1 %v8386_v52  ;;  %5875 = vmatprep.subr.bf16.mxu0 %v8391_v53  ;;  %v8478_v52 = vld [vmem:[%s11512_s1 + $0x14ec] ss:$16 sps:$4 sm:$0xff]   ;;  %v10957_v53 = vpop.f32.mrf.mxu0 }
 0x289   :  { %5902 = vmatprep.subr.bf16.mxu1 %v8394_v54  ;;  %v8473_v54 = vld [vmem:[%s11512_s1 + $0x13e8] ss:$16 sps:$4 sm:$0xff]  }
 0x28b   :  { %5876 = vmatpush2.bf16.msra.mxu0 %v8389_v56  ;;  %v8481_v56 = vld [vmem:[%s11512_s1 + $0x13cc] ss:$16 sps:$4 sm:$0xff]  }
 0x28c   :  { %5903 = vmatpush1.bf16.msra.mxu1 %v8392_v57  ;;  %5877 = vmatprep.subr.bf16.mxu0 %v8397_v58  ;;  %v8484_v57 = vld [vmem:[%s11512_s1 + $0x14cc] ss:$16 sps:$4 sm:$0xff]   ;;  %v10971_v58 = vpop.f32.mrf.mxu0 }
 0x28d   :  { %5904 = vmatprep.subr.bf16.mxu1 %v8400_v59  ;;  %v8667_v59 = vld [vmem:[%s11513_s0 + $0x40] ss:$100 sps:$4 sm:$0xff]  }
 0x28f   :  { %5878 = vmatpush2.bf16.msra.mxu0 %v8395_v60  ;;  %v8479_v60 = vld [vmem:[%s11512_s1 + $0x13c8] ss:$16 sps:$4 sm:$0xff]  }
 0x290   :  { %5905 = vmatpush1.bf16.msra.mxu1 %v8398_v61  ;;  %5879 = vmatprep.subr.bf16.mxu0 %v8403_v62  ;;  %v8482_v61 = vld [vmem:[%s11512_s1 + $0x14c8] ss:$16 sps:$4 sm:$0xff]   ;;  %v10982_v62 = vpop.f32.mrf.mxu1 }
 0x291   :  { %5906 = vmatprep.subr.bf16.mxu1 %v8406_v63  ;;  %v10984_v63 = vpop.f32.mrf.mxu0 }
 0x293   :  { %5880 = vmatpush2.bf16.msra.mxu0 %v8401_v0  ;;  %v8487_v0 = vld [vmem:[%s11512_s1 + $0x13ac] ss:$16 sps:$4 sm:$0xff]  }
 0x294   :  { %5907 = vmatpush1.bf16.msra.mxu1 %v8404_v1  ;;  %5881 = vmatprep.subr.bf16.mxu0 %v8409_v2  ;;  %v8490_v1 = vld [vmem:[%s11512_s1 + $0x14ac] ss:$16 sps:$4 sm:$0xff]   ;;  %v8668_v2 = vld [vmem:[%s11513_s0 + $0x54] ss:$100 sps:$4 sm:$0xff]  }
 0x295   :  { %5908 = vmatprep.subr.bf16.mxu1 %v8412_v3  ;;  %v8485_v3 = vld [vmem:[%s11512_s1 + $0x13a8] ss:$16 sps:$4 sm:$0xff]  }
 0x297   :  { %5882 = vmatpush2.bf16.msra.mxu0 %v8407_v4  ;;  %v8488_v4 = vld [vmem:[%s11512_s1 + $0x14a8] ss:$16 sps:$4 sm:$0xff]  }
 0x298   :  { %5909 = vmatpush1.bf16.msra.mxu1 %v8410_v5  ;;  %5883 = vmatprep.subr.bf16.mxu0 %v8415_v6  ;;  %v11001_v5 = vpop.f32.mrf.mxu1  ;;  %v11003_v6 = vpop.f32.mrf.mxu0 }
 0x299   :  { %5910 = vmatprep.subr.bf16.mxu1 %v8418_v7  ;;  %v8493_v7 = vld [vmem:[%s11512_s1 + $0x138c] ss:$16 sps:$4 sm:$0xff]  }
 0x29b   :  { %5884 = vmatpush2.bf16.msra.mxu0 %v8413_v8  ;;  %v8496_v8 = vld [vmem:[%s11512_s1 + $0x148c] ss:$16 sps:$4 sm:$0xff]  }
 0x29c   :  { %5911 = vmatpush1.bf16.msra.mxu1 %v8416_v9  ;;  %5885 = vmatprep.subr.bf16.mxu0 %v8421_v10  ;;  %v8491_v9 = vld [vmem:[%s11512_s1 + $0x1388] ss:$16 sps:$4 sm:$0xff]  }
 0x29d   :  { %5912 = vmatprep.subr.bf16.mxu1 %v8424_v11  ;;  %v8494_v10 = vld [vmem:[%s11512_s1 + $0x1488] ss:$16 sps:$4 sm:$0xff]   ;;  %v11017_v11 = vpop.f32.mrf.mxu1 }
 0x29f   :  { %5886 = vmatpush2.bf16.msra.mxu0 %v8419_v12  ;;  %v11019_v12 = vpop.f32.mrf.mxu0 }
 0x2a0   :  { %5913 = vmatpush1.bf16.msra.mxu1 %v8422_v13  ;;  %5941 = vmatprep.subr.bf16.mxu0 %v8430_v15  ;;  %v8499_v13 = vld [vmem:[%s11512_s1 + $0x136c] ss:$16 sps:$4 sm:$0xff]   ;;  %v8497_v15 = vld [vmem:[%s11512_s1 + $0x1368] ss:$16 sps:$4 sm:$0xff]  }
 0x2a1   :  { %5914 = vmatprep.subr.bf16.mxu1 %v8427_v14  ;;  %v8502_v14 = vld [vmem:[%s11512_s1 + $0x146c] ss:$16 sps:$4 sm:$0xff]  }
 0x2a2   :  { %5888 = vmatmul.mubr.bf16.vlgmr.msra.gmra.mxu0 %v8665_v22 }
 0x2a3   :  { %5942 = vmatpush1.bf16.msra.mxu0 %v8428_v17  ;;  %5973 = vmatprep.mubr.bf16.mxu0 %v8666_v27  ;;  %v11033_v17 = vpop.f32.mrf.mxu1 }
 0x2a4   :  { %5915 = vmatpush2.bf16.msra.mxu1 %v8425_v16  ;;  %5943 = vmatprep.subr.bf16.mxu0 %v8436_v19  ;;  %v8500_v16 = vld [vmem:[%s11512_s1 + $0x1468] ss:$16 sps:$4 sm:$0xff]   ;;  %v8505_v19 = vld [vmem:[%s11512_s1 + $0x134c] ss:$16 sps:$4 sm:$0xff]  }
 0x2a5   :  { %5916 = vmatprep.subr.bf16.mxu1 %v8433_v18  ;;  %v11035_v18 = vpop.f32.mrf.mxu0 }
 0x2a7   :  { %5944 = vmatpush1.bf16.msra.mxu0 %v8434_v21  ;;  %v11043_v21 = vpop.f32.mrf.mxu1  ;;  %v11045_v22 = vpop.f32.mrf.mxu0 }
 0x2a8   :  { %5917 = vmatpush2.bf16.msra.mxu1 %v8431_v20  ;;  %5945 = vmatprep.subr.bf16.mxu0 %v8442_v24  ;;  %v8508_v20 = vld [vmem:[%s11512_s1 + $0x144c] ss:$16 sps:$4 sm:$0xff]   ;;  %v8506_v24 = vld [vmem:[%s11512_s1 + $0x1448] ss:$16 sps:$4 sm:$0xff]  }
 0x2a9   :  { %5918 = vmatprep.subr.bf16.mxu1 %v8439_v23  ;;  %v8503_v23 = vld [vmem:[%s11512_s1 + $0x1348] ss:$16 sps:$4 sm:$0xff]   ;;  %v11059_v27 = vpop.f32.mrf.mxu1 }
 0x2ab   :  { %5946 = vmatpush1.bf16.msra.mxu0 %v8440_v26  ;;  %v8514_v26 = vld [vmem:[%s11512_s1 + $0x142c] ss:$16 sps:$4 sm:$0xff]  }
 0x2ac   :  { %5919 = vmatpush2.bf16.msra.mxu1 %v8437_v25  ;;  %5947 = vmatprep.subr.bf16.mxu0 %v8448_v29  ;;  %v8511_v25 = vld [vmem:[%s11512_s1 + $0x132c] ss:$16 sps:$4 sm:$0xff]   ;;  %v8509_v29 = vld [vmem:[%s11512_s1 + $0x1328] ss:$16 sps:$4 sm:$0xff]  }
 0x2ad   :  { %5920 = vmatprep.subr.bf16.mxu1 %v8445_v28  ;;  %v11061_v28 = vpop.f32.mrf.mxu0 }
 0x2af   :  { %5948 = vmatpush1.bf16.msra.mxu0 %v8446_v31  ;;  %v8517_v31 = vld [vmem:[%s11512_s1 + $0x130c] ss:$16 sps:$4 sm:$0xff]  }
 0x2b0   :  { %5921 = vmatpush2.bf16.msra.mxu1 %v8443_v30  ;;  %5949 = vmatprep.subr.bf16.mxu0 %v8454_v33  ;;  %v8512_v30 = vld [vmem:[%s11512_s1 + $0x1428] ss:$16 sps:$4 sm:$0xff]   ;;  %v11075_v33 = vpop.f32.mrf.mxu1 }
 0x2b1   :  { %5922 = vmatprep.subr.bf16.mxu1 %v8451_v32  ;;  %v8520_v32 = vld [vmem:[%s11512_s1 + $0x140c] ss:$16 sps:$4 sm:$0xff]  }
 0x2b3   :  { %5950 = vmatpush1.bf16.msra.mxu0 %v8452_v35  ;;  %v8515_v35 = vld [vmem:[%s11512_s1 + $0x1308] ss:$16 sps:$4 sm:$0xff]  }
 0x2b4   :  { %5923 = vmatpush2.bf16.msra.mxu1 %v8449_v34  ;;  %5951 = vmatprep.subr.bf16.mxu0 %v8460_v38  ;;  %v11077_v34 = vpop.f32.mrf.mxu0  ;;  %v8523_v38 = vld [vmem:[%s11512_s1 + $0x15ec] ss:$16 sps:$4 sm:$0xff]  }
 0x2b5   :  { %5924 = vmatprep.subr.bf16.mxu1 %v8457_v37  ;;  %v8518_v37 = vld [vmem:[%s11512_s1 + $0x1408] ss:$16 sps:$4 sm:$0xff]  }
 0x2b7   :  { %5952 = vmatpush1.bf16.msra.mxu0 %v8458_v40  ;;  %v11091_v40 = vpop.f32.mrf.mxu1 }
 0x2b8   :  { %5925 = vmatpush2.bf16.msra.mxu1 %v8455_v39  ;;  %5953 = vmatprep.subr.bf16.mxu0 %v8466_v42  ;;  %v8526_v39 = vld [vmem:[%s11512_s1 + $0x16ec] ss:$16 sps:$4 sm:$0xff]   ;;  %v8521_v42 = vld [vmem:[%s11512_s1 + $0x15e8] ss:$16 sps:$4 sm:$0xff]  }
 0x2b9   :  { %5926 = vmatprep.subr.bf16.mxu1 %v8463_v41  ;;  %v11093_v41 = vpop.f32.mrf.mxu0 }
 0x2bb   :  { %5954 = vmatpush1.bf16.msra.mxu0 %v8464_v44  ;;  %v11101_v44 = vpop.f32.mrf.mxu1 }
 0x2bc   :  { %5927 = vmatpush2.bf16.msra.mxu1 %v8461_v43  ;;  %5955 = vmatprep.subr.bf16.mxu0 %v8472_v47  ;;  %v8524_v43 = vld [vmem:[%s11512_s1 + $0x16e8] ss:$16 sps:$4 sm:$0xff]   ;;  %v8529_v47 = vld [vmem:[%s11512_s1 + $0x15cc] ss:$16 sps:$4 sm:$0xff]  }
 0x2bd   :  { %5928 = vmatprep.subr.bf16.mxu1 %v8469_v46  ;;  %v11103_v46 = vpop.f32.mrf.mxu0 }
 0x2bf   :  { %5956 = vmatpush1.bf16.msra.mxu0 %v8470_v50  ;;  %v8669_v50 = vld [vmem:[%s11513_s0 + $0x48] ss:$100 sps:$4 sm:$0xff]  }
 0x2c0   :  { %5929 = vmatpush2.bf16.msra.mxu1 %v8467_v49  ;;  %5957 = vmatprep.subr.bf16.mxu0 %v8475_v51  ;;  %v8532_v49 = vld [vmem:[%s11512_s1 + $0x16cc] ss:$16 sps:$4 sm:$0xff]   ;;  %v8527_v51 = vld [vmem:[%s11512_s1 + $0x15c8] ss:$16 sps:$4 sm:$0xff]  }
 0x2c1   :  { %5984 = vmatprep.subr.bf16.mxu1 %v8478_v52  ;;  %v8530_v52 = vld [vmem:[%s11512_s1 + $0x16c8] ss:$16 sps:$4 sm:$0xff]  }
 0x2c3   :  { %5931 = vmatmul.mubr.bf16.vlgmr.msra.gmra.mxu1 %v8667_v59  ;;  %5958 = vmatpush2.bf16.msra.mxu0 %v8473_v54  ;;  %v11120_v54 = vpop.f32.mrf.mxu1  ;;  %v8670_v59 = vld [vmem:[%s11513_s0 + $0x5c] ss:$100 sps:$4 sm:$0xff]  }
 0x2c4   :  { %5985 = vmatpush1.bf16.msra.mxu1 %v8476_v55  ;;  %5959 = vmatprep.subr.bf16.mxu0 %v8481_v56  ;;  %v11122_v55 = vpop.f32.mrf.mxu0  ;;  %v8535_v56 = vld [vmem:[%s11512_s1 + $0x15ac] ss:$16 sps:$4 sm:$0xff]  }
 0x2c5   :  { %5986 = vmatprep.subr.bf16.mxu1 %v8484_v57  ;;  %6016 = vmatprep.mubr.bf16.mxu1 %v8668_v2  ;;  %v8538_v57 = vld [vmem:[%s11512_s1 + $0x16ac] ss:$16 sps:$4 sm:$0xff]  }
 0x2c6   :  { %v11141_v2 = vpop.f32.mrf.mxu0 }
 0x2c7   :  { %5960 = vmatpush2.bf16.msra.mxu0 %v8479_v60  ;;  %v849_v60 = vlaneseq }
 0x2c8   :  { %5987 = vmatpush1.bf16.msra.mxu1 %v8482_v61  ;;  %5961 = vmatprep.subr.bf16.mxu0 %v8487_v0  ;;  %v8533_v61 = vld [vmem:[%s11512_s1 + $0x15a8] ss:$16 sps:$4 sm:$0xff]  }
 0x2c9   :  { %5988 = vmatprep.subr.bf16.mxu1 %v8490_v1  ;;  %v8536_v0 = vld [vmem:[%s11512_s1 + $0x16a8] ss:$16 sps:$4 sm:$0xff]   ;;  %v11139_v1 = vpop.f32.mrf.mxu1 }
 0x2cb   :  { %5962 = vmatpush2.bf16.msra.mxu0 %v8485_v3  ;;  %v8541_v3 = vld [vmem:[%s11512_s1 + $0x158c] ss:$16 sps:$4 sm:$0xff]  }
 0x2cc   :  { %5989 = vmatpush1.bf16.msra.mxu1 %v8488_v4  ;;  %5963 = vmatprep.subr.bf16.mxu0 %v8493_v7  ;;  %v8544_v4 = vld [vmem:[%s11512_s1 + $0x168c] ss:$16 sps:$4 sm:$0xff]   ;;  %v11149_v7 = vshrl.u32 %v849_v60, 7 }
 0x2cd   :  { %5990 = vmatprep.subr.bf16.mxu1 %v8496_v8  ;;  %v8539_v8 = vld [vmem:[%s11512_s1 + $0x1588] ss:$16 sps:$4 sm:$0xff]  }
 0x2cf   :  { %5964 = vmatpush2.bf16.msra.mxu0 %v8491_v9  ;;  %v8542_v9 = vld [vmem:[%s11512_s1 + $0x1688] ss:$16 sps:$4 sm:$0xff]  }
 0x2d0   :  { %5991 = vmatpush1.bf16.msra.mxu1 %v8494_v10  ;;  %5965 = vmatprep.subr.bf16.mxu0 %v8499_v13  ;;  %v11157_v10 = vpop.f32.mrf.mxu1  ;;  %v11159_v13 = vpop.f32.mrf.mxu0 }
 0x2d1   :  { %5992 = vmatprep.subr.bf16.mxu1 %v8502_v14  ;;  %v8547_v14 = vld [vmem:[%s11512_s1 + $0x156c] ss:$16 sps:$4 sm:$0xff]  }
 0x2d3   :  { %5966 = vmatpush2.bf16.msra.mxu0 %v8497_v15  ;;  %v8550_v15 = vld [vmem:[%s11512_s1 + $0x166c] ss:$16 sps:$4 sm:$0xff]  }
 0x2d4   :  { %5993 = vmatpush1.bf16.msra.mxu1 %v8500_v16  ;;  %5967 = vmatprep.subr.bf16.mxu0 %v8505_v19  ;;  %v11167_v16 = vpop.f32.mrf.mxu1  ;;  %v11169_v19 = vpop.f32.mrf.mxu0 }
 0x2d5   :  { %5994 = vmatprep.subr.bf16.mxu1 %v8508_v20  ;;  %v855_v20 = vsub.s32 1, %v11149_v7 }
 0x2d7   :  { %5968 = vmatpush2.bf16.msra.mxu0 %v8503_v23  ;;  %v8545_v23 = vld [vmem:[%s11512_s1 + $0x1568] ss:$16 sps:$4 sm:$0xff]  }
 0x2d8   :  { %5995 = vmatpush1.bf16.msra.mxu1 %v8506_v24  ;;  %5969 = vmatprep.subr.bf16.mxu0 %v8511_v25  ;;  %v8548_v24 = vld [vmem:[%s11512_s1 + $0x1668] ss:$16 sps:$4 sm:$0xff]   ;;  %v11181_v25 = vld [vmem:[%s11515_s2] sm:$0xf] }
 0x2d9   :  { %5996 = vmatprep.subr.bf16.mxu1 %v8514_v26  ;;  %v8553_v26 = vld [vmem:[%s11512_s1 + $0x154c] ss:$16 sps:$4 sm:$0xff]  }
 0x2db   :  { %5970 = vmatpush2.bf16.msra.mxu0 %v8509_v29  ;;  %v8556_v29 = vld [vmem:[%s11512_s1 + $0x164c] ss:$16 sps:$4 sm:$0xff]  }
 0x2dc   :  { %5997 = vmatpush1.bf16.msra.mxu1 %v8512_v30  ;;  %5971 = vmatprep.subr.bf16.mxu0 %v8517_v31  ;;  %v11189_v30 = vpop.f32.mrf.mxu1  ;;  %v11191_v31 = vpop.f32.mrf.mxu0 }
 0x2dd   :  { %5998 = vmatprep.subr.bf16.mxu1 %v8520_v32  ;;  %v856_v32 = vrot.slane %v11181_v25, %v855_v20 }
 0x2df   :  { %5972 = vmatpush2.bf16.msra.mxu0 %v8515_v35  ;;  %v8551_v35 = vld [vmem:[%s11512_s1 + $0x1548] ss:$16 sps:$4 sm:$0xff]  }
 0x2e0   :  { %5999 = vmatpush1.bf16.msra.mxu1 %v8518_v37  ;;  %6027 = vmatprep.subr.bf16.mxu0 %v8526_v39  ;;  %v8554_v37 = vld [vmem:[%s11512_s1 + $0x1648] ss:$16 sps:$4 sm:$0xff]   ;;  %v8562_v39 = vld [vmem:[%s11512_s1 + $0x162c] ss:$16 sps:$4 sm:$0xff]  }
 0x2e1   :  { %6000 = vmatprep.subr.bf16.mxu1 %v8523_v38  ;;  %v8559_v38 = vld [vmem:[%s11512_s1 + $0x152c] ss:$16 sps:$4 sm:$0xff]  }
 0x2e2   :  { %5974 = vmatmul.mubr.bf16.vlgmr.msra.gmra.mxu0 %v8669_v50  ;;  %v8557_v50 = vld [vmem:[%s11512_s1 + $0x1528] ss:$16 sps:$4 sm:$0xff]  }
 0x2e3   :  { %6028 = vmatpush1.bf16.msra.mxu0 %v8524_v43  ;;  %6059 = vmatprep.mubr.bf16.mxu0 %v8670_v59  ;;  %v11207_v43 = vpop.f32.mrf.mxu1 }
 0x2e4   :  { %6001 = vmatpush2.bf16.msra.mxu1 %v8521_v42  ;;  %6029 = vmatprep.subr.bf16.mxu0 %v8532_v49  ;;  %v5036_v42 = vadd.f32 %v10971_v58, %v856_v32  ;;  %v5032_v49 = vadd.f32 %v10943_v48, %v856_v32  ;;  %v8565_v58 = vld [vmem:[%s11512_s1 + $0x150c] ss:$16 sps:$4 sm:$0xff]   ;;  %v8575_v32 = vld [vmem:[%s11512_s1 + $0x17c8] ss:$16 sps:$4 sm:$0xff]  }
 0x2e5   :  { %6002 = vmatprep.subr.bf16.mxu1 %v8529_v47  ;;  %v11209_v47 = vpop.f32.mrf.mxu0  ;;  %v8568_v48 = vld [vmem:[%s11512_s1 + $0x160c] ss:$16 sps:$4 sm:$0xff]  }
 0x2e6   :  { %v5075_v59 = vadd.f32 %v11001_v5, %v5032_v49  ;;  %v8571_v5 = vld [vmem:[%s11512_s1 + $0x17ec] ss:$16 sps:$4 sm:$0xff]   ;;  %v8581_v49 = vld [vmem:[%s11512_s1 + $0x17a8] ss:$16 sps:$4 sm:$0xff]  }
 0x2e7   :  { %6030 = vmatpush1.bf16.msra.mxu0 %v8530_v52  ;;  %v5079_v52 = vadd.f32 %v11033_v17, %v5036_v42 }
 0x2e8   :  { %6003 = vmatpush2.bf16.msra.mxu1 %v8527_v51  ;;  %6031 = vmatprep.subr.bf16.mxu0 %v8538_v57  ;;  %v8560_v51 = vld [vmem:[%s11512_s1 + $0x1628] ss:$16 sps:$4 sm:$0xff]   ;;  %v11225_v57 = vpop.f32.mrf.mxu0 }
 0x2e9   :  { %6004 = vmatprep.subr.bf16.mxu1 %v8535_v56  ;;  %v5336_v56 = vpop.f32.mrf.mxu1  ;;  %v5122_v60 = vadd.f32 %v11035_v18, %v5079_v52  ;;  %v8574_v18 = vld [vmem:[%s11512_s1 + $0x18ec] ss:$16 sps:$4 sm:$0xff]  }
 0x2ea   :  { %v11237_v17 = vpop.f32.mrf.mxu0 }
 0x2eb   :  { %6032 = vmatpush1.bf16.msra.mxu0 %v8536_v0  ;;  %v8566_v0 = vld [vmem:[%s11512_s1 + $0x1608] ss:$16 sps:$4 sm:$0xff]  }
 0x2ec   :  { %6005 = vmatpush2.bf16.msra.mxu1 %v8533_v61  ;;  %6033 = vmatprep.subr.bf16.mxu0 %v8544_v4  ;;  %v8563_v61 = vld [vmem:[%s11512_s1 + $0x1508] ss:$16 sps:$4 sm:$0xff]   ;;  %v5118_v4 = vadd.f32 %v11003_v6, %v5075_v59  ;;  %v11255_v20 = vpop.f32.mrf.mxu0  ;;  %v8577_v6 = vld [vmem:[%s11512_s1 + $0x17cc] ss:$16 sps:$4 sm:$0xff]  }
 0x2ed   :  { %6006 = vmatprep.subr.bf16.mxu1 %v8541_v3  ;;  %v11235_v3 = vpop.f32.mrf.mxu1  ;;  %v8587_v59 = vld [vmem:[%s11512_s1 + $0x1788] ss:$16 sps:$4 sm:$0xff]  }
 0x2ef   :  { %6034 = vmatpush1.bf16.msra.mxu0 %v8542_v9  ;;  %v8569_v9 = vld [vmem:[%s11512_s1 + $0x17e8] ss:$16 sps:$4 sm:$0xff]  }
 0x2f0   :  { %6007 = vmatpush2.bf16.msra.mxu1 %v8539_v8  ;;  %6035 = vmatprep.subr.bf16.mxu0 %v8550_v15  ;;  %v5165_v8 = vadd.f32 %v11091_v40, %v5122_v60  ;;  %v11253_v15 = vpop.f32.mrf.mxu1  ;;  %v8580_v40 = vld [vmem:[%s11512_s1 + $0x18cc] ss:$16 sps:$4 sm:$0xff]   ;;  %v8590_v60 = vld [vmem:[%s11512_s1 + $0x1888] ss:$16 sps:$4 sm:$0xff]  }
 0x2f1   :  { %6008 = vmatprep.subr.bf16.mxu1 %v8547_v14  ;;  %v8572_v14 = vld [vmem:[%s11512_s1 + $0x18e8] ss:$16 sps:$4 sm:$0xff]  }
 0x2f3   :  { %6036 = vmatpush1.bf16.msra.mxu0 %v8548_v24  ;;  %v5208_v24 = vadd.f32 %v11093_v41, %v5165_v8  ;;  %v11277_v41 = vpop.f32.mrf.mxu0 }
 0x2f4   :  { %6009 = vmatpush2.bf16.msra.mxu1 %v8545_v23  ;;  %6037 = vmatprep.subr.bf16.mxu0 %v8556_v29  ;;  %v5161_v23 = vadd.f32 %v11059_v27, %v5118_v4  ;;  %v11275_v27 = vpop.f32.mrf.mxu1 }
 0x2f5   :  { %6010 = vmatprep.subr.bf16.mxu1 %v8553_v26  ;;  %v8671_v26 = vld [vmem:[%s11513_s0 + $0x50] ss:$100 sps:$4 sm:$0xff]  }
 0x2f6   :  { %v5204_v29 = vadd.f32 %v11061_v28, %v5161_v23  ;;  %v8583_v28 = vld [vmem:[%s11512_s1 + $0x17ac] ss:$16 sps:$4 sm:$0xff]  }
 0x2f7   :  { %6038 = vmatpush1.bf16.msra.mxu0 %v8554_v37  ;;  %v8586_v37 = vld [vmem:[%s11512_s1 + $0x18ac] ss:$16 sps:$4 sm:$0xff]  }
 0x2f8   :  { %6011 = vmatpush2.bf16.msra.mxu1 %v8551_v35  ;;  %6039 = vmatprep.subr.bf16.mxu0 %v8562_v39  ;;  %v8578_v35 = vld [vmem:[%s11512_s1 + $0x18c8] ss:$16 sps:$4 sm:$0xff]   ;;  %v5247_v39 = vadd.f32 %v11120_v54, %v5204_v29  ;;  %v8592_v54 = vld [vmem:[%s11512_s1 + $0x188c] ss:$16 sps:$4 sm:$0xff]  }
 0x2f9   :  { %6012 = vmatprep.subr.bf16.mxu1 %v8559_v38  ;;  %v5251_v38 = vadd.f32 %v11157_v10, %v5208_v24  ;;  %v8599_v29 = vld [vmem:[%s11512_s1 + $0x1748] ss:$16 sps:$4 sm:$0xff]  }
 0x2fa   :  { %v5290_v10 = vadd.f32 %v11122_v55, %v5247_v39  ;;  %v8595_v55 = vld [vmem:[%s11512_s1 + $0x176c] ss:$16 sps:$4 sm:$0xff]  }
 0x2fb   :  { %6040 = vmatpush1.bf16.msra.mxu0 %v8560_v51  ;;  %v5294_v42 = vadd.f32 %v11159_v13, %v5251_v38  ;;  %v5422_v51 = vpop.f32.mrf.mxu1 }
 0x2fc   :  { %6013 = vmatpush2.bf16.msra.mxu1 %v8557_v50  ;;  %6041 = vmatprep.subr.bf16.mxu0 %v8568_v48  ;;  %v8584_v50 = vld [vmem:[%s11512_s1 + $0x18a8] ss:$16 sps:$4 sm:$0xff]  }
 0x2fd   :  { %6014 = vmatprep.subr.bf16.mxu1 %v8565_v58  ;;  %v5465_v58 = vpop.f32.mrf.mxu0  ;;  %v11302_v13 = vpop.f32.mrf.mxu1  ;;  %v5337_v52 = vadd.f32 %v5336_v56, %v5294_v42  ;;  %v8598_v56 = vld [vmem:[%s11512_s1 + $0x186c] ss:$16 sps:$4 sm:$0xff]  }
 0x2ff   :  { %6042 = vmatpush1.bf16.msra.mxu0 %v8566_v0  ;;  %v11304_v48 = vpop.f32.mrf.mxu0  ;;  %v5380_v0 = vadd.f32 %v11225_v57, %v5337_v52 }
 0x300   :  { %6015 = vmatpush2.bf16.msra.mxu1 %v8563_v61  ;;  %6043 = vmatprep.subr.bf16.mxu0 %v8571_v5  ;;  %v5333_v61 = vadd.f32 %v11189_v30, %v5290_v10  ;;  %v851_v5 = vsub.s32 0, %v11149_v7  ;;  %v8601_v30 = vld [vmem:[%s11512_s1 + $0x174c] ss:$16 sps:$4 sm:$0xff]  }
 0x301   :  { %6070 = vmatprep.subr.bf16.mxu1 %v8574_v18  ;;  %v5504_v18 = vpop.f32.mrf.mxu1  ;;  %v5547_v4 = vpop.f32.mrf.mxu0  ;;  %v5423_v57 = vadd.f32 %v5422_v51, %v5380_v0 }
 0x302   :  { %v5376_v8 = vadd.f32 %v11191_v31, %v5333_v61  ;;  %v8604_v31 = vld [vmem:[%s11512_s1 + $0x184c] ss:$16 sps:$4 sm:$0xff]  }
 0x303   :  { %6017 = vmatmul.mubr.bf16.vlgmr.msra.gmra.mxu1 %v8671_v26  ;;  %6044 = vmatpush2.bf16.msra.mxu0 %v8569_v9  ;;  %v8593_v9 = vld [vmem:[%s11512_s1 + $0x1768] ss:$16 sps:$4 sm:$0xff]   ;;  %v11337_v23 = vpop.f32.mrf.mxu0  ;;  %v5466_v26 = vadd.f32 %v5465_v58, %v5423_v57 }
 0x304   :  { %6071 = vmatpush1.bf16.msra.mxu1 %v8572_v14  ;;  %6045 = vmatprep.subr.bf16.mxu0 %v8577_v6  ;;  %v8596_v14 = vld [vmem:[%s11512_s1 + $0x1868] ss:$16 sps:$4 sm:$0xff]   ;;  %v852_v6 = vrot.slane %v11181_v25, %v851_v5  ;;  %v5419_v24 = vadd.f32 %v11253_v15, %v5376_v8  ;;  %v8610_v15 = vld [vmem:[%s11512_s1 + $0x182c] ss:$16 sps:$4 sm:$0xff]   ;;  %v8619_v5 = vld [vmem:[%s11514_s3 + $0x70] sm:$0xff]  }
 0x305   :  { %6072 = vmatprep.subr.bf16.mxu1 %v8580_v40  ;;  %6102 = vmatprep.mubr.bf16.mxu1 %v8674_v36  ;;  %v8589_v36 = vld [vmem:[%s11512_s1 + $0x178c] ss:$16 sps:$4 sm:$0xff]   ;;  %v11335_v40 = vpop.f32.mrf.mxu1  ;;  %v5551_v42 = vpop.f32.mrf.mxu0  ;;  %v8673_v8 = vld [vmem:[%s11513_s0 + $0x60] ss:$100 sps:$4 sm:$0xff]  }
 0x306   :  { %v5030_v38 = vadd.f32 %v10935_v45, %v852_v6  ;;  %v8613_v45 = vld [vmem:[%s11512_s1 + $0x170c] ss:$16 sps:$4 sm:$0xff]  }
 0x307   :  { %6046 = vmatpush2.bf16.msra.mxu0 %v8575_v32  ;;  %v8602_v32 = vld [vmem:[%s11512_s1 + $0x1848] ss:$16 sps:$4 sm:$0xff]   ;;  %v5508_v39 = vpop.f32.mrf.mxu1 }
 0x308   :  { %6073 = vmatpush1.bf16.msra.mxu1 %v8578_v35  ;;  %6047 = vmatprep.subr.bf16.mxu0 %v8583_v28  ;;  %v5034_v35 = vadd.f32 %v10957_v53, %v852_v6  ;;  %v8607_v28 = vld [vmem:[%s11512_s1 + $0x172c] ss:$16 sps:$4 sm:$0xff]   ;;  %v8605_v53 = vld [vmem:[%s11512_s1 + $0x1728] ss:$16 sps:$4 sm:$0xff]  }
 0x309   :  { %6074 = vmatprep.subr.bf16.mxu1 %v8586_v37  ;;  %v5462_v37 = vadd.f32 %v11255_v20, %v5419_v24  ;;  %v8616_v20 = vld [vmem:[%s11512_s1 + $0x180c] ss:$16 sps:$4 sm:$0xff]  }
 0x30a   :  { %v5077_v51 = vadd.f32 %v11017_v11, %v5034_v35  ;;  %v8611_v11 = vld [vmem:[%s11512_s1 + $0x1708] ss:$16 sps:$4 sm:$0xff]  }
 0x30b   :  { %6048 = vmatpush2.bf16.msra.mxu0 %v8581_v49  ;;  %v5509_v49 = vadd.f32 %v5508_v39, %v5466_v26  ;;  %v5505_v58 = vadd.f32 %v5504_v18, %v5462_v37  ;;  %v8618_v61 = vld [vmem:[%s11514_s3 + $0x38] sm:$0xff]  }
 0x30c   :  { %6075 = vmatpush1.bf16.msra.mxu1 %v8584_v50  ;;  %6049 = vmatprep.subr.bf16.mxu0 %v8589_v36  ;;  %v8608_v50 = vld [vmem:[%s11512_s1 + $0x1828] ss:$16 sps:$4 sm:$0xff]   ;;  %v5120_v10 = vadd.f32 %v11019_v12, %v5077_v51  ;;  %v8640_v51 = vld [vmem:[%s11514_s3 + $0xa0] sm:$0xff]  }
 0x30d   :  { %6076 = vmatprep.subr.bf16.mxu1 %v8592_v54  ;;  %v5552_v36 = vadd.f32 %v5551_v42, %v5509_v49  ;;  %v5073_v54 = vadd.f32 %v10982_v62, %v5030_v38  ;;  %v5548_v52 = vadd.f32 %v5547_v4, %v5505_v58  ;;  %v8617_v62 = vld [vmem:[%s11514_s3 + $0x78] sm:$0xff]   ;;  %v8636_v42 = vld [vmem:[%s11514_s3 + $0xb0] sm:$0xff]   ;;  %v8637_v49 = vld [vmem:[%s11514_s3 + $0xe8] sm:$0xff]  }
 0x30e   :  { %v8643_v58 = vld [vmem:[%s11514_s3 + $0xd0] sm:$0xff]  }
 0x30f   :  { %6050 = vmatpush2.bf16.msra.mxu0 %v8587_v59  ;;  %v8614_v59 = vld [vmem:[%s11512_s1 + $0x1808] ss:$16 sps:$4 sm:$0xff]   ;;  %v6118_v12 = vmax.f32 %v5552_v36, 0.0  ;;  %v8644_v36 = vld [vmem:[%s11514_s3 + $0x90] sm:$0xff]  }
 0x310   :  { %6077 = vmatpush1.bf16.msra.mxu1 %v8590_v60  ;;  %6051 = vmatprep.subr.bf16.mxu0 %v8595_v55  ;;  %v5116_v60 = vadd.f32 %v10984_v63, %v5073_v54  ;;  %v5163_v55 = vadd.f32 %v11075_v33, %v5120_v10  ;;  %v8672_v33 = vld [vmem:[%s11513_s0 + $0x58] ss:$100 sps:$4 sm:$0xff]   ;;  %v8645_v54 = vld [vmem:[%s11514_s3 + $0xc8] sm:$0xff]  }
 0x311   :  { %6078 = vmatprep.subr.bf16.mxu1 %v8598_v56  ;;  %v6114_v56 = vmax.f32 %v5548_v52, 0.0  ;;  %v8646_v10 = vld [vmem:[%s11514_s3 + $0x88] sm:$0xff]   ;;  %v8647_v52 = vld [vmem:[%s11514_s3 + $0xc0] sm:$0xff]  }
 0x312   :  { %v5159_v0 = vadd.f32 %v11043_v21, %v5116_v60  ;;  %v5206_v63 = vadd.f32 %v11077_v34, %v5163_v55  ;;  %v8620_v21 = vld [vmem:[%s11514_s3 + $0x30] sm:$0xff]   ;;  %v5631_v55 = vpop.f32.mrf.mxu0 }
 0x313   :  { %6052 = vmatpush2.bf16.msra.mxu0 %v8593_v9  ;;  %v6122_v18 = vpack.c.bf16 %v6118_v12, %v6114_v56 }
 0x314   :  { %6079 = vmatpush1.bf16.msra.mxu1 %v8596_v14  ;;  %6053 = vmatprep.subr.bf16.mxu0 %v8601_v30  ;;  %v5202_v4 = vadd.f32 %v11045_v22, %v5159_v0  ;;  %v5249_v34 = vadd.f32 %v11139_v1, %v5206_v63  ;;  %v8621_v22 = vld [vmem:[%s11514_s3 + $0x68] sm:$0xff]   ;;  %v8623_v1 = vld [vmem:[%s11514_s3 + $0x60] sm:$0xff]  }
 0x315   :  { %6080 = vmatprep.subr.bf16.mxu1 %v8604_v31  ;;  %v8622_v30 = vld [vmem:[%s11514_s3 + $0x28] sm:$0xff]  }
 0x316   :  { %v5245_v9 = vadd.f32 %v11101_v44, %v5202_v4  ;;  %v5292_v14 = vadd.f32 %v11141_v2, %v5249_v34  ;;  %v8624_v44 = vld [vmem:[%s11514_s3 + $0x20] sm:$0xff]  }
 0x317   :  { %6054 = vmatpush2.bf16.msra.mxu0 %v8599_v29 }
 0x318   :  { %6081 = vmatpush1.bf16.msra.mxu1 %v8602_v32  ;;  %6055 = vmatprep.subr.bf16.mxu0 %v8607_v28  ;;  %v5288_v31 = vadd.f32 %v11103_v46, %v5245_v9  ;;  %v5335_v57 = vadd.f32 %v11207_v43, %v5292_v14  ;;  %v8625_v46 = vld [vmem:[%s11514_s3 + $0x58] sm:$0xff]  }
 0x319   :  { %6082 = vmatprep.subr.bf16.mxu1 %v8610_v15  ;;  %v8626_v43 = vld [vmem:[%s11514_s3 + $0x18] sm:$0xff]  }
 0x31a   :  { %v5331_v2 = vadd.f32 %v11167_v16, %v5288_v31  ;;  %v5378_v6 = vadd.f32 %v11209_v47, %v5335_v57  ;;  %v8627_v16 = vld [vmem:[%s11514_s3 + $0x50] sm:$0xff]  }
 0x31b   :  { %6056 = vmatpush2.bf16.msra.mxu0 %v8605_v53  ;;  %v8638_v53 = vld [vmem:[%s11514_s3 + $0xa8] sm:$0xff]  }
 0x31c   :  { %6083 = vmatpush1.bf16.msra.mxu1 %v8608_v50  ;;  %6057 = vmatprep.subr.bf16.mxu0 %v8613_v45  ;;  %v5374_v24 = vadd.f32 %v11169_v19, %v5331_v2  ;;  %v5421_v26 = vadd.f32 %v11275_v27, %v5378_v6  ;;  %v8628_v19 = vld [vmem:[%s11514_s3 + $0x10] sm:$0xff]   ;;  %v8629_v27 = vld [vmem:[%s11514_s3 + $0x48] sm:$0xff]   ;;  %v8639_v50 = vld [vmem:[%s11514_s3 + $0xe0] sm:$0xff]  }
 0x31d   :  { %6084 = vmatprep.subr.bf16.mxu1 %v8616_v20  ;;  %v8641_v45 = vld [vmem:[%s11514_s3 + $0xd8] sm:$0xff]  }
 0x31e   :  { %v5417_v47 = vadd.f32 %v11235_v3, %v5374_v24  ;;  %v5464_v29 = vadd.f32 %v11277_v41, %v5421_v26  ;;  %v8630_v3 = vld [vmem:[%s11514_s3 + $0x8] sm:$0xff]   ;;  %v8642_v20 = vld [vmem:[%s11514_s3 + $0x98] sm:$0xff]  }
 0x31f   :  { %6058 = vmatpush2.bf16.msra.mxu0 %v8611_v11  ;;  %v8648_v11 = vld [vmem:[%s11514_s3 + $0x80] sm:$0xff]  }
 0x320   :  { %6085 = vmatpush1.bf16.msra.mxu1 %v8614_v59  ;;  %7335 = vmatprep.subr.bf16.mxu0 %v8617_v62  ;;  %v5460_v32 = vadd.f32 %v11237_v17, %v5417_v47  ;;  %v5507_v35 = vadd.f32 %v11335_v40, %v5464_v29  ;;  %v8631_v17 = vld [vmem:[%s11514_s3 + $0x40] sm:$0xff]   ;;  %v5588_v59 = vpop.f32.mrf.mxu1  ;;  %v859_v47 = vsub.s32 2, %v11149_v7 }
 0x321   :  { %v8632_v40 = vld [vmem:[%s11514_s3] sm:$0xff]  }
 0x322   :  { %6060 = vmatmul.mubr.bf16.vlgmr.msra.gmra.mxu0 %v8672_v33  ;;  %v5503_v41 = vadd.f32 %v11302_v13, %v5460_v32  ;;  %v5550_v28 = vadd.f32 %v11337_v23, %v5507_v35  ;;  %v8633_v13 = vld [vmem:[%s11514_s3 + $0xf8] sm:$0xff]   ;;  %v5590_v60 = vpop.f32.mrf.mxu1 }
 0x323   :  { %6103 = vmatmul.mubr.bf16.vlgmr.msra.gmra.mxu1 %v8673_v8  ;;  %7336 = vmatpush3.bf16.msra.mxu0 %v8618_v61  ;;  %v8634_v23 = vld [vmem:[%s11514_s3 + $0xb8] sm:$0xff]   ;;  %v5633_v61 = vpop.f32.mrf.mxu0 }
 0x324   :  { %6420 = vmatprep.mubr.bf16.mxu0 %v6122_v18  ;;  %7337 = vmatprep.subr.bf16.mxu0 %v8619_v5  ;;  %v5546_v15 = vadd.f32 %v11304_v48, %v5503_v41  ;;  %v6117_v37 = vmax.f32 %v5550_v28, 0.0  ;;  %v8635_v48 = vld [vmem:[%s11514_s3 + $0xf0] sm:$0xff]   ;;  %v5592_v62 = vpop.f32.mrf.mxu1 }
 0x325   :  { %7357 = vmatprep.subr.bf16.mxu1 %v8633_v13  ;;  %v5635_v63 = vpop.f32.mrf.mxu0 }
 0x326   :  { %v6113_v38 = vmax.f32 %v5546_v15, 0.0  ;;  %7358 = vmatpush3.bf16.msra.mxu1 %v8634_v23  ;;  %v5594_v12 = vpop.f32.mrf.mxu1 }
 0x327   :  { %7338 = vmatpush3.bf16.msra.mxu0 %v8620_v21  ;;  %7359 = vmatprep.subr.bf16.mxu1 %v8635_v48  ;;  %v5637_v18 = vpop.f32.mrf.mxu0 }
 0x328   :  { %7339 = vmatprep.subr.bf16.mxu0 %v8621_v22  ;;  %v6121_v39 = vpack.c.bf16 %v6117_v37, %v6113_v38  ;;  %v5674_v56 = vpop.f32.mrf.mxu1 }
 0x329   :  { %v5717_v33 = vpop.f32.mrf.mxu0 }
 0x32a   :  { %7360 = vmatpush3.bf16.msra.mxu1 %v8636_v42  ;;  %v5676_v0 = vpop.f32.mrf.mxu1 }
 0x32b   :  { %7340 = vmatpush3.bf16.msra.mxu0 %v8622_v30  ;;  %7361 = vmatprep.subr.bf16.mxu1 %v8637_v49  ;;  %v5719_v21 = vpop.f32.mrf.mxu0 }
 0x32c   :  { %7341 = vmatprep.subr.bf16.mxu0 %v8623_v1  ;;  %v5678_v5 = vpop.f32.mrf.mxu1 }
 0x32d   :  { %v5721_v22 = vpop.f32.mrf.mxu0 }
 0x32e   :  { %7362 = vmatpush3.bf16.msra.mxu1 %v8638_v53  ;;  %v5680_v4 = vpop.f32.mrf.mxu1 }
 0x32f   :  { %7342 = vmatpush3.bf16.msra.mxu0 %v8624_v44  ;;  %7363 = vmatprep.subr.bf16.mxu1 %v8639_v50  ;;  %v5723_v14 = vpop.f32.mrf.mxu0 }
 0x330   :  { %7343 = vmatprep.subr.bf16.mxu0 %v8625_v46  ;;  %v5760_v8 = vpop.f32.mrf.mxu1 }
 0x331   :  { %v5803_v31 = vpop.f32.mrf.mxu0 }
 0x332   :  { %7364 = vmatpush3.bf16.msra.mxu1 %v8640_v51  ;;  %v5762_v34 = vpop.f32.mrf.mxu1 }
 0x333   :  { %7344 = vmatpush3.bf16.msra.mxu0 %v8626_v43  ;;  %7365 = vmatprep.subr.bf16.mxu1 %v8641_v45  ;;  %v5805_v57 = vpop.f32.mrf.mxu0 }
 0x334   :  { %7345 = vmatprep.subr.bf16.mxu0 %v8627_v16  ;;  %v5764_v9 = vpop.f32.mrf.mxu1  ;;  %v863_v16 = vsub.s32 3, %v11149_v7 }
 0x335   :  { %v5807_v2 = vpop.f32.mrf.mxu0 }
 0x336   :  { %7366 = vmatpush3.bf16.msra.mxu1 %v8642_v20  ;;  %v5766_v30 = vpop.f32.mrf.mxu1  ;;  %v864_v32 = vrot.slane %v11181_v25, %v863_v16 }
 0x337   :  { %7346 = vmatpush3.bf16.msra.mxu0 %v8628_v19  ;;  %7367 = vmatprep.subr.bf16.mxu1 %v8643_v58  ;;  %v5809_v46 = vpop.f32.mrf.mxu0 }
 0x338   :  { %7347 = vmatprep.subr.bf16.mxu0 %v8629_v27  ;;  %v860_v27 = vrot.slane %v11181_v25, %v859_v47  ;;  %v5591_v41 = vadd.f32 %v5590_v60, %v864_v32 }
 0x33a   :  { %7368 = vmatpush3.bf16.msra.mxu1 %v8644_v36  ;;  %v5589_v28 = vadd.f32 %v5588_v59, %v860_v27  ;;  %v5634_v15 = vadd.f32 %v5633_v61, %v5591_v41 }
 0x33b   :  { %7348 = vmatpush3.bf16.msra.mxu0 %v8630_v3  ;;  %7369 = vmatprep.subr.bf16.mxu1 %v8645_v54 }
 0x33c   :  { %7349 = vmatprep.subr.bf16.mxu0 %v8631_v17  ;;  %v5593_v17 = vadd.f32 %v5592_v62, %v860_v27  ;;  %v5677_v23 = vadd.f32 %v5676_v0, %v5634_v15 }
 0x33e   :  { %7370 = vmatpush3.bf16.msra.mxu1 %v8646_v10  ;;  %v5636_v13 = vadd.f32 %v5635_v63, %v5593_v17  ;;  %v5720_v50 = vadd.f32 %v5719_v21, %v5677_v23 }
 0x33f   :  { %7350 = vmatpush3.bf16.msra.mxu0 %v8632_v40  ;;  %7371 = vmatprep.subr.bf16.mxu1 %v8647_v52  ;;  %v5632_v40 = vadd.f32 %v5631_v55, %v5589_v28 }
 0x340   :  { %v5679_v53 = vadd.f32 %v5678_v5, %v5636_v13  ;;  %v5763_v20 = vadd.f32 %v5762_v34, %v5720_v50 }
 0x341   :  { %v5675_v48 = vadd.f32 %v5674_v56, %v5632_v40 }
 0x342   :  { %6421 = vmatmul.mubr.bf16.vlgmr.msra.gmra.mxu0 %v6121_v39  ;;  %7372 = vmatpush3.bf16.msra.mxu1 %v8648_v11  ;;  %v5595_v39 = vadd.f32 %v5594_v12, %v864_v32  ;;  %v5722_v45 = vadd.f32 %v5721_v22, %v5679_v53  ;;  %v5806_v11 = vadd.f32 %v5805_v57, %v5763_v20 }
 0x343   :  { %v5846_v1 = vpop.f32.mrf.mxu1  ;;  %v5718_v51 = vadd.f32 %v5717_v33, %v5675_v48 }
 0x344   :  { %v5638_v49 = vadd.f32 %v5637_v18, %v5595_v39  ;;  %v5765_v52 = vadd.f32 %v5764_v9, %v5722_v45 }
 0x345   :  { %v5848_v44 = vpop.f32.mrf.mxu1  ;;  %v5761_v58 = vadd.f32 %v5760_v8, %v5718_v51  ;;  %v7302_v51 = vld [vmem:[%s11516_s4] ss:$0 sm:$0xff] }
 0x346   :  { %v5681_v25 = vadd.f32 %v5680_v4, %v5638_v49  ;;  %v5808_v62 = vadd.f32 %v5807_v2, %v5765_v52  ;;  %v5849_v12 = vadd.f32 %v5848_v44, %v5806_v11 }
 0x347   :  { %v5850_v6 = vpop.f32.mrf.mxu1  ;;  %v5804_v59 = vadd.f32 %v5803_v31, %v5761_v58 }
 0x348   :  { %v5724_v10 = vadd.f32 %v5723_v14, %v5681_v25  ;;  %v5851_v63 = vadd.f32 %v5850_v6, %v5808_v62 }
 0x349   :  { %v5852_v24 = vpop.f32.mrf.mxu1  ;;  %v5847_v55 = vadd.f32 %v5846_v1, %v5804_v59 }
 0x34a   :  { %v5767_v60 = vadd.f32 %v5766_v30, %v5724_v10 }
 0x34c   :  { %v5810_v0 = vadd.f32 %v5809_v46, %v5767_v60 }
 0x34e   :  { %v5853_v4 = vadd.f32 %v5852_v24, %v5810_v0 }
 0x362   :  { %v5889_v43 = vpop.f32.mrf.mxu0 }
 0x363   :  { %v5890_v18 = vadd.f32 %v5889_v43, %v5847_v55 }
 0x364   :  { %v5891_v29 = vpop.f32.mrf.mxu0 }
 0x365   :  { %v5892_v5 = vadd.f32 %v5891_v29, %v5849_v12 }
 0x366   :  { %v5893_v35 = vpop.f32.mrf.mxu0 }
 0x367   :  { %v5894_v33 = vadd.f32 %v5893_v35, %v5851_v63 }
 0x368   :  { %v5895_v37 = vpop.f32.mrf.mxu0 }
 0x369   :  { %v5896_v14 = vadd.f32 %v5895_v37, %v5853_v4 }
 0x383   :  { %v5932_v26 = vpop.f32.mrf.mxu1 }
 0x384   :  { %v5933_v8 = vadd.f32 %v5932_v26, %v5890_v18 }
 0x385   :  { %v5934_v19 = vpop.f32.mrf.mxu1 }
 0x386   :  { %v5935_v21 = vadd.f32 %v5934_v19, %v5892_v5 }
 0x387   :  { %v5936_v3 = vpop.f32.mrf.mxu1 }
 0x388   :  { %v5937_v9 = vadd.f32 %v5936_v3, %v5894_v33 }
 0x389   :  { %v5938_v38 = vpop.f32.mrf.mxu1 }
 0x38a   :  { %v5939_v44 = vadd.f32 %v5938_v38, %v5896_v14 }
 0x3a2   :  { %v5975_v7 = vpop.f32.mrf.mxu0 }
 0x3a3   :  { %v5976_v31 = vadd.f32 %v5975_v7, %v5933_v8 }
 0x3a4   :  { %v5977_v36 = vpop.f32.mrf.mxu0 }
 0x3a5   :  { %v5978_v57 = vadd.f32 %v5977_v36, %v5935_v21 }
 0x3a6   :  { %v5979_v56 = vpop.f32.mrf.mxu0 }
 0x3a7   :  { %v5980_v1 = vadd.f32 %v5979_v56, %v5937_v9 }
 0x3a8   :  { %v5981_v34 = vpop.f32.mrf.mxu0 }
 0x3a9   :  { %v5982_v29 = vadd.f32 %v5981_v34, %v5939_v44 }
 0x3c3   :  { %v6018_v42 = vpop.f32.mrf.mxu1 }
 0x3c4   :  { %v6019_v47 = vadd.f32 %v6018_v42, %v5976_v31 }
 0x3c5   :  { %v6020_v54 = vpop.f32.mrf.mxu1 }
 0x3c6   :  { %v6021_v16 = vadd.f32 %v6020_v54, %v5978_v57 }
 0x3c7   :  { %v6022_v61 = vpop.f32.mrf.mxu1 }
 0x3c8   :  { %v6023_v43 = vadd.f32 %v6022_v61, %v5980_v1 }
 0x3c9   :  { %v6024_v22 = vpop.f32.mrf.mxu1 }
 0x3ca   :  { %v6025_v27 = vadd.f32 %v6024_v22, %v5982_v29 }
 0x3e2   :  { %v6061_v30 = vpop.f32.mrf.mxu0 }
 0x3e3   :  { %v6104_v2 = vpop.f32.mrf.mxu1  ;;  %v6062_v32 = vadd.f32 %v6061_v30, %v6019_v47 }
 0x3e4   :  { %v6063_v46 = vpop.f32.mrf.mxu0 }
 0x3e5   :  { %v6106_v6 = vpop.f32.mrf.mxu1  ;;  %v6064_v24 = vadd.f32 %v6063_v46, %v6021_v16  ;;  %v6105_v15 = vadd.f32 %v6104_v2, %v6062_v32 }
 0x3e6   :  { %v6065_v19 = vpop.f32.mrf.mxu0 }
 0x3e7   :  { %v6108_v26 = vpop.f32.mrf.mxu1  ;;  %v6066_v35 = vadd.f32 %v6065_v19, %v6023_v43  ;;  %v6107_v3 = vadd.f32 %v6106_v6, %v6064_v24  ;;  %v6115_v23 = vmax.f32 %v6105_v15, 0.0 }
 0x3e8   :  { %v6067_v41 = vpop.f32.mrf.mxu0 }
 0x3e9   :  { %v6109_v28 = vadd.f32 %v6108_v26, %v6066_v35  ;;  %v6068_v17 = vadd.f32 %v6067_v41, %v6025_v27  ;;  %v6110_v40 = vpop.f32.mrf.mxu1  ;;  %v6116_v39 = vmax.f32 %v6107_v3, 0.0 }
 0x3eb   :  { %v6111_v37 = vadd.f32 %v6110_v40, %v6068_v17  ;;  %v6119_v38 = vmax.f32 %v6109_v28, 0.0 }
 0x3ed   :  { %v6120_v13 = vmax.f32 %v6111_v37, 0.0  ;;  %v6123_v7 = vpack.c.bf16 %v6119_v38, %v6115_v23 }
 0x3ef   :  { %v6124_v48 = vpack.c.bf16 %v6120_v13, %v6116_v39 }
 0x3f1   :  { %6461 = vmatprep.mubr.bf16.mxu1 %v6124_v48 }
 0x3f2   :  { %6462 = vmatmul.mubr.bf16.vlgmr.msra.gmra.mxu1 %v6123_v7 }
 0x402   :  { %v7351_v42 = vpop.f32.mrf.mxu0 }
 0x404   :  { %v7352_v49 = vpop.f32.mrf.mxu0 }
 0x405   :  { %v7353_v50 = vadd.f32 %v7352_v49, %v7351_v42 }
 0x406   :  { %v7354_v53 = vpop.f32.mrf.mxu0 }
 0x407   :  { %v6423_v58 = vadd.f32 %v7353_v50, %v7302_v51 }
 0x408   :  { %v7355_v25 = vpop.f32.mrf.mxu0 }
 0x409   :  { %v7356_v36 = vadd.f32 %v7355_v25, %v7354_v53 }
 0x40b   :  { %v6426_v59 = vadd.f32 %v7356_v36, %v7302_v51 }
 0x4b2   :  { %v7373_v45 = vpop.f32.mrf.mxu1 }
 0x4b4   :  { %v7374_v20 = vpop.f32.mrf.mxu1 }
 0x4b5   :  { %v7375_v54 = vadd.f32 %v7374_v20, %v7373_v45 }
 0x4b6   :  { %v7376_v10 = vpop.f32.mrf.mxu1 }
 0x4b7   :  { %v6464_v52 = vadd.f32 %v7375_v54, %v6423_v58 }
 0x4b8   :  { %v7377_v11 = vpop.f32.mrf.mxu1 }
 0x4b9   :  { %6471 = vst.msk [vmem:[%s11517_s5] sm:$0xff] %vm6470_vm0, %v6464_v52  ;;  %v7378_v60 = vadd.f32 %v7377_v11, %v7376_v10 }
 0x4bb   :  { %v6467_v62 = vadd.f32 %v7378_v60, %v6426_v59 }
 0x4bd   :  { %6472 = vst.msk [vmem:[%s11517_s5 + $0x8] sm:$0xff] %vm6470_vm0, %v6467_v62 }

</bundles_post_ra>
